<compile_context>
chip_gen: v7x
topology: tpu7x:2x2x1
jax: 0.10.0
libtpu: 0.0.40
codegen_flags: <defaults>
</compile_context>

<pallas_src>
import numpy as np
import jax
import jax.numpy as jnp
from jax import lax
from jax.experimental import pallas as pl
from jax.experimental.pallas import tpu as pltpu

# ----------------------- model hyper-parameters (defaults) -------------------
SUB_FRAME_RADIUS_H = 3
SUB_FRAME_RADIUS_W = 3
OUT_CHANNELS = 4
HIDDEN_SIZE_SCALE = 1
MULTI_PIXEL = False
USE_PIXEL_POS = False

SF_H = 2 * SUB_FRAME_RADIUS_H + 1            # 7
SF_W = 2 * SUB_FRAME_RADIUS_W + 1            # 7
SPATIAL = SF_H * SF_W                        # 49 (flattened depth slice)
HC = SF_H - 2                                # 5 (valid conv on H)
WC = SF_W - 2                                # 5 (valid conv on W)
HW = HC * WC                                 # 25
GRU_INPUT_SIZE = OUT_CHANNELS * HW           # 100
GRU_HIDDEN_SIZE = GRU_INPUT_SIZE * HIDDEN_SIZE_SCALE   # 100
OUTPUT_DIM = 1 if not MULTI_PIXEL else 9
PAD = 128                                    # lane-aligned padded F / Hd


# ------------------------------- fused Pallas kernel -------------------------
def _fused_kernel(x_ref, wsp_ref, wslab_ref, bslab_ref, o_ref, xp_ref):
    # x_ref    : (D+2, Bp, 49)  bf16  zero-padded depth slices, batch rows padded to Bp=8
    # wsp_ref  : (3, 49, 128)   bf16  per-depth-tap conv weights, columns in GRU (c,h,w) order
    # wslab_ref: (128, 896)     bf16  [ wih(0:384) | whh(384:768) | w1(768:896) ]
    # bslab_ref: (1, 1280)      f32   [ bc | bih | bhh | b1 | w2 | b2 ] in 128-lane segments
    # o_ref    : (Bp, OUTPUT_DIM) f32
    # xp_ref   : (T, Bp, 384)   f32   scratch: hoisted GRU input projections
    T = xp_ref.shape[0]
    Bp = xp_ref.shape[1]
    Hp = wslab_ref.shape[0]                                    # 128

    def mm(a, b):
        return jnp.dot(a, b, preferred_element_type=jnp.float32)

    # Static views into the packed slabs (all boundaries are 128-lane aligned).
    wih_view = wslab_ref.at[:, 0 * Hp:3 * Hp]
    whh_view = wslab_ref.at[:, 3 * Hp:6 * Hp]
    w1_view = wslab_ref.at[:, 6 * Hp:7 * Hp]
    bc = jnp.broadcast_to(bslab_ref[:, 0 * Hp:1 * Hp], (Bp, Hp))        # hoisted broadcasts
    bih = jnp.broadcast_to(bslab_ref[:, 1 * Hp:4 * Hp], (Bp, 3 * Hp))
    bhh = jnp.broadcast_to(bslab_ref[:, 4 * Hp:7 * Hp], (Bp, 3 * Hp))
    b1 = bslab_ref[:, 7 * Hp:8 * Hp]
    w2 = bslab_ref[:, 8 * Hp:9 * Hp]
    b2 = bslab_ref[:, 9 * Hp:9 * Hp + 1]

    # Phase 1: Conv3d(+bias,+ReLU, dropout=0) and the GRU input projection for
    # all timesteps. 3 depth taps -> 3 tiny MXU matmuls; result never leaves VMEM.
    for t in range(T):                                          # static -> fully unrolled
        acc = (mm(x_ref[2 * t + 0], wsp_ref[0])
               + mm(x_ref[2 * t + 1], wsp_ref[1])
               + mm(x_ref[2 * t + 2], wsp_ref[2]))              # (Bp, 128) f32
        xt = jnp.maximum(acc + bc, 0.0).astype(jnp.bfloat16)    # conv output, GRU order
        xp_ref[t] = mm(xt, wih_view[...]) + bih                 # (Bp, 384) f32

    # Phase 2: GRU recurrence (gate order r, z, n). One MXU push per step; whh
    # is streamed from VMEM each step rather than held live across the unroll.
    h = jnp.zeros((Bp, Hp), jnp.float32)
    for t in range(T):
        xpt = xp_ref[t]                                         # (Bp, 384) f32
        hp = mm(h.astype(jnp.bfloat16), whh_view[...]) + bhh    # (Bp, 384) f32
        rz = jax.nn.sigmoid(xpt[:, :2 * Hp] + hp[:, :2 * Hp])   # merged r|z sigmoid
        r = rz[:, :Hp]
        z = rz[:, Hp:]
        n = jnp.tanh(xpt[:, 2 * Hp:] + r * hp[:, 2 * Hp:])
        h = n + z * (h - n)                                     # == (1-z)*n + z*h

    # Phase 3: dense_output: Linear(Hd, Hd) -> ReLU -> Linear(Hd, 1).
    hid = jnp.maximum(mm(h.astype(jnp.bfloat16), w1_view[...]) + b1, 0.0)
    o_ref[...] = jnp.sum(hid * w2, axis=-1, keepdims=True) + b2


# ------------------------------- wrapper (plain JAX) --------------------------
@jax.jit
def pixelwise_conv_gru_forward(pixel_position, sub_dsi, kparams):
    del pixel_position                                           # use_pixel_pos = False
    B, D = sub_dsi.shape[:2]
    T = (D + 2 - 3) // 2 + 1                                     # stride-2 depth conv
    Bp = max(8, ((B + 7) // 8) * 8)                              # sublane-aligned pixel rows

    # Minimal prologue: pad batch->Bp and depth by (1,1), make depth-major,
    # flatten the 7x7 frame. (~6 KB of data, no im2col / HBM round-trip.)
    x = jnp.pad(sub_dsi, ((0, Bp - B), (1, 1), (0, 0), (0, 0)))   # (Bp, D+2, 7, 7)
    x = x.transpose(1, 0, 2, 3).reshape(D + 2, Bp, SPATIAL)
    x = x.astype(jnp.bfloat16)

    vmem = pl.BlockSpec(memory_space=pltpu.MemorySpace.VMEM)
    out = pl.pallas_call(
        _fused_kernel,
        out_shape=jax.ShapeDtypeStruct((Bp, OUTPUT_DIM), jnp.float32),
        in_specs=[vmem] * 4,
        out_specs=vmem,
        scratch_shapes=[pltpu.VMEM((T, Bp, 3 * PAD), jnp.float32)],
    )(x, kparams["wsp"], kparams["wslab"], kparams["bslab"])

    out = out[:B]
    if not MULTI_PIXEL:
        out = out[:, 0]                                          # squeeze(dim=-1) -> (B,)
    return out


# --------------------- kernel-side parameter preparation ---------------------
def prepare_params(p):
    """Logical (PyTorch-layout) params -> packed / padded / bf16 kernel params."""
    C, Hp = OUT_CHANNELS, PAD

    # Spatial scatter matrix: S[kh*3+kw, (h+kh)*7+(w+kw), h*5+w] = 1
    S = np.zeros((9, SPATIAL, HW), np.float32)
    for kh in range(3):
        for kw in range(3):
            for h in range(HC):
                for w in range(WC):
                    S[kh * 3 + kw, (h + kh) * SF_W + (w + kw), h * WC + w] = 1.0
    S = jnp.asarray(S)
    # wsp[kd, s, c*25 + h*5 + w] = conv_w[c, kd, kh, kw] with s=(h+kh)*7+(w+kw)
    w9 = p["conv_w"].reshape(C, 3, 9)                            # (c, kd, kh*3+kw)
    wsp = jnp.einsum("cdq,qsp->dscp", w9, S).reshape(3, SPATIAL, C * HW)
    wsp = jnp.pad(wsp, ((0, 0), (0, 0), (0, Hp - C * HW)))       # (3, 49, 128)

    def padmat(w):
        return jnp.pad(w, ((0, Hp - w.shape[0]), (0, Hp - w.shape[1])))

    def padvec(b):
        return jnp.pad(b, (0, Hp - b.shape[0]))

    # Gate order (r, z, n) preserved from PyTorch; weights stored (in, out).
    wih = jnp.concatenate([padmat(p["w_ir"]), padmat(p["w_iz"]), padmat(p["w_in"])], axis=1)
    whh = jnp.concatenate([padmat(p["w_hr"]), padmat(p["w_hz"]), padmat(p["w_hn"])], axis=1)
    wslab = jnp.concatenate([wih, whh, padmat(p["w1"])], axis=1).astype(jnp.bfloat16)  # (128, 896)

    bc = padvec(jnp.repeat(p["conv_b"], HW))
    bih = jnp.concatenate([padvec(p["b_ir"]), padvec(p["b_iz"]), padvec(p["b_in"])])
    bhh = jnp.concatenate([padvec(p["b_hr"]), padvec(p["b_hz"]), padvec(p["b_hn"])])
    bslab = jnp.concatenate([bc, bih, bhh, padvec(p["b1"]), padvec(p["w2"]),
                             jnp.pad(p["b2"], (0, Hp - 1))]).reshape(1, 10 * Hp)
    bslab = bslab.astype(jnp.float32)

    return dict(wsp=wsp.astype(jnp.bfloat16), wslab=wslab, bslab=bslab)


# ---------------------- deterministic parameter initialization ---------------
def init_params(key):
    C, F, Hd = OUT_CHANNELS, GRU_INPUT_SIZE, GRU_HIDDEN_SIZE
    keys = jax.random.split(key, 18)

    def unif(k, shape, fan_in):
        bound = 1.0 / (fan_in ** 0.5)
        return jax.random.uniform(k, shape, jnp.float32, -bound, bound)

    return dict(
        conv_w=unif(keys[0], (C, 3, 3, 3), 27),     # torch Conv3d weight (C,1,3,3,3), squeezed
        conv_b=unif(keys[1], (C,), 27),
        # GRU layer (gate order r, z, n), stored pre-transposed (in, out)
        w_ir=unif(keys[2], (F, Hd), Hd), w_iz=unif(keys[3], (F, Hd), Hd), w_in=unif(keys[4], (F, Hd), Hd),
        w_hr=unif(keys[5], (Hd, Hd), Hd), w_hz=unif(keys[6], (Hd, Hd), Hd), w_hn=unif(keys[7], (Hd, Hd), Hd),
        b_ir=unif(keys[8], (Hd,), Hd), b_iz=unif(keys[9], (Hd,), Hd), b_in=unif(keys[10], (Hd,), Hd),
        b_hr=unif(keys[11], (Hd,), Hd), b_hz=unif(keys[12], (Hd,), Hd), b_hn=unif(keys[13], (Hd,), Hd),
        # dense_output: Linear(Hd, Hd) -> ReLU -> Linear(Hd, 1)
        w1=unif(keys[14], (Hd, Hd), Hd), b1=unif(keys[15], (Hd,), Hd),
        w2=unif(keys[16], (Hd,), Hd), b2=unif(keys[17], (1,), Hd),
    )


# --------------------------- pure-JAX reference (self-check) -----------------
def reference_forward(pixel_position, sub_dsi, params):
    del pixel_position
    B, D = sub_dsi.shape[:2]
    T = (D + 2 - 3) // 2 + 1
    x_pad = jnp.pad(sub_dsi, ((0, 0), (1, 1), (0, 0), (0, 0)))
    taps = []
    for kd in range(3):
        xd = lax.slice_in_dim(x_pad, kd, kd + 2 * (T - 1) + 1, stride=2, axis=1)
        for kh in range(3):
            for kw in range(3):
                taps.append(xd[:, :, kh:kh + HC, kw:kw + WC])
    patches = jnp.stack(taps, axis=-1)                            # (B, T, HC, WC, 27)
    wmat = params["conv_w"].reshape(OUT_CHANNELS, 27).T           # (27, C)
    conv = jnp.maximum(jnp.einsum("bthwk,kc->bthwc", patches, wmat) + params["conv_b"], 0.0)
    x = conv.transpose(0, 1, 4, 2, 3).reshape(B, T, GRU_INPUT_SIZE)   # (c, h, w) order
    h = jnp.zeros((B, GRU_HIDDEN_SIZE), jnp.float32)
    for t in range(T):
        xt = x[:, t]
        r = jax.nn.sigmoid(xt @ params["w_ir"] + params["b_ir"] + h @ params["w_hr"] + params["b_hr"])
        z = jax.nn.sigmoid(xt @ params["w_iz"] + params["b_iz"] + h @ params["w_hz"] + params["b_hz"])
        n = jnp.tanh(xt @ params["w_in"] + params["b_in"] + r * (h @ params["w_hn"] + params["b_hn"]))
        h = (1.0 - z) * n + z * h
    hid = jnp.maximum(h @ params["w1"] + params["b1"], 0.0)
    out = hid @ params["w2"].reshape(-1, 1) + params["b2"]        # (B, 1)
    return out[:, 0] if not MULTI_PIXEL else out


# ------------------------------------ main ------------------------------------
if __name__ == "__main__":
    key = jax.random.PRNGKey(0)
    k_param, k_dsi, k_pos = jax.random.split(key, 3)

    B, D = 2, 16                                      # batch, depth levels of the sub-DSI
    sub_dsi = jax.random.uniform(k_dsi, (B, D, SF_H, SF_W), jnp.float32)
    pixel_position = jax.random.uniform(k_pos, (B, 2), jnp.float32)

    params = init_params(k_param)
    kparams = prepare_params(params)                  # one-time packed/padded bf16 weights

    out = pixelwise_conv_gru_forward(pixel_position, sub_dsi, kparams)
    out = jax.block_until_ready(out)
    assert out.shape == (B,)

    ref = reference_forward(pixel_position, sub_dsi, params)
    # bf16 matmul operands (per perf review) -> compare against the f32 reference
    # at a bf16-appropriate tolerance.
    if not jnp.allclose(out, ref, rtol=1e-2, atol=1e-2):
        raise AssertionError(f"mismatch: pallas={out} ref={ref}")

    print("KERNEL_OK")
</pallas_src>

<mosaic_0001>
module attributes {stable_mosaic.version = 11 : i64} {
  func.func @_fused_kernel(%arg0: memref<18x8x49xbf16, #tpu.memory_space<vmem>>, %arg1: memref<3x49x128xbf16, #tpu.memory_space<vmem>>, %arg2: memref<128x896xbf16, #tpu.memory_space<vmem>>, %arg3: memref<1x1280xf32, #tpu.memory_space<vmem>>, %arg4: memref<8x1xf32, #tpu.memory_space<vmem>>, %arg5: memref<8x8x384xf32, #tpu.memory_space<vmem>>) attributes {dimension_semantics = [], scalar_prefetch = 0 : i64, scratch_operands = 1 : i64, tpu.core_type = #tpu.core_type<tc>} {
    %c0 = arith.constant 0 : index
    %c0_0 = arith.constant 0 : index
    %0 = vector.load %arg3[%c0, %c0_0] : memref<1x1280xf32, #tpu.memory_space<vmem>>, vector<1x128xf32>
    %1 = vector.shape_cast %0 : vector<1x128xf32> to vector<1x128xf32>
    %2 = vector.broadcast %1 : vector<1x128xf32> to vector<8x128xf32>
    %c0_1 = arith.constant 0 : index
    %c128 = arith.constant 128 : index
    %3 = vector.load %arg3[%c0_1, %c128] : memref<1x1280xf32, #tpu.memory_space<vmem>>, vector<1x384xf32>
    %4 = vector.shape_cast %3 : vector<1x384xf32> to vector<1x384xf32>
    %5 = vector.broadcast %4 : vector<1x384xf32> to vector<8x384xf32>
    %c0_2 = arith.constant 0 : index
    %c512 = arith.constant 512 : index
    %6 = vector.load %arg3[%c0_2, %c512] : memref<1x1280xf32, #tpu.memory_space<vmem>>, vector<1x384xf32>
    %7 = vector.shape_cast %6 : vector<1x384xf32> to vector<1x384xf32>
    %8 = vector.broadcast %7 : vector<1x384xf32> to vector<8x384xf32>
    %c0_3 = arith.constant 0 : index
    %c896 = arith.constant 896 : index
    %9 = vector.load %arg3[%c0_3, %c896] : memref<1x1280xf32, #tpu.memory_space<vmem>>, vector<1x128xf32>
    %c0_4 = arith.constant 0 : index
    %c1024 = arith.constant 1024 : index
    %10 = vector.load %arg3[%c0_4, %c1024] : memref<1x1280xf32, #tpu.memory_space<vmem>>, vector<1x128xf32>
    %c0_5 = arith.constant 0 : index
    %c1152 = arith.constant 1152 : index
    %11 = vector.load %arg3[%c0_5, %c1152] : memref<1x1280xf32, #tpu.memory_space<vmem>>, vector<1x1xf32>
    %c0_6 = arith.constant 0 : index
    %c0_7 = arith.constant 0 : index
    %c0_8 = arith.constant 0 : index
    %12 = vector.load %arg0[%c0_6, %c0_7, %c0_8] : memref<18x8x49xbf16, #tpu.memory_space<vmem>>, vector<1x8x49xbf16>
    %13 = vector.shape_cast %12 : vector<1x8x49xbf16> to vector<8x49xbf16>
    %c0_9 = arith.constant 0 : index
    %c0_10 = arith.constant 0 : index
    %c0_11 = arith.constant 0 : index
    %14 = vector.load %arg1[%c0_9, %c0_10, %c0_11] : memref<3x49x128xbf16, #tpu.memory_space<vmem>>, vector<1x49x128xbf16>
    %15 = vector.shape_cast %14 : vector<1x49x128xbf16> to vector<49x128xbf16>
    %cst = arith.constant dense<0.000000e+00> : vector<8x128xf32>
    %16 = tpu.matmul %13, %15, %cst {dimension_numbers = #tpu.dot_dimension_numbers<[1], [0], [0], [1], [0, 0, 1, 1], [], []>} : vector<8x49xbf16>, vector<49x128xbf16>, vector<8x128xf32> -> vector<8x128xf32>
    %c1 = arith.constant 1 : index
    %c0_12 = arith.constant 0 : index
    %c0_13 = arith.constant 0 : index
    %17 = vector.load %arg0[%c1, %c0_12, %c0_13] : memref<18x8x49xbf16, #tpu.memory_space<vmem>>, vector<1x8x49xbf16>
    %18 = vector.shape_cast %17 : vector<1x8x49xbf16> to vector<8x49xbf16>
    %c1_14 = arith.constant 1 : index
    %c0_15 = arith.constant 0 : index
    %c0_16 = arith.constant 0 : index
    %19 = vector.load %arg1[%c1_14, %c0_15, %c0_16] : memref<3x49x128xbf16, #tpu.memory_space<vmem>>, vector<1x49x128xbf16>
    %20 = vector.shape_cast %19 : vector<1x49x128xbf16> to vector<49x128xbf16>
    %cst_17 = arith.constant dense<0.000000e+00> : vector<8x128xf32>
    %21 = tpu.matmul %18, %20, %cst_17 {dimension_numbers = #tpu.dot_dimension_numbers<[1], [0], [0], [1], [0, 0, 1, 1], [], []>} : vector<8x49xbf16>, vector<49x128xbf16>, vector<8x128xf32> -> vector<8x128xf32>
    %22 = arith.addf %16, %21 : vector<8x128xf32>
    %c2 = arith.constant 2 : index
    %c0_18 = arith.constant 0 : index
    %c0_19 = arith.constant 0 : index
    %23 = vector.load %arg0[%c2, %c0_18, %c0_19] : memref<18x8x49xbf16, #tpu.memory_space<vmem>>, vector<1x8x49xbf16>
    %24 = vector.shape_cast %23 : vector<1x8x49xbf16> to vector<8x49xbf16>
    %c2_20 = arith.constant 2 : index
    %c0_21 = arith.constant 0 : index
    %c0_22 = arith.constant 0 : index
    %25 = vector.load %arg1[%c2_20, %c0_21, %c0_22] : memref<3x49x128xbf16, #tpu.memory_space<vmem>>, vector<1x49x128xbf16>
    %26 = vector.shape_cast %25 : vector<1x49x128xbf16> to vector<49x128xbf16>
    %cst_23 = arith.constant dense<0.000000e+00> : vector<8x128xf32>
    %27 = tpu.matmul %24, %26, %cst_23 {dimension_numbers = #tpu.dot_dimension_numbers<[1], [0], [0], [1], [0, 0, 1, 1], [], []>} : vector<8x49xbf16>, vector<49x128xbf16>, vector<8x128xf32> -> vector<8x128xf32>
    %28 = arith.addf %22, %27 : vector<8x128xf32>
    %29 = arith.addf %28, %2 : vector<8x128xf32>
    %cst_24 = arith.constant 0.000000e+00 : f32
    %30 = vector.broadcast %cst_24 : f32 to vector<8x128xf32>
    %31 = arith.maximumf %29, %30 : vector<8x128xf32>
    %32 = arith.truncf %31 : vector<8x128xf32> to vector<8x128xbf16>
    %c0_25 = arith.constant 0 : index
    %c0_26 = arith.constant 0 : index
    %33 = vector.load %arg2[%c0_25, %c0_26] : memref<128x896xbf16, #tpu.memory_space<vmem>>, vector<128x384xbf16>
    %cst_27 = arith.constant dense<0.000000e+00> : vector<8x384xf32>
    %34 = tpu.matmul %32, %33, %cst_27 {dimension_numbers = #tpu.dot_dimension_numbers<[1], [0], [0], [1], [0, 0, 1, 1], [], []>} : vector<8x128xbf16>, vector<128x384xbf16>, vector<8x384xf32> -> vector<8x384xf32>
    %35 = arith.addf %34, %5 : vector<8x384xf32>
    %c0_28 = arith.constant 0 : index
    %c0_29 = arith.constant 0 : index
    %c0_30 = arith.constant 0 : index
    %36 = vector.load %arg5[%c0_28, %c0_29, %c0_30] : memref<8x8x384xf32, #tpu.memory_space<vmem>>, vector<1x8x384xf32>
    %37 = vector.shape_cast %36 : vector<1x8x384xf32> to vector<8x384xf32>
    %38 = vector.shape_cast %35 : vector<8x384xf32> to vector<1x8x384xf32>
    tpu.vector_store %arg5[%c0_28, %c0_29, %c0_30], %38 {strides = array<i32>} : memref<8x8x384xf32, #tpu.memory_space<vmem>>, vector<1x8x384xf32>,
    %c2_31 = arith.constant 2 : index
    %c0_32 = arith.constant 0 : index
    %c0_33 = arith.constant 0 : index
    %39 = vector.load %arg0[%c2_31, %c0_32, %c0_33] : memref<18x8x49xbf16, #tpu.memory_space<vmem>>, vector<1x8x49xbf16>
    %40 = vector.shape_cast %39 : vector<1x8x49xbf16> to vector<8x49xbf16>
    %c0_34 = arith.constant 0 : index
    %c0_35 = arith.constant 0 : index
    %c0_36 = arith.constant 0 : index
    %41 = vector.load %arg1[%c0_34, %c0_35, %c0_36] : memref<3x49x128xbf16, #tpu.memory_space<vmem>>, vector<1x49x128xbf16>
    %42 = vector.shape_cast %41 : vector<1x49x128xbf16> to vector<49x128xbf16>
    %cst_37 = arith.constant dense<0.000000e+00> : vector<8x128xf32>
    %43 = tpu.matmul %40, %42, %cst_37 {dimension_numbers = #tpu.dot_dimension_numbers<[1], [0], [0], [1], [0, 0, 1, 1], [], []>} : vector<8x49xbf16>, vector<49x128xbf16>, vector<8x128xf32> -> vector<8x128xf32>
    %c3 = arith.constant 3 : index
    %c0_38 = arith.constant 0 : index
    %c0_39 = arith.constant 0 : index
    %44 = vector.load %arg0[%c3, %c0_38, %c0_39] : memref<18x8x49xbf16, #tpu.memory_space<vmem>>, vector<1x8x49xbf16>
    %45 = vector.shape_cast %44 : vector<1x8x49xbf16> to vector<8x49xbf16>
    %c1_40 = arith.constant 1 : index
    %c0_41 = arith.constant 0 : index
    %c0_42 = arith.constant 0 : index
    %46 = vector.load %arg1[%c1_40, %c0_41, %c0_42] : memref<3x49x128xbf16, #tpu.memory_space<vmem>>, vector<1x49x128xbf16>
    %47 = vector.shape_cast %46 : vector<1x49x128xbf16> to vector<49x128xbf16>
    %cst_43 = arith.constant dense<0.000000e+00> : vector<8x128xf32>
    %48 = tpu.matmul %45, %47, %cst_43 {dimension_numbers = #tpu.dot_dimension_numbers<[1], [0], [0], [1], [0, 0, 1, 1], [], []>} : vector<8x49xbf16>, vector<49x128xbf16>, vector<8x128xf32> -> vector<8x128xf32>
    %49 = arith.addf %43, %48 : vector<8x128xf32>
    %c4 = arith.constant 4 : index
    %c0_44 = arith.constant 0 : index
    %c0_45 = arith.constant 0 : index
    %50 = vector.load %arg0[%c4, %c0_44, %c0_45] : memref<18x8x49xbf16, #tpu.memory_space<vmem>>, vector<1x8x49xbf16>
    %51 = vector.shape_cast %50 : vector<1x8x49xbf16> to vector<8x49xbf16>
    %c2_46 = arith.constant 2 : index
    %c0_47 = arith.constant 0 : index
    %c0_48 = arith.constant 0 : index
    %52 = vector.load %arg1[%c2_46, %c0_47, %c0_48] : memref<3x49x128xbf16, #tpu.memory_space<vmem>>, vector<1x49x128xbf16>
    %53 = vector.shape_cast %52 : vector<1x49x128xbf16> to vector<49x128xbf16>
    %cst_49 = arith.constant dense<0.000000e+00> : vector<8x128xf32>
    %54 = tpu.matmul %51, %53, %cst_49 {dimension_numbers = #tpu.dot_dimension_numbers<[1], [0], [0], [1], [0, 0, 1, 1], [], []>} : vector<8x49xbf16>, vector<49x128xbf16>, vector<8x128xf32> -> vector<8x128xf32>
    %55 = arith.addf %49, %54 : vector<8x128xf32>
    %56 = arith.addf %55, %2 : vector<8x128xf32>
    %cst_50 = arith.constant 0.000000e+00 : f32
    %57 = vector.broadcast %cst_50 : f32 to vector<8x128xf32>
    %58 = arith.maximumf %56, %57 : vector<8x128xf32>
    %59 = arith.truncf %58 : vector<8x128xf32> to vector<8x128xbf16>
    %c0_51 = arith.constant 0 : index
    %c0_52 = arith.constant 0 : index
    %60 = vector.load %arg2[%c0_51, %c0_52] : memref<128x896xbf16, #tpu.memory_space<vmem>>, vector<128x384xbf16>
    %cst_53 = arith.constant dense<0.000000e+00> : vector<8x384xf32>
    %61 = tpu.matmul %59, %60, %cst_53 {dimension_numbers = #tpu.dot_dimension_numbers<[1], [0], [0], [1], [0, 0, 1, 1], [], []>} : vector<8x128xbf16>, vector<128x384xbf16>, vector<8x384xf32> -> vector<8x384xf32>
    %62 = arith.addf %61, %5 : vector<8x384xf32>
    %c1_54 = arith.constant 1 : index
    %c0_55 = arith.constant 0 : index
    %c0_56 = arith.constant 0 : index
    %63 = vector.load %arg5[%c1_54, %c0_55, %c0_56] : memref<8x8x384xf32, #tpu.memory_space<vmem>>, vector<1x8x384xf32>
    %64 = vector.shape_cast %63 : vector<1x8x384xf32> to vector<8x384xf32>
    %65 = vector.shape_cast %62 : vector<8x384xf32> to vector<1x8x384xf32>
    tpu.vector_store %arg5[%c1_54, %c0_55, %c0_56], %65 {strides = array<i32>} : memref<8x8x384xf32, #tpu.memory_space<vmem>>, vector<1x8x384xf32>,
    %c4_57 = arith.constant 4 : index
    %c0_58 = arith.constant 0 : index
    %c0_59 = arith.constant 0 : index
    %66 = vector.load %arg0[%c4_57, %c0_58, %c0_59] : memref<18x8x49xbf16, #tpu.memory_space<vmem>>, vector<1x8x49xbf16>
    %67 = vector.shape_cast %66 : vector<1x8x49xbf16> to vector<8x49xbf16>
    %c0_60 = arith.constant 0 : index
    %c0_61 = arith.constant 0 : index
    %c0_62 = arith.constant 0 : index
    %68 = vector.load %arg1[%c0_60, %c0_61, %c0_62] : memref<3x49x128xbf16, #tpu.memory_space<vmem>>, vector<1x49x128xbf16>
    %69 = vector.shape_cast %68 : vector<1x49x128xbf16> to vector<49x128xbf16>
    %cst_63 = arith.constant dense<0.000000e+00> : vector<8x128xf32>
    %70 = tpu.matmul %67, %69, %cst_63 {dimension_numbers = #tpu.dot_dimension_numbers<[1], [0], [0], [1], [0, 0, 1, 1], [], []>} : vector<8x49xbf16>, vector<49x128xbf16>, vector<8x128xf32> -> vector<8x128xf32>
    %c5 = arith.constant 5 : index
    %c0_64 = arith.constant 0 : index
    %c0_65 = arith.constant 0 : index
    %71 = vector.load %arg0[%c5, %c0_64, %c0_65] : memref<18x8x49xbf16, #tpu.memory_space<vmem>>, vector<1x8x49xbf16>
    %72 = vector.shape_cast %71 : vector<1x8x49xbf16> to vector<8x49xbf16>
    %c1_66 = arith.constant 1 : index
    %c0_67 = arith.constant 0 : index
    %c0_68 = arith.constant 0 : index
    %73 = vector.load %arg1[%c1_66, %c0_67, %c0_68] : memref<3x49x128xbf16, #tpu.memory_space<vmem>>, vector<1x49x128xbf16>
    %74 = vector.shape_cast %73 : vector<1x49x128xbf16> to vector<49x128xbf16>
    %cst_69 = arith.constant dense<0.000000e+00> : vector<8x128xf32>
    %75 = tpu.matmul %72, %74, %cst_69 {dimension_numbers = #tpu.dot_dimension_numbers<[1], [0], [0], [1], [0, 0, 1, 1], [], []>} : vector<8x49xbf16>, vector<49x128xbf16>, vector<8x128xf32> -> vector<8x128xf32>
    %76 = arith.addf %70, %75 : vector<8x128xf32>
    %c6 = arith.constant 6 : index
    %c0_70 = arith.constant 0 : index
    %c0_71 = arith.constant 0 : index
    %77 = vector.load %arg0[%c6, %c0_70, %c0_71] : memref<18x8x49xbf16, #tpu.memory_space<vmem>>, vector<1x8x49xbf16>
    %78 = vector.shape_cast %77 : vector<1x8x49xbf16> to vector<8x49xbf16>
    %c2_72 = arith.constant 2 : index
    %c0_73 = arith.constant 0 : index
    %c0_74 = arith.constant 0 : index
    %79 = vector.load %arg1[%c2_72, %c0_73, %c0_74] : memref<3x49x128xbf16, #tpu.memory_space<vmem>>, vector<1x49x128xbf16>
    %80 = vector.shape_cast %79 : vector<1x49x128xbf16> to vector<49x128xbf16>
    %cst_75 = arith.constant dense<0.000000e+00> : vector<8x128xf32>
    %81 = tpu.matmul %78, %80, %cst_75 {dimension_numbers = #tpu.dot_dimension_numbers<[1], [0], [0], [1], [0, 0, 1, 1], [], []>} : vector<8x49xbf16>, vector<49x128xbf16>, vector<8x128xf32> -> vector<8x128xf32>
    %82 = arith.addf %76, %81 : vector<8x128xf32>
    %83 = arith.addf %82, %2 : vector<8x128xf32>
    %cst_76 = arith.constant 0.000000e+00 : f32
    %84 = vector.broadcast %cst_76 : f32 to vector<8x128xf32>
    %85 = arith.maximumf %83, %84 : vector<8x128xf32>
    %86 = arith.truncf %85 : vector<8x128xf32> to vector<8x128xbf16>
    %c0_77 = arith.constant 0 : index
    %c0_78 = arith.constant 0 : index
    %87 = vector.load %arg2[%c0_77, %c0_78] : memref<128x896xbf16, #tpu.memory_space<vmem>>, vector<128x384xbf16>
    %cst_79 = arith.constant dense<0.000000e+00> : vector<8x384xf32>
    %88 = tpu.matmul %86, %87, %cst_79 {dimension_numbers = #tpu.dot_dimension_numbers<[1], [0], [0], [1], [0, 0, 1, 1], [], []>} : vector<8x128xbf16>, vector<128x384xbf16>, vector<8x384xf32> -> vector<8x384xf32>
    %89 = arith.addf %88, %5 : vector<8x384xf32>
    %c2_80 = arith.constant 2 : index
    %c0_81 = arith.constant 0 : index
    %c0_82 = arith.constant 0 : index
    %90 = vector.load %arg5[%c2_80, %c0_81, %c0_82] : memref<8x8x384xf32, #tpu.memory_space<vmem>>, vector<1x8x384xf32>
    %91 = vector.shape_cast %90 : vector<1x8x384xf32> to vector<8x384xf32>
    %92 = vector.shape_cast %89 : vector<8x384xf32> to vector<1x8x384xf32>
    tpu.vector_store %arg5[%c2_80, %c0_81, %c0_82], %92 {strides = array<i32>} : memref<8x8x384xf32, #tpu.memory_space<vmem>>, vector<1x8x384xf32>,
    %c6_83 = arith.constant 6 : index
    %c0_84 = arith.constant 0 : index
    %c0_85 = arith.constant 0 : index
    %93 = vector.load %arg0[%c6_83, %c0_84, %c0_85] : memref<18x8x49xbf16, #tpu.memory_space<vmem>>, vector<1x8x49xbf16>
    %94 = vector.shape_cast %93 : vector<1x8x49xbf16> to vector<8x49xbf16>
    %c0_86 = arith.constant 0 : index
    %c0_87 = arith.constant 0 : index
    %c0_88 = arith.constant 0 : index
    %95 = vector.load %arg1[%c0_86, %c0_87, %c0_88] : memref<3x49x128xbf16, #tpu.memory_space<vmem>>, vector<1x49x128xbf16>
    %96 = vector.shape_cast %95 : vector<1x49x128xbf16> to vector<49x128xbf16>
    %cst_89 = arith.constant dense<0.000000e+00> : vector<8x128xf32>
    %97 = tpu.matmul %94, %96, %cst_89 {dimension_numbers = #tpu.dot_dimension_numbers<[1], [0], [0], [1], [0, 0, 1, 1], [], []>} : vector<8x49xbf16>, vector<49x128xbf16>, vector<8x128xf32> -> vector<8x128xf32>
    %c7 = arith.constant 7 : index
    %c0_90 = arith.constant 0 : index
    %c0_91 = arith.constant 0 : index
    %98 = vector.load %arg0[%c7, %c0_90, %c0_91] : memref<18x8x49xbf16, #tpu.memory_space<vmem>>, vector<1x8x49xbf16>
    %99 = vector.shape_cast %98 : vector<1x8x49xbf16> to vector<8x49xbf16>
    %c1_92 = arith.constant 1 : index
    %c0_93 = arith.constant 0 : index
    %c0_94 = arith.constant 0 : index
    %100 = vector.load %arg1[%c1_92, %c0_93, %c0_94] : memref<3x49x128xbf16, #tpu.memory_space<vmem>>, vector<1x49x128xbf16>
    %101 = vector.shape_cast %100 : vector<1x49x128xbf16> to vector<49x128xbf16>
    %cst_95 = arith.constant dense<0.000000e+00> : vector<8x128xf32>
    %102 = tpu.matmul %99, %101, %cst_95 {dimension_numbers = #tpu.dot_dimension_numbers<[1], [0], [0], [1], [0, 0, 1, 1], [], []>} : vector<8x49xbf16>, vector<49x128xbf16>, vector<8x128xf32> -> vector<8x128xf32>
    %103 = arith.addf %97, %102 : vector<8x128xf32>
    %c8 = arith.constant 8 : index
    %c0_96 = arith.constant 0 : index
    %c0_97 = arith.constant 0 : index
    %104 = vector.load %arg0[%c8, %c0_96, %c0_97] : memref<18x8x49xbf16, #tpu.memory_space<vmem>>, vector<1x8x49xbf16>
    %105 = vector.shape_cast %104 : vector<1x8x49xbf16> to vector<8x49xbf16>
    %c2_98 = arith.constant 2 : index
    %c0_99 = arith.constant 0 : index
    %c0_100 = arith.constant 0 : index
    %106 = vector.load %arg1[%c2_98, %c0_99, %c0_100] : memref<3x49x128xbf16, #tpu.memory_space<vmem>>, vector<1x49x128xbf16>
    %107 = vector.shape_cast %106 : vector<1x49x128xbf16> to vector<49x128xbf16>
    %cst_101 = arith.constant dense<0.000000e+00> : vector<8x128xf32>
    %108 = tpu.matmul %105, %107, %cst_101 {dimension_numbers = #tpu.dot_dimension_numbers<[1], [0], [0], [1], [0, 0, 1, 1], [], []>} : vector<8x49xbf16>, vector<49x128xbf16>, vector<8x128xf32> -> vector<8x128xf32>
    %109 = arith.addf %103, %108 : vector<8x128xf32>
    %110 = arith.addf %109, %2 : vector<8x128xf32>
    %cst_102 = arith.constant 0.000000e+00 : f32
    %111 = vector.broadcast %cst_102 : f32 to vector<8x128xf32>
    %112 = arith.maximumf %110, %111 : vector<8x128xf32>
    %113 = arith.truncf %112 : vector<8x128xf32> to vector<8x128xbf16>
    %c0_103 = arith.constant 0 : index
    %c0_104 = arith.constant 0 : index
    %114 = vector.load %arg2[%c0_103, %c0_104] : memref<128x896xbf16, #tpu.memory_space<vmem>>, vector<128x384xbf16>
    %cst_105 = arith.constant dense<0.000000e+00> : vector<8x384xf32>
    %115 = tpu.matmul %113, %114, %cst_105 {dimension_numbers = #tpu.dot_dimension_numbers<[1], [0], [0], [1], [0, 0, 1, 1], [], []>} : vector<8x128xbf16>, vector<128x384xbf16>, vector<8x384xf32> -> vector<8x384xf32>
    %116 = arith.addf %115, %5 : vector<8x384xf32>
    %c3_106 = arith.constant 3 : index
    %c0_107 = arith.constant 0 : index
    %c0_108 = arith.constant 0 : index
    %117 = vector.load %arg5[%c3_106, %c0_107, %c0_108] : memref<8x8x384xf32, #tpu.memory_space<vmem>>, vector<1x8x384xf32>
    %118 = vector.shape_cast %117 : vector<1x8x384xf32> to vector<8x384xf32>
    %119 = vector.shape_cast %116 : vector<8x384xf32> to vector<1x8x384xf32>
    tpu.vector_store %arg5[%c3_106, %c0_107, %c0_108], %119 {strides = array<i32>} : memref<8x8x384xf32, #tpu.memory_space<vmem>>, vector<1x8x384xf32>,
    %c8_109 = arith.constant 8 : index
    %c0_110 = arith.constant 0 : index
    %c0_111 = arith.constant 0 : index
    %120 = vector.load %arg0[%c8_109, %c0_110, %c0_111] : memref<18x8x49xbf16, #tpu.memory_space<vmem>>, vector<1x8x49xbf16>
    %121 = vector.shape_cast %120 : vector<1x8x49xbf16> to vector<8x49xbf16>
    %c0_112 = arith.constant 0 : index
    %c0_113 = arith.constant 0 : index
    %c0_114 = arith.constant 0 : index
    %122 = vector.load %arg1[%c0_112, %c0_113, %c0_114] : memref<3x49x128xbf16, #tpu.memory_space<vmem>>, vector<1x49x128xbf16>
    %123 = vector.shape_cast %122 : vector<1x49x128xbf16> to vector<49x128xbf16>
    %cst_115 = arith.constant dense<0.000000e+00> : vector<8x128xf32>
    %124 = tpu.matmul %121, %123, %cst_115 {dimension_numbers = #tpu.dot_dimension_numbers<[1], [0], [0], [1], [0, 0, 1, 1], [], []>} : vector<8x49xbf16>, vector<49x128xbf16>, vector<8x128xf32> -> vector<8x128xf32>
    %c9 = arith.constant 9 : index
    %c0_116 = arith.constant 0 : index
    %c0_117 = arith.constant 0 : index
    %125 = vector.load %arg0[%c9, %c0_116, %c0_117] : memref<18x8x49xbf16, #tpu.memory_space<vmem>>, vector<1x8x49xbf16>
    %126 = vector.shape_cast %125 : vector<1x8x49xbf16> to vector<8x49xbf16>
    %c1_118 = arith.constant 1 : index
    %c0_119 = arith.constant 0 : index
    %c0_120 = arith.constant 0 : index
    %127 = vector.load %arg1[%c1_118, %c0_119, %c0_120] : memref<3x49x128xbf16, #tpu.memory_space<vmem>>, vector<1x49x128xbf16>
    %128 = vector.shape_cast %127 : vector<1x49x128xbf16> to vector<49x128xbf16>
    %cst_121 = arith.constant dense<0.000000e+00> : vector<8x128xf32>
    %129 = tpu.matmul %126, %128, %cst_121 {dimension_numbers = #tpu.dot_dimension_numbers<[1], [0], [0], [1], [0, 0, 1, 1], [], []>} : vector<8x49xbf16>, vector<49x128xbf16>, vector<8x128xf32> -> vector<8x128xf32>
    %130 = arith.addf %124, %129 : vector<8x128xf32>
    %c10 = arith.constant 10 : index
    %c0_122 = arith.constant 0 : index
    %c0_123 = arith.constant 0 : index
    %131 = vector.load %arg0[%c10, %c0_122, %c0_123] : memref<18x8x49xbf16, #tpu.memory_space<vmem>>, vector<1x8x49xbf16>
    %132 = vector.shape_cast %131 : vector<1x8x49xbf16> to vector<8x49xbf16>
    %c2_124 = arith.constant 2 : index
    %c0_125 = arith.constant 0 : index
    %c0_126 = arith.constant 0 : index
    %133 = vector.load %arg1[%c2_124, %c0_125, %c0_126] : memref<3x49x128xbf16, #tpu.memory_space<vmem>>, vector<1x49x128xbf16>
    %134 = vector.shape_cast %133 : vector<1x49x128xbf16> to vector<49x128xbf16>
    %cst_127 = arith.constant dense<0.000000e+00> : vector<8x128xf32>
    %135 = tpu.matmul %132, %134, %cst_127 {dimension_numbers = #tpu.dot_dimension_numbers<[1], [0], [0], [1], [0, 0, 1, 1], [], []>} : vector<8x49xbf16>, vector<49x128xbf16>, vector<8x128xf32> -> vector<8x128xf32>
    %136 = arith.addf %130, %135 : vector<8x128xf32>
    %137 = arith.addf %136, %2 : vector<8x128xf32>
    %cst_128 = arith.constant 0.000000e+00 : f32
    %138 = vector.broadcast %cst_128 : f32 to vector<8x128xf32>
    %139 = arith.maximumf %137, %138 : vector<8x128xf32>
    %140 = arith.truncf %139 : vector<8x128xf32> to vector<8x128xbf16>
    %c0_129 = arith.constant 0 : index
    %c0_130 = arith.constant 0 : index
    %141 = vector.load %arg2[%c0_129, %c0_130] : memref<128x896xbf16, #tpu.memory_space<vmem>>, vector<128x384xbf16>
    %cst_131 = arith.constant dense<0.000000e+00> : vector<8x384xf32>
    %142 = tpu.matmul %140, %141, %cst_131 {dimension_numbers = #tpu.dot_dimension_numbers<[1], [0], [0], [1], [0, 0, 1, 1], [], []>} : vector<8x128xbf16>, vector<128x384xbf16>, vector<8x384xf32> -> vector<8x384xf32>
    %143 = arith.addf %142, %5 : vector<8x384xf32>
    %c4_132 = arith.constant 4 : index
    %c0_133 = arith.constant 0 : index
    %c0_134 = arith.constant 0 : index
    %144 = vector.load %arg5[%c4_132, %c0_133, %c0_134] : memref<8x8x384xf32, #tpu.memory_space<vmem>>, vector<1x8x384xf32>
    %145 = vector.shape_cast %144 : vector<1x8x384xf32> to vector<8x384xf32>
    %146 = vector.shape_cast %143 : vector<8x384xf32> to vector<1x8x384xf32>
    tpu.vector_store %arg5[%c4_132, %c0_133, %c0_134], %146 {strides = array<i32>} : memref<8x8x384xf32, #tpu.memory_space<vmem>>, vector<1x8x384xf32>,
    %c10_135 = arith.constant 10 : index
    %c0_136 = arith.constant 0 : index
    %c0_137 = arith.constant 0 : index
    %147 = vector.load %arg0[%c10_135, %c0_136, %c0_137] : memref<18x8x49xbf16, #tpu.memory_space<vmem>>, vector<1x8x49xbf16>
    %148 = vector.shape_cast %147 : vector<1x8x49xbf16> to vector<8x49xbf16>
    %c0_138 = arith.constant 0 : index
    %c0_139 = arith.constant 0 : index
    %c0_140 = arith.constant 0 : index
    %149 = vector.load %arg1[%c0_138, %c0_139, %c0_140] : memref<3x49x128xbf16, #tpu.memory_space<vmem>>, vector<1x49x128xbf16>
    %150 = vector.shape_cast %149 : vector<1x49x128xbf16> to vector<49x128xbf16>
    %cst_141 = arith.constant dense<0.000000e+00> : vector<8x128xf32>
    %151 = tpu.matmul %148, %150, %cst_141 {dimension_numbers = #tpu.dot_dimension_numbers<[1], [0], [0], [1], [0, 0, 1, 1], [], []>} : vector<8x49xbf16>, vector<49x128xbf16>, vector<8x128xf32> -> vector<8x128xf32>
    %c11 = arith.constant 11 : index
    %c0_142 = arith.constant 0 : index
    %c0_143 = arith.constant 0 : index
    %152 = vector.load %arg0[%c11, %c0_142, %c0_143] : memref<18x8x49xbf16, #tpu.memory_space<vmem>>, vector<1x8x49xbf16>
    %153 = vector.shape_cast %152 : vector<1x8x49xbf16> to vector<8x49xbf16>
    %c1_144 = arith.constant 1 : index
    %c0_145 = arith.constant 0 : index
    %c0_146 = arith.constant 0 : index
    %154 = vector.load %arg1[%c1_144, %c0_145, %c0_146] : memref<3x49x128xbf16, #tpu.memory_space<vmem>>, vector<1x49x128xbf16>
    %155 = vector.shape_cast %154 : vector<1x49x128xbf16> to vector<49x128xbf16>
    %cst_147 = arith.constant dense<0.000000e+00> : vector<8x128xf32>
    %156 = tpu.matmul %153, %155, %cst_147 {dimension_numbers = #tpu.dot_dimension_numbers<[1], [0], [0], [1], [0, 0, 1, 1], [], []>} : vector<8x49xbf16>, vector<49x128xbf16>, vector<8x128xf32> -> vector<8x128xf32>
    %157 = arith.addf %151, %156 : vector<8x128xf32>
    %c12 = arith.constant 12 : index
    %c0_148 = arith.constant 0 : index
    %c0_149 = arith.constant 0 : index
    %158 = vector.load %arg0[%c12, %c0_148, %c0_149] : memref<18x8x49xbf16, #tpu.memory_space<vmem>>, vector<1x8x49xbf16>
    %159 = vector.shape_cast %158 : vector<1x8x49xbf16> to vector<8x49xbf16>
    %c2_150 = arith.constant 2 : index
    %c0_151 = arith.constant 0 : index
    %c0_152 = arith.constant 0 : index
    %160 = vector.load %arg1[%c2_150, %c0_151, %c0_152] : memref<3x49x128xbf16, #tpu.memory_space<vmem>>, vector<1x49x128xbf16>
    %161 = vector.shape_cast %160 : vector<1x49x128xbf16> to vector<49x128xbf16>
    %cst_153 = arith.constant dense<0.000000e+00> : vector<8x128xf32>
    %162 = tpu.matmul %159, %161, %cst_153 {dimension_numbers = #tpu.dot_dimension_numbers<[1], [0], [0], [1], [0, 0, 1, 1], [], []>} : vector<8x49xbf16>, vector<49x128xbf16>, vector<8x128xf32> -> vector<8x128xf32>
    %163 = arith.addf %157, %162 : vector<8x128xf32>
    %164 = arith.addf %163, %2 : vector<8x128xf32>
    %cst_154 = arith.constant 0.000000e+00 : f32
    %165 = vector.broadcast %cst_154 : f32 to vector<8x128xf32>
    %166 = arith.maximumf %164, %165 : vector<8x128xf32>
    %167 = arith.truncf %166 : vector<8x128xf32> to vector<8x128xbf16>
    %c0_155 = arith.constant 0 : index
    %c0_156 = arith.constant 0 : index
    %168 = vector.load %arg2[%c0_155, %c0_156] : memref<128x896xbf16, #tpu.memory_space<vmem>>, vector<128x384xbf16>
    %cst_157 = arith.constant dense<0.000000e+00> : vector<8x384xf32>
    %169 = tpu.matmul %167, %168, %cst_157 {dimension_numbers = #tpu.dot_dimension_numbers<[1], [0], [0], [1], [0, 0, 1, 1], [], []>} : vector<8x128xbf16>, vector<128x384xbf16>, vector<8x384xf32> -> vector<8x384xf32>
    %170 = arith.addf %169, %5 : vector<8x384xf32>
    %c5_158 = arith.constant 5 : index
    %c0_159 = arith.constant 0 : index
    %c0_160 = arith.constant 0 : index
    %171 = vector.load %arg5[%c5_158, %c0_159, %c0_160] : memref<8x8x384xf32, #tpu.memory_space<vmem>>, vector<1x8x384xf32>
    %172 = vector.shape_cast %171 : vector<1x8x384xf32> to vector<8x384xf32>
    %173 = vector.shape_cast %170 : vector<8x384xf32> to vector<1x8x384xf32>
    tpu.vector_store %arg5[%c5_158, %c0_159, %c0_160], %173 {strides = array<i32>} : memref<8x8x384xf32, #tpu.memory_space<vmem>>, vector<1x8x384xf32>,
    %c12_161 = arith.constant 12 : index
    %c0_162 = arith.constant 0 : index
    %c0_163 = arith.constant 0 : index
    %174 = vector.load %arg0[%c12_161, %c0_162, %c0_163] : memref<18x8x49xbf16, #tpu.memory_space<vmem>>, vector<1x8x49xbf16>
    %175 = vector.shape_cast %174 : vector<1x8x49xbf16> to vector<8x49xbf16>
    %c0_164 = arith.constant 0 : index
    %c0_165 = arith.constant 0 : index
    %c0_166 = arith.constant 0 : index
    %176 = vector.load %arg1[%c0_164, %c0_165, %c0_166] : memref<3x49x128xbf16, #tpu.memory_space<vmem>>, vector<1x49x128xbf16>
    %177 = vector.shape_cast %176 : vector<1x49x128xbf16> to vector<49x128xbf16>
    %cst_167 = arith.constant dense<0.000000e+00> : vector<8x128xf32>
    %178 = tpu.matmul %175, %177, %cst_167 {dimension_numbers = #tpu.dot_dimension_numbers<[1], [0], [0], [1], [0, 0, 1, 1], [], []>} : vector<8x49xbf16>, vector<49x128xbf16>, vector<8x128xf32> -> vector<8x128xf32>
    %c13 = arith.constant 13 : index
    %c0_168 = arith.constant 0 : index
    %c0_169 = arith.constant 0 : index
    %179 = vector.load %arg0[%c13, %c0_168, %c0_169] : memref<18x8x49xbf16, #tpu.memory_space<vmem>>, vector<1x8x49xbf16>
    %180 = vector.shape_cast %179 : vector<1x8x49xbf16> to vector<8x49xbf16>
    %c1_170 = arith.constant 1 : index
    %c0_171 = arith.constant 0 : index
    %c0_172 = arith.constant 0 : index
    %181 = vector.load %arg1[%c1_170, %c0_171, %c0_172] : memref<3x49x128xbf16, #tpu.memory_space<vmem>>, vector<1x49x128xbf16>
    %182 = vector.shape_cast %181 : vector<1x49x128xbf16> to vector<49x128xbf16>
    %cst_173 = arith.constant dense<0.000000e+00> : vector<8x128xf32>
    %183 = tpu.matmul %180, %182, %cst_173 {dimension_numbers = #tpu.dot_dimension_numbers<[1], [0], [0], [1], [0, 0, 1, 1], [], []>} : vector<8x49xbf16>, vector<49x128xbf16>, vector<8x128xf32> -> vector<8x128xf32>
    %184 = arith.addf %178, %183 : vector<8x128xf32>
    %c14 = arith.constant 14 : index
    %c0_174 = arith.constant 0 : index
    %c0_175 = arith.constant 0 : index
    %185 = vector.load %arg0[%c14, %c0_174, %c0_175] : memref<18x8x49xbf16, #tpu.memory_space<vmem>>, vector<1x8x49xbf16>
    %186 = vector.shape_cast %185 : vector<1x8x49xbf16> to vector<8x49xbf16>
    %c2_176 = arith.constant 2 : index
    %c0_177 = arith.constant 0 : index
    %c0_178 = arith.constant 0 : index
    %187 = vector.load %arg1[%c2_176, %c0_177, %c0_178] : memref<3x49x128xbf16, #tpu.memory_space<vmem>>, vector<1x49x128xbf16>
    %188 = vector.shape_cast %187 : vector<1x49x128xbf16> to vector<49x128xbf16>
    %cst_179 = arith.constant dense<0.000000e+00> : vector<8x128xf32>
    %189 = tpu.matmul %186, %188, %cst_179 {dimension_numbers = #tpu.dot_dimension_numbers<[1], [0], [0], [1], [0, 0, 1, 1], [], []>} : vector<8x49xbf16>, vector<49x128xbf16>, vector<8x128xf32> -> vector<8x128xf32>
    %190 = arith.addf %184, %189 : vector<8x128xf32>
    %191 = arith.addf %190, %2 : vector<8x128xf32>
    %cst_180 = arith.constant 0.000000e+00 : f32
    %192 = vector.broadcast %cst_180 : f32 to vector<8x128xf32>
    %193 = arith.maximumf %191, %192 : vector<8x128xf32>
    %194 = arith.truncf %193 : vector<8x128xf32> to vector<8x128xbf16>
    %c0_181 = arith.constant 0 : index
    %c0_182 = arith.constant 0 : index
    %195 = vector.load %arg2[%c0_181, %c0_182] : memref<128x896xbf16, #tpu.memory_space<vmem>>, vector<128x384xbf16>
    %cst_183 = arith.constant dense<0.000000e+00> : vector<8x384xf32>
    %196 = tpu.matmul %194, %195, %cst_183 {dimension_numbers = #tpu.dot_dimension_numbers<[1], [0], [0], [1], [0, 0, 1, 1], [], []>} : vector<8x128xbf16>, vector<128x384xbf16>, vector<8x384xf32> -> vector<8x384xf32>
    %197 = arith.addf %196, %5 : vector<8x384xf32>
    %c6_184 = arith.constant 6 : index
    %c0_185 = arith.constant 0 : index
    %c0_186 = arith.constant 0 : index
    %198 = vector.load %arg5[%c6_184, %c0_185, %c0_186] : memref<8x8x384xf32, #tpu.memory_space<vmem>>, vector<1x8x384xf32>
    %199 = vector.shape_cast %198 : vector<1x8x384xf32> to vector<8x384xf32>
    %200 = vector.shape_cast %197 : vector<8x384xf32> to vector<1x8x384xf32>
    tpu.vector_store %arg5[%c6_184, %c0_185, %c0_186], %200 {strides = array<i32>} : memref<8x8x384xf32, #tpu.memory_space<vmem>>, vector<1x8x384xf32>,
    %c14_187 = arith.constant 14 : index
    %c0_188 = arith.constant 0 : index
    %c0_189 = arith.constant 0 : index
    %201 = vector.load %arg0[%c14_187, %c0_188, %c0_189] : memref<18x8x49xbf16, #tpu.memory_space<vmem>>, vector<1x8x49xbf16>
    %202 = vector.shape_cast %201 : vector<1x8x49xbf16> to vector<8x49xbf16>
    %c0_190 = arith.constant 0 : index
    %c0_191 = arith.constant 0 : index
    %c0_192 = arith.constant 0 : index
    %203 = vector.load %arg1[%c0_190, %c0_191, %c0_192] : memref<3x49x128xbf16, #tpu.memory_space<vmem>>, vector<1x49x128xbf16>
    %204 = vector.shape_cast %203 : vector<1x49x128xbf16> to vector<49x128xbf16>
    %cst_193 = arith.constant dense<0.000000e+00> : vector<8x128xf32>
    %205 = tpu.matmul %202, %204, %cst_193 {dimension_numbers = #tpu.dot_dimension_numbers<[1], [0], [0], [1], [0, 0, 1, 1], [], []>} : vector<8x49xbf16>, vector<49x128xbf16>, vector<8x128xf32> -> vector<8x128xf32>
    %c15 = arith.constant 15 : index
    %c0_194 = arith.constant 0 : index
    %c0_195 = arith.constant 0 : index
    %206 = vector.load %arg0[%c15, %c0_194, %c0_195] : memref<18x8x49xbf16, #tpu.memory_space<vmem>>, vector<1x8x49xbf16>
    %207 = vector.shape_cast %206 : vector<1x8x49xbf16> to vector<8x49xbf16>
    %c1_196 = arith.constant 1 : index
    %c0_197 = arith.constant 0 : index
    %c0_198 = arith.constant 0 : index
    %208 = vector.load %arg1[%c1_196, %c0_197, %c0_198] : memref<3x49x128xbf16, #tpu.memory_space<vmem>>, vector<1x49x128xbf16>
    %209 = vector.shape_cast %208 : vector<1x49x128xbf16> to vector<49x128xbf16>
    %cst_199 = arith.constant dense<0.000000e+00> : vector<8x128xf32>
    %210 = tpu.matmul %207, %209, %cst_199 {dimension_numbers = #tpu.dot_dimension_numbers<[1], [0], [0], [1], [0, 0, 1, 1], [], []>} : vector<8x49xbf16>, vector<49x128xbf16>, vector<8x128xf32> -> vector<8x128xf32>
    %211 = arith.addf %205, %210 : vector<8x128xf32>
    %c16 = arith.constant 16 : index
    %c0_200 = arith.constant 0 : index
    %c0_201 = arith.constant 0 : index
    %212 = vector.load %arg0[%c16, %c0_200, %c0_201] : memref<18x8x49xbf16, #tpu.memory_space<vmem>>, vector<1x8x49xbf16>
    %213 = vector.shape_cast %212 : vector<1x8x49xbf16> to vector<8x49xbf16>
    %c2_202 = arith.constant 2 : index
    %c0_203 = arith.constant 0 : index
    %c0_204 = arith.constant 0 : index
    %214 = vector.load %arg1[%c2_202, %c0_203, %c0_204] : memref<3x49x128xbf16, #tpu.memory_space<vmem>>, vector<1x49x128xbf16>
    %215 = vector.shape_cast %214 : vector<1x49x128xbf16> to vector<49x128xbf16>
    %cst_205 = arith.constant dense<0.000000e+00> : vector<8x128xf32>
    %216 = tpu.matmul %213, %215, %cst_205 {dimension_numbers = #tpu.dot_dimension_numbers<[1], [0], [0], [1], [0, 0, 1, 1], [], []>} : vector<8x49xbf16>, vector<49x128xbf16>, vector<8x128xf32> -> vector<8x128xf32>
    %217 = arith.addf %211, %216 : vector<8x128xf32>
    %218 = arith.addf %217, %2 : vector<8x128xf32>
    %cst_206 = arith.constant 0.000000e+00 : f32
    %219 = vector.broadcast %cst_206 : f32 to vector<8x128xf32>
    %220 = arith.maximumf %218, %219 : vector<8x128xf32>
    %221 = arith.truncf %220 : vector<8x128xf32> to vector<8x128xbf16>
    %c0_207 = arith.constant 0 : index
    %c0_208 = arith.constant 0 : index
    %222 = vector.load %arg2[%c0_207, %c0_208] : memref<128x896xbf16, #tpu.memory_space<vmem>>, vector<128x384xbf16>
    %cst_209 = arith.constant dense<0.000000e+00> : vector<8x384xf32>
    %223 = tpu.matmul %221, %222, %cst_209 {dimension_numbers = #tpu.dot_dimension_numbers<[1], [0], [0], [1], [0, 0, 1, 1], [], []>} : vector<8x128xbf16>, vector<128x384xbf16>, vector<8x384xf32> -> vector<8x384xf32>
    %224 = arith.addf %223, %5 : vector<8x384xf32>
    %c7_210 = arith.constant 7 : index
    %c0_211 = arith.constant 0 : index
    %c0_212 = arith.constant 0 : index
    %225 = vector.load %arg5[%c7_210, %c0_211, %c0_212] : memref<8x8x384xf32, #tpu.memory_space<vmem>>, vector<1x8x384xf32>
    %226 = vector.shape_cast %225 : vector<1x8x384xf32> to vector<8x384xf32>
    %227 = vector.shape_cast %224 : vector<8x384xf32> to vector<1x8x384xf32>
    tpu.vector_store %arg5[%c7_210, %c0_211, %c0_212], %227 {strides = array<i32>} : memref<8x8x384xf32, #tpu.memory_space<vmem>>, vector<1x8x384xf32>,
    %cst_213 = arith.constant 0.000000e+00 : f32
    %228 = vector.broadcast %cst_213 : f32 to vector<8x128xf32>
    %c0_214 = arith.constant 0 : index
    %c0_215 = arith.constant 0 : index
    %c0_216 = arith.constant 0 : index
    %229 = vector.load %arg5[%c0_214, %c0_215, %c0_216] : memref<8x8x384xf32, #tpu.memory_space<vmem>>, vector<1x8x384xf32>
    %230 = vector.shape_cast %229 : vector<1x8x384xf32> to vector<8x384xf32>
    %231 = arith.truncf %228 : vector<8x128xf32> to vector<8x128xbf16>
    %c0_217 = arith.constant 0 : index
    %c384 = arith.constant 384 : index
    %232 = vector.load %arg2[%c0_217, %c384] : memref<128x896xbf16, #tpu.memory_space<vmem>>, vector<128x384xbf16>
    %cst_218 = arith.constant dense<0.000000e+00> : vector<8x384xf32>
    %233 = tpu.matmul %231, %232, %cst_218 {dimension_numbers = #tpu.dot_dimension_numbers<[1], [0], [0], [1], [0, 0, 1, 1], [], []>} : vector<8x128xbf16>, vector<128x384xbf16>, vector<8x384xf32> -> vector<8x384xf32>
    %234 = arith.addf %233, %8 : vector<8x384xf32>
    %235 = vector.extract_strided_slice %230 {offsets = [0, 0], sizes = [8, 256], strides = [1, 1]} : vector<8x384xf32> to vector<8x256xf32>
    %236 = vector.extract_strided_slice %234 {offsets = [0, 0], sizes = [8, 256], strides = [1, 1]} : vector<8x384xf32> to vector<8x256xf32>
    %237 = arith.addf %235, %236 : vector<8x256xf32>
    %238 = arith.negf %237 : vector<8x256xf32>
    %239 = math.exp %238 : vector<8x256xf32>
    %cst_219 = arith.constant 1.000000e+00 : f32
    %240 = vector.broadcast %cst_219 : f32 to vector<8x256xf32>
    %241 = arith.addf %240, %239 : vector<8x256xf32>
    %242 = arith.divf %240, %241 : vector<8x256xf32>
    %243 = vector.extract_strided_slice %242 {offsets = [0, 0], sizes = [8, 128], strides = [1, 1]} : vector<8x256xf32> to vector<8x128xf32>
    %244 = vector.extract_strided_slice %242 {offsets = [0, 128], sizes = [8, 128], strides = [1, 1]} : vector<8x256xf32> to vector<8x128xf32>
    %245 = vector.extract_strided_slice %230 {offsets = [0, 256], sizes = [8, 128], strides = [1, 1]} : vector<8x384xf32> to vector<8x128xf32>
    %246 = vector.extract_strided_slice %234 {offsets = [0, 256], sizes = [8, 128], strides = [1, 1]} : vector<8x384xf32> to vector<8x128xf32>
    %247 = arith.mulf %243, %246 : vector<8x128xf32>
    %248 = arith.addf %245, %247 : vector<8x128xf32>
    %249 = math.tanh %248 : vector<8x128xf32>
    %250 = arith.subf %228, %249 : vector<8x128xf32>
    %251 = arith.mulf %244, %250 : vector<8x128xf32>
    %252 = arith.addf %249, %251 : vector<8x128xf32>
    %c1_220 = arith.constant 1 : index
    %c0_221 = arith.constant 0 : index
    %c0_222 = arith.constant 0 : index
    %253 = vector.load %arg5[%c1_220, %c0_221, %c0_222] : memref<8x8x384xf32, #tpu.memory_space<vmem>>, vector<1x8x384xf32>
    %254 = vector.shape_cast %253 : vector<1x8x384xf32> to vector<8x384xf32>
    %255 = arith.truncf %252 : vector<8x128xf32> to vector<8x128xbf16>
    %c0_223 = arith.constant 0 : index
    %c384_224 = arith.constant 384 : index
    %256 = vector.load %arg2[%c0_223, %c384_224] : memref<128x896xbf16, #tpu.memory_space<vmem>>, vector<128x384xbf16>
    %cst_225 = arith.constant dense<0.000000e+00> : vector<8x384xf32>
    %257 = tpu.matmul %255, %256, %cst_225 {dimension_numbers = #tpu.dot_dimension_numbers<[1], [0], [0], [1], [0, 0, 1, 1], [], []>} : vector<8x128xbf16>, vector<128x384xbf16>, vector<8x384xf32> -> vector<8x384xf32>
    %258 = arith.addf %257, %8 : vector<8x384xf32>
    %259 = vector.extract_strided_slice %254 {offsets = [0, 0], sizes = [8, 256], strides = [1, 1]} : vector<8x384xf32> to vector<8x256xf32>
    %260 = vector.extract_strided_slice %258 {offsets = [0, 0], sizes = [8, 256], strides = [1, 1]} : vector<8x384xf32> to vector<8x256xf32>
    %261 = arith.addf %259, %260 : vector<8x256xf32>
    %262 = arith.negf %261 : vector<8x256xf32>
    %263 = math.exp %262 : vector<8x256xf32>
    %cst_226 = arith.constant 1.000000e+00 : f32
    %264 = vector.broadcast %cst_226 : f32 to vector<8x256xf32>
    %265 = arith.addf %264, %263 : vector<8x256xf32>
    %266 = arith.divf %264, %265 : vector<8x256xf32>
    %267 = vector.extract_strided_slice %266 {offsets = [0, 0], sizes = [8, 128], strides = [1, 1]} : vector<8x256xf32> to vector<8x128xf32>
    %268 = vector.extract_strided_slice %266 {offsets = [0, 128], sizes = [8, 128], strides = [1, 1]} : vector<8x256xf32> to vector<8x128xf32>
    %269 = vector.extract_strided_slice %254 {offsets = [0, 256], sizes = [8, 128], strides = [1, 1]} : vector<8x384xf32> to vector<8x128xf32>
    %270 = vector.extract_strided_slice %258 {offsets = [0, 256], sizes = [8, 128], strides = [1, 1]} : vector<8x384xf32> to vector<8x128xf32>
    %271 = arith.mulf %267, %270 : vector<8x128xf32>
    %272 = arith.addf %269, %271 : vector<8x128xf32>
    %273 = math.tanh %272 : vector<8x128xf32>
    %274 = arith.subf %252, %273 : vector<8x128xf32>
    %275 = arith.mulf %268, %274 : vector<8x128xf32>
    %276 = arith.addf %273, %275 : vector<8x128xf32>
    %c2_227 = arith.constant 2 : index
    %c0_228 = arith.constant 0 : index
    %c0_229 = arith.constant 0 : index
    %277 = vector.load %arg5[%c2_227, %c0_228, %c0_229] : memref<8x8x384xf32, #tpu.memory_space<vmem>>, vector<1x8x384xf32>
    %278 = vector.shape_cast %277 : vector<1x8x384xf32> to vector<8x384xf32>
    %279 = arith.truncf %276 : vector<8x128xf32> to vector<8x128xbf16>
    %c0_230 = arith.constant 0 : index
    %c384_231 = arith.constant 384 : index
    %280 = vector.load %arg2[%c0_230, %c384_231] : memref<128x896xbf16, #tpu.memory_space<vmem>>, vector<128x384xbf16>
    %cst_232 = arith.constant dense<0.000000e+00> : vector<8x384xf32>
    %281 = tpu.matmul %279, %280, %cst_232 {dimension_numbers = #tpu.dot_dimension_numbers<[1], [0], [0], [1], [0, 0, 1, 1], [], []>} : vector<8x128xbf16>, vector<128x384xbf16>, vector<8x384xf32> -> vector<8x384xf32>
    %282 = arith.addf %281, %8 : vector<8x384xf32>
    %283 = vector.extract_strided_slice %278 {offsets = [0, 0], sizes = [8, 256], strides = [1, 1]} : vector<8x384xf32> to vector<8x256xf32>
    %284 = vector.extract_strided_slice %282 {offsets = [0, 0], sizes = [8, 256], strides = [1, 1]} : vector<8x384xf32> to vector<8x256xf32>
    %285 = arith.addf %283, %284 : vector<8x256xf32>
    %286 = arith.negf %285 : vector<8x256xf32>
    %287 = math.exp %286 : vector<8x256xf32>
    %cst_233 = arith.constant 1.000000e+00 : f32
    %288 = vector.broadcast %cst_233 : f32 to vector<8x256xf32>
    %289 = arith.addf %288, %287 : vector<8x256xf32>
    %290 = arith.divf %288, %289 : vector<8x256xf32>
    %291 = vector.extract_strided_slice %290 {offsets = [0, 0], sizes = [8, 128], strides = [1, 1]} : vector<8x256xf32> to vector<8x128xf32>
    %292 = vector.extract_strided_slice %290 {offsets = [0, 128], sizes = [8, 128], strides = [1, 1]} : vector<8x256xf32> to vector<8x128xf32>
    %293 = vector.extract_strided_slice %278 {offsets = [0, 256], sizes = [8, 128], strides = [1, 1]} : vector<8x384xf32> to vector<8x128xf32>
    %294 = vector.extract_strided_slice %282 {offsets = [0, 256], sizes = [8, 128], strides = [1, 1]} : vector<8x384xf32> to vector<8x128xf32>
    %295 = arith.mulf %291, %294 : vector<8x128xf32>
    %296 = arith.addf %293, %295 : vector<8x128xf32>
    %297 = math.tanh %296 : vector<8x128xf32>
    %298 = arith.subf %276, %297 : vector<8x128xf32>
    %299 = arith.mulf %292, %298 : vector<8x128xf32>
    %300 = arith.addf %297, %299 : vector<8x128xf32>
    %c3_234 = arith.constant 3 : index
    %c0_235 = arith.constant 0 : index
    %c0_236 = arith.constant 0 : index
    %301 = vector.load %arg5[%c3_234, %c0_235, %c0_236] : memref<8x8x384xf32, #tpu.memory_space<vmem>>, vector<1x8x384xf32>
    %302 = vector.shape_cast %301 : vector<1x8x384xf32> to vector<8x384xf32>
    %303 = arith.truncf %300 : vector<8x128xf32> to vector<8x128xbf16>
    %c0_237 = arith.constant 0 : index
    %c384_238 = arith.constant 384 : index
    %304 = vector.load %arg2[%c0_237, %c384_238] : memref<128x896xbf16, #tpu.memory_space<vmem>>, vector<128x384xbf16>
    %cst_239 = arith.constant dense<0.000000e+00> : vector<8x384xf32>
    %305 = tpu.matmul %303, %304, %cst_239 {dimension_numbers = #tpu.dot_dimension_numbers<[1], [0], [0], [1], [0, 0, 1, 1], [], []>} : vector<8x128xbf16>, vector<128x384xbf16>, vector<8x384xf32> -> vector<8x384xf32>
    %306 = arith.addf %305, %8 : vector<8x384xf32>
    %307 = vector.extract_strided_slice %302 {offsets = [0, 0], sizes = [8, 256], strides = [1, 1]} : vector<8x384xf32> to vector<8x256xf32>
    %308 = vector.extract_strided_slice %306 {offsets = [0, 0], sizes = [8, 256], strides = [1, 1]} : vector<8x384xf32> to vector<8x256xf32>
    %309 = arith.addf %307, %308 : vector<8x256xf32>
    %310 = arith.negf %309 : vector<8x256xf32>
    %311 = math.exp %310 : vector<8x256xf32>
    %cst_240 = arith.constant 1.000000e+00 : f32
    %312 = vector.broadcast %cst_240 : f32 to vector<8x256xf32>
    %313 = arith.addf %312, %311 : vector<8x256xf32>
    %314 = arith.divf %312, %313 : vector<8x256xf32>
    %315 = vector.extract_strided_slice %314 {offsets = [0, 0], sizes = [8, 128], strides = [1, 1]} : vector<8x256xf32> to vector<8x128xf32>
    %316 = vector.extract_strided_slice %314 {offsets = [0, 128], sizes = [8, 128], strides = [1, 1]} : vector<8x256xf32> to vector<8x128xf32>
    %317 = vector.extract_strided_slice %302 {offsets = [0, 256], sizes = [8, 128], strides = [1, 1]} : vector<8x384xf32> to vector<8x128xf32>
    %318 = vector.extract_strided_slice %306 {offsets = [0, 256], sizes = [8, 128], strides = [1, 1]} : vector<8x384xf32> to vector<8x128xf32>
    %319 = arith.mulf %315, %318 : vector<8x128xf32>
    %320 = arith.addf %317, %319 : vector<8x128xf32>
    %321 = math.tanh %320 : vector<8x128xf32>
    %322 = arith.subf %300, %321 : vector<8x128xf32>
    %323 = arith.mulf %316, %322 : vector<8x128xf32>
    %324 = arith.addf %321, %323 : vector<8x128xf32>
    %c4_241 = arith.constant 4 : index
    %c0_242 = arith.constant 0 : index
    %c0_243 = arith.constant 0 : index
    %325 = vector.load %arg5[%c4_241, %c0_242, %c0_243] : memref<8x8x384xf32, #tpu.memory_space<vmem>>, vector<1x8x384xf32>
    %326 = vector.shape_cast %325 : vector<1x8x384xf32> to vector<8x384xf32>
    %327 = arith.truncf %324 : vector<8x128xf32> to vector<8x128xbf16>
    %c0_244 = arith.constant 0 : index
    %c384_245 = arith.constant 384 : index
    %328 = vector.load %arg2[%c0_244, %c384_245] : memref<128x896xbf16, #tpu.memory_space<vmem>>, vector<128x384xbf16>
    %cst_246 = arith.constant dense<0.000000e+00> : vector<8x384xf32>
    %329 = tpu.matmul %327, %328, %cst_246 {dimension_numbers = #tpu.dot_dimension_numbers<[1], [0], [0], [1], [0, 0, 1, 1], [], []>} : vector<8x128xbf16>, vector<128x384xbf16>, vector<8x384xf32> -> vector<8x384xf32>
    %330 = arith.addf %329, %8 : vector<8x384xf32>
    %331 = vector.extract_strided_slice %326 {offsets = [0, 0], sizes = [8, 256], strides = [1, 1]} : vector<8x384xf32> to vector<8x256xf32>
    %332 = vector.extract_strided_slice %330 {offsets = [0, 0], sizes = [8, 256], strides = [1, 1]} : vector<8x384xf32> to vector<8x256xf32>
    %333 = arith.addf %331, %332 : vector<8x256xf32>
    %334 = arith.negf %333 : vector<8x256xf32>
    %335 = math.exp %334 : vector<8x256xf32>
    %cst_247 = arith.constant 1.000000e+00 : f32
    %336 = vector.broadcast %cst_247 : f32 to vector<8x256xf32>
    %337 = arith.addf %336, %335 : vector<8x256xf32>
    %338 = arith.divf %336, %337 : vector<8x256xf32>
    %339 = vector.extract_strided_slice %338 {offsets = [0, 0], sizes = [8, 128], strides = [1, 1]} : vector<8x256xf32> to vector<8x128xf32>
    %340 = vector.extract_strided_slice %338 {offsets = [0, 128], sizes = [8, 128], strides = [1, 1]} : vector<8x256xf32> to vector<8x128xf32>
    %341 = vector.extract_strided_slice %326 {offsets = [0, 256], sizes = [8, 128], strides = [1, 1]} : vector<8x384xf32> to vector<8x128xf32>
    %342 = vector.extract_strided_slice %330 {offsets = [0, 256], sizes = [8, 128], strides = [1, 1]} : vector<8x384xf32> to vector<8x128xf32>
    %343 = arith.mulf %339, %342 : vector<8x128xf32>
    %344 = arith.addf %341, %343 : vector<8x128xf32>
    %345 = math.tanh %344 : vector<8x128xf32>
    %346 = arith.subf %324, %345 : vector<8x128xf32>
    %347 = arith.mulf %340, %346 : vector<8x128xf32>
    %348 = arith.addf %345, %347 : vector<8x128xf32>
    %c5_248 = arith.constant 5 : index
    %c0_249 = arith.constant 0 : index
    %c0_250 = arith.constant 0 : index
    %349 = vector.load %arg5[%c5_248, %c0_249, %c0_250] : memref<8x8x384xf32, #tpu.memory_space<vmem>>, vector<1x8x384xf32>
    %350 = vector.shape_cast %349 : vector<1x8x384xf32> to vector<8x384xf32>
    %351 = arith.truncf %348 : vector<8x128xf32> to vector<8x128xbf16>
    %c0_251 = arith.constant 0 : index
    %c384_252 = arith.constant 384 : index
    %352 = vector.load %arg2[%c0_251, %c384_252] : memref<128x896xbf16, #tpu.memory_space<vmem>>, vector<128x384xbf16>
    %cst_253 = arith.constant dense<0.000000e+00> : vector<8x384xf32>
    %353 = tpu.matmul %351, %352, %cst_253 {dimension_numbers = #tpu.dot_dimension_numbers<[1], [0], [0], [1], [0, 0, 1, 1], [], []>} : vector<8x128xbf16>, vector<128x384xbf16>, vector<8x384xf32> -> vector<8x384xf32>
    %354 = arith.addf %353, %8 : vector<8x384xf32>
    %355 = vector.extract_strided_slice %350 {offsets = [0, 0], sizes = [8, 256], strides = [1, 1]} : vector<8x384xf32> to vector<8x256xf32>
    %356 = vector.extract_strided_slice %354 {offsets = [0, 0], sizes = [8, 256], strides = [1, 1]} : vector<8x384xf32> to vector<8x256xf32>
    %357 = arith.addf %355, %356 : vector<8x256xf32>
    %358 = arith.negf %357 : vector<8x256xf32>
    %359 = math.exp %358 : vector<8x256xf32>
    %cst_254 = arith.constant 1.000000e+00 : f32
    %360 = vector.broadcast %cst_254 : f32 to vector<8x256xf32>
    %361 = arith.addf %360, %359 : vector<8x256xf32>
    %362 = arith.divf %360, %361 : vector<8x256xf32>
    %363 = vector.extract_strided_slice %362 {offsets = [0, 0], sizes = [8, 128], strides = [1, 1]} : vector<8x256xf32> to vector<8x128xf32>
    %364 = vector.extract_strided_slice %362 {offsets = [0, 128], sizes = [8, 128], strides = [1, 1]} : vector<8x256xf32> to vector<8x128xf32>
    %365 = vector.extract_strided_slice %350 {offsets = [0, 256], sizes = [8, 128], strides = [1, 1]} : vector<8x384xf32> to vector<8x128xf32>
    %366 = vector.extract_strided_slice %354 {offsets = [0, 256], sizes = [8, 128], strides = [1, 1]} : vector<8x384xf32> to vector<8x128xf32>
    %367 = arith.mulf %363, %366 : vector<8x128xf32>
    %368 = arith.addf %365, %367 : vector<8x128xf32>
    %369 = math.tanh %368 : vector<8x128xf32>
    %370 = arith.subf %348, %369 : vector<8x128xf32>
    %371 = arith.mulf %364, %370 : vector<8x128xf32>
    %372 = arith.addf %369, %371 : vector<8x128xf32>
    %c6_255 = arith.constant 6 : index
    %c0_256 = arith.constant 0 : index
    %c0_257 = arith.constant 0 : index
    %373 = vector.load %arg5[%c6_255, %c0_256, %c0_257] : memref<8x8x384xf32, #tpu.memory_space<vmem>>, vector<1x8x384xf32>
    %374 = vector.shape_cast %373 : vector<1x8x384xf32> to vector<8x384xf32>
    %375 = arith.truncf %372 : vector<8x128xf32> to vector<8x128xbf16>
    %c0_258 = arith.constant 0 : index
    %c384_259 = arith.constant 384 : index
    %376 = vector.load %arg2[%c0_258, %c384_259] : memref<128x896xbf16, #tpu.memory_space<vmem>>, vector<128x384xbf16>
    %cst_260 = arith.constant dense<0.000000e+00> : vector<8x384xf32>
    %377 = tpu.matmul %375, %376, %cst_260 {dimension_numbers = #tpu.dot_dimension_numbers<[1], [0], [0], [1], [0, 0, 1, 1], [], []>} : vector<8x128xbf16>, vector<128x384xbf16>, vector<8x384xf32> -> vector<8x384xf32>
    %378 = arith.addf %377, %8 : vector<8x384xf32>
    %379 = vector.extract_strided_slice %374 {offsets = [0, 0], sizes = [8, 256], strides = [1, 1]} : vector<8x384xf32> to vector<8x256xf32>
    %380 = vector.extract_strided_slice %378 {offsets = [0, 0], sizes = [8, 256], strides = [1, 1]} : vector<8x384xf32> to vector<8x256xf32>
    %381 = arith.addf %379, %380 : vector<8x256xf32>
    %382 = arith.negf %381 : vector<8x256xf32>
    %383 = math.exp %382 : vector<8x256xf32>
    %cst_261 = arith.constant 1.000000e+00 : f32
    %384 = vector.broadcast %cst_261 : f32 to vector<8x256xf32>
    %385 = arith.addf %384, %383 : vector<8x256xf32>
    %386 = arith.divf %384, %385 : vector<8x256xf32>
    %387 = vector.extract_strided_slice %386 {offsets = [0, 0], sizes = [8, 128], strides = [1, 1]} : vector<8x256xf32> to vector<8x128xf32>
    %388 = vector.extract_strided_slice %386 {offsets = [0, 128], sizes = [8, 128], strides = [1, 1]} : vector<8x256xf32> to vector<8x128xf32>
    %389 = vector.extract_strided_slice %374 {offsets = [0, 256], sizes = [8, 128], strides = [1, 1]} : vector<8x384xf32> to vector<8x128xf32>
    %390 = vector.extract_strided_slice %378 {offsets = [0, 256], sizes = [8, 128], strides = [1, 1]} : vector<8x384xf32> to vector<8x128xf32>
    %391 = arith.mulf %387, %390 : vector<8x128xf32>
    %392 = arith.addf %389, %391 : vector<8x128xf32>
    %393 = math.tanh %392 : vector<8x128xf32>
    %394 = arith.subf %372, %393 : vector<8x128xf32>
    %395 = arith.mulf %388, %394 : vector<8x128xf32>
    %396 = arith.addf %393, %395 : vector<8x128xf32>
    %c7_262 = arith.constant 7 : index
    %c0_263 = arith.constant 0 : index
    %c0_264 = arith.constant 0 : index
    %397 = vector.load %arg5[%c7_262, %c0_263, %c0_264] : memref<8x8x384xf32, #tpu.memory_space<vmem>>, vector<1x8x384xf32>
    %398 = vector.shape_cast %397 : vector<1x8x384xf32> to vector<8x384xf32>
    %399 = arith.truncf %396 : vector<8x128xf32> to vector<8x128xbf16>
    %c0_265 = arith.constant 0 : index
    %c384_266 = arith.constant 384 : index
    %400 = vector.load %arg2[%c0_265, %c384_266] : memref<128x896xbf16, #tpu.memory_space<vmem>>, vector<128x384xbf16>
    %cst_267 = arith.constant dense<0.000000e+00> : vector<8x384xf32>
    %401 = tpu.matmul %399, %400, %cst_267 {dimension_numbers = #tpu.dot_dimension_numbers<[1], [0], [0], [1], [0, 0, 1, 1], [], []>} : vector<8x128xbf16>, vector<128x384xbf16>, vector<8x384xf32> -> vector<8x384xf32>
    %402 = arith.addf %401, %8 : vector<8x384xf32>
    %403 = vector.extract_strided_slice %398 {offsets = [0, 0], sizes = [8, 256], strides = [1, 1]} : vector<8x384xf32> to vector<8x256xf32>
    %404 = vector.extract_strided_slice %402 {offsets = [0, 0], sizes = [8, 256], strides = [1, 1]} : vector<8x384xf32> to vector<8x256xf32>
    %405 = arith.addf %403, %404 : vector<8x256xf32>
    %406 = arith.negf %405 : vector<8x256xf32>
    %407 = math.exp %406 : vector<8x256xf32>
    %cst_268 = arith.constant 1.000000e+00 : f32
    %408 = vector.broadcast %cst_268 : f32 to vector<8x256xf32>
    %409 = arith.addf %408, %407 : vector<8x256xf32>
    %410 = arith.divf %408, %409 : vector<8x256xf32>
    %411 = vector.extract_strided_slice %410 {offsets = [0, 0], sizes = [8, 128], strides = [1, 1]} : vector<8x256xf32> to vector<8x128xf32>
    %412 = vector.extract_strided_slice %410 {offsets = [0, 128], sizes = [8, 128], strides = [1, 1]} : vector<8x256xf32> to vector<8x128xf32>
    %413 = vector.extract_strided_slice %398 {offsets = [0, 256], sizes = [8, 128], strides = [1, 1]} : vector<8x384xf32> to vector<8x128xf32>
    %414 = vector.extract_strided_slice %402 {offsets = [0, 256], sizes = [8, 128], strides = [1, 1]} : vector<8x384xf32> to vector<8x128xf32>
    %415 = arith.mulf %411, %414 : vector<8x128xf32>
    %416 = arith.addf %413, %415 : vector<8x128xf32>
    %417 = math.tanh %416 : vector<8x128xf32>
    %418 = arith.subf %396, %417 : vector<8x128xf32>
    %419 = arith.mulf %412, %418 : vector<8x128xf32>
    %420 = arith.addf %417, %419 : vector<8x128xf32>
    %421 = arith.truncf %420 : vector<8x128xf32> to vector<8x128xbf16>
    %c0_269 = arith.constant 0 : index
    %c768 = arith.constant 768 : index
    %422 = vector.load %arg2[%c0_269, %c768] : memref<128x896xbf16, #tpu.memory_space<vmem>>, vector<128x128xbf16>
    %cst_270 = arith.constant dense<0.000000e+00> : vector<8x128xf32>
    %423 = tpu.matmul %421, %422, %cst_270 {dimension_numbers = #tpu.dot_dimension_numbers<[1], [0], [0], [1], [0, 0, 1, 1], [], []>} : vector<8x128xbf16>, vector<128x128xbf16>, vector<8x128xf32> -> vector<8x128xf32>
    %424 = vector.broadcast %9 : vector<1x128xf32> to vector<8x128xf32>
    %425 = arith.addf %423, %424 : vector<8x128xf32>
    %cst_271 = arith.constant 0.000000e+00 : f32
    %426 = vector.broadcast %cst_271 : f32 to vector<8x128xf32>
    %427 = arith.maximumf %425, %426 : vector<8x128xf32>
    %428 = vector.broadcast %10 : vector<1x128xf32> to vector<8x128xf32>
    %429 = arith.mulf %427, %428 : vector<8x128xf32>
    %cst_272 = arith.constant dense<0.000000e+00> : vector<8xf32>
    %430 = vector.multi_reduction <add>, %429, %cst_272 [1] : vector<8x128xf32> to vector<8xf32>
    %431 = vector.shape_cast %430 : vector<8xf32> to vector<8x1xf32>
    %432 = vector.broadcast %11 : vector<1x1xf32> to vector<8x1xf32>
    %433 = arith.addf %431, %432 : vector<8x1xf32>
    %c0_273 = arith.constant 0 : index
    %c0_274 = arith.constant 0 : index
    %434 = vector.load %arg4[%c0_273, %c0_274] : memref<8x1xf32, #tpu.memory_space<vmem>>, vector<8x1xf32>
    tpu.vector_store %arg4[%c0_273, %c0_274], %433 {strides = array<i32>} : memref<8x1xf32, #tpu.memory_space<vmem>>, vector<8x1xf32>,
    return
  }
}

</mosaic_0001>

<bundles_post_ra>
// kernel: pixelwise_conv_gru_forward.1
= control target key start
LH: loop header
LB: loop body
LE: loop exit
PB: predicated region body
PF: predicated region fallthrough
CT: control target
= control target key end

     0   :  { %v6832_v0 = vmov 0.0   ;;  %vm6833_vm0 = vmmov 0   ;;  %vm105_vm1 = vcmask 1040384   ;;  %v6834_v7 = vmov 0   ;;  %s8637_s1 = inlined_call_operand.vmem [shape: bf16[3,49,128], index: 1, kind: input, shape index: {}]   ;;  %s8638_s2 = inlined_call_operand.vmem [shape: bf16[128,896], index: 2, kind: input, shape index: {}]   ;;  %s8639_s0 = inlined_call_operand.vmem [shape: bf16[18,8,49], index: 0, kind: input, shape index: {}]   ;;  %s8640_s3 = inlined_call_operand.vmem [shape: f32[1,1280], index: 3, kind: input, shape index: {}]   ;;  %s8641_s4 = inlined_call_operand.vmem [shape: f32[8,1], index: 4, kind: output, shape index: {}]  }
   0x1   :  { %5780 = vmatprep.subr.bf16.mxu1 %v6832_v0  ;;  %v6475_v1 = vld [vmem:[%s8637_s1 + $0x1c] sm:$0xff]   ;;  %5788 = vmatprep.mubr.msk.bf16.mxu1 %vm6833_vm0, %v6832_v0  ;;  %v6476_v2 = vld [vmem:[%s8637_s1 + $0x24] sm:$0xff]   ;;  %v6478_v4 = vld [vmem:[%s8637_s1 + $0x34] ss:$0 sps:$4 sm:$0x11]   ;;  %v6888_v8 = vsel %vm105_vm1, 65535, %v6834_v7 }
   0x2   :  { %5804 = vmatprep.subr.bf16.mxu0 %v6832_v0  ;;  %5812 = vmatprep.mubr.msk.bf16.mxu0 %vm6833_vm0, %v6832_v0  ;;  %v6479_v3 = vld [vmem:[%s8637_s1 + $0x38] sm:$0xff]   ;;  %v6477_v5 = vld [vmem:[%s8637_s1 + $0x2c] sm:$0xff]   ;;  %v6481_v6 = vld [vmem:[%s8637_s1 + $0x40] sm:$0xff]   ;;  %v109_v10 = vand.u32 %v6478_v4, %v6888_v8  ;;  %vm101_vm2 = vcmask 400384   ;;  %vm5002_vm3 = vcmask 7168  }
   0x3   :  { %5781 = vmatpush3.bf16.msra.mxu1 %v6475_v1  ;;  %5805 = vmatpush3.bf16.msra.mxu0 %v6479_v3  ;;  %v6483_v9 = vld [vmem:[%s8637_s1 + $0x48] sm:$0xff]   ;;  %v6485_v11 = vld [vmem:[%s8637_s1 + $0x50] ss:$0 sps:$4 sm:$0x11]   ;;  %v5009_v12 = vld [vmem:[%s8639_s0 + $0x4] sm:$0xf] }
   0x4   :  { %5782 = vmatprep.subr.bf16.mxu1 %v6832_v0  ;;  %5806 = vmatprep.subr.bf16.mxu0 %v6832_v0  ;;  %v253_v13 = vand.u32 %v6485_v11, %v6888_v8  ;;  %v6480_v14 = vld [vmem:[%s8637_s1] sm:$0xff]   ;;  %v5027_v15 = vld [vmem:[%s8639_s0 + $0x8] sm:$0xf]  ;;  %v6484_v18 = vld [vmem:[%s8637_s1 + $0x10] sm:$0xff]  }
   0x5   :  { %v6490_v16 = vld [vmem:[%s8638_s2 + $0x8] ss:$28 sps:$4 sm:$0xff]   ;;  %v6486_v19 = vld [vmem:[%s8637_s1 + $0x18] ss:$0 sps:$4 sm:$0x11]   ;;  %v6519_v62 = vld [vmem:[%s8637_s1 + $0x1c] sm:$0xff]  }
   0x6   :  { %v6482_v17 = vld [vmem:[%s8637_s1 + $0x8] sm:$0xff]   ;;  %v6936_v20 = vld [vmem:[%s8638_s2 + $0x4] ss:$28 sps:$4 sm:$0xff]   ;;  %v176_v21 = vand.u32 %v6486_v19, %v6888_v8  ;;  %v6951_v24 = vld [vmem:[%s8638_s2 + $0x3c] ss:$28 sps:$4 sm:$0xff]  }
   0x7   :  { %5783 = vmatpush3.bf16.msra.mxu1 %v6476_v2  ;;  %5807 = vmatpush3.bf16.msra.mxu0 %v6481_v6  ;;  %v62_v22 = vld [vmem:[%s8639_s0] sm:$0xf]  ;;  %v6957_v25 = vld [vmem:[%s8638_s2 + $0x38] ss:$28 sps:$4 sm:$0xff]   ;;  %v6975_v28 = vld [vmem:[%s8638_s2 + $0x70] ss:$28 sps:$4 sm:$0xff]  }
   0x8   :  { %5784 = vmatprep.subr.bf16.mxu1 %v6832_v0  ;;  %5808 = vmatprep.subr.bf16.mxu0 %v6832_v0  ;;  %v6946_v23 = vld [vmem:[%s8638_s2] ss:$28 sps:$4 sm:$0xff]   ;;  %v6970_v27 = vld [vmem:[%s8638_s2 + $0x74] ss:$28 sps:$4 sm:$0xff]   ;;  %v6986_v30 = vld [vmem:[%s8638_s2 + $0xa8] ss:$28 sps:$4 sm:$0xff]  }
   0x9   :  { %v6494_v26 = vld [vmem:[%s8638_s2 + $0x40] ss:$28 sps:$4 sm:$0xff]   ;;  %v6498_v29 = vld [vmem:[%s8638_s2 + $0x78] ss:$28 sps:$4 sm:$0xff]   ;;  %v6991_v31 = vld [vmem:[%s8638_s2 + $0xac] ss:$28 sps:$4 sm:$0xff]  }
   0xa   :  { %v6502_v32 = vld [vmem:[%s8638_s2 + $0xb0] ss:$28 sps:$4 sm:$0xff]   ;;  %v6999_v33 = vld [vmem:[%s8638_s2 + $0xe4] ss:$28 sps:$4 sm:$0xff]   ;;  %v7014_v36 = vld [vmem:[%s8638_s2 + $0x11c] ss:$28 sps:$4 sm:$0xff]  }
   0xb   :  { %5785 = vmatpush3.bf16.msra.mxu1 %v6477_v5  ;;  %5809 = vmatpush3.bf16.msra.mxu0 %v6483_v9  ;;  %v7006_v34 = vld [vmem:[%s8638_s2 + $0xe0] ss:$28 sps:$4 sm:$0xff]   ;;  %v6506_v35 = vld [vmem:[%s8638_s2 + $0xe8] ss:$28 sps:$4 sm:$0xff]   ;;  %v7022_v37 = vld [vmem:[%s8638_s2 + $0x118] ss:$28 sps:$4 sm:$0xff]  }
   0xc   :  { %5786 = vmatprep.subr.bf16.mxu1 %v6832_v0  ;;  %5810 = vmatprep.subr.bf16.mxu0 %v6832_v0  ;;  %v6510_v38 = vld [vmem:[%s8638_s2 + $0x120] ss:$28 sps:$4 sm:$0xff]   ;;  %v7034_v39 = vld [vmem:[%s8638_s2 + $0x154] ss:$28 sps:$4 sm:$0xff]   ;;  %v7050_v42 = vld [vmem:[%s8638_s2 + $0x18c] ss:$28 sps:$4 sm:$0xff]  }
   0xd   :  { %v7039_v40 = vld [vmem:[%s8638_s2 + $0x150] ss:$28 sps:$4 sm:$0xff]   ;;  %v6514_v41 = vld [vmem:[%s8638_s2 + $0x158] ss:$28 sps:$4 sm:$0xff]   ;;  %v7055_v43 = vld [vmem:[%s8638_s2 + $0x188] ss:$28 sps:$4 sm:$0xff]  }
   0xe   :  { %v6518_v44 = vld [vmem:[%s8638_s2 + $0x190] ss:$28 sps:$4 sm:$0xff]   ;;  %v7068_v56 = vld [vmem:[%s8640_s3] ss:$0 sm:$0xff]  ;;  %v6521_v2 = vld [vmem:[%s8637_s1 + $0x24] sm:$0xff]  }
   0xf   :  { %5787 = vmatpush3.bf16.msra.mxu1 %v109_v10  ;;  %5811 = vmatpush3.bf16.msra.mxu0 %v253_v13  ;;  %v6520_v63 = vld [vmem:[%s8637_s1] sm:$0xff]   ;;  %v6522_v3 = vld [vmem:[%s8637_s1 + $0x8] sm:$0xff]   ;;  %v6524_v5 = vld [vmem:[%s8637_s1 + $0x10] sm:$0xff]  }
  0x10   :  { %5792 = vmatprep.subr.bf16.mxu1 %v6832_v0  ;;  %5816 = vmatprep.subr.bf16.mxu0 %v6832_v0  ;;  %v6523_v4 = vld [vmem:[%s8637_s1 + $0x2c] sm:$0xff]   ;;  %v6525_v6 = vld [vmem:[%s8637_s1 + $0x34] ss:$0 sps:$4 sm:$0x11]   ;;  %v5064_v13 = vld [vmem:[%s8639_s0 + $0x8] sm:$0xf] }
  0x11   :  { %v6526_v9 = vld [vmem:[%s8637_s1 + $0x18] ss:$0 sps:$4 sm:$0x11]   ;;  %v585_v10 = vand.u32 %v6525_v6, %v6888_v8  ;;  %v5083_v19 = vld [vmem:[%s8639_s0 + $0x10] sm:$0xf] }
  0x12   :  { %5789 = vmatmul.mubr.msk.bf16.vlgmr.msra.gmra.mrb[0].mxu1 %vm101_vm2, %v5009_v12  ;;  %5813 = vmatmul.mubr.msk.bf16.vlgmr.msra.gmra.mrb[0].mxu0 %vm101_vm2, %v5027_v15  ;;  %v652_v11 = vand.u32 %v6526_v9, %v6888_v8  ;;  %v5065_v12 = vld [vmem:[%s8639_s0 + $0xc] sm:$0xf]  ;;  %v6528_v15 = vld [vmem:[%s8637_s1 + $0x40] sm:$0xff]   ;;  %v6546_v6 = vld [vmem:[%s8637_s1 + $0x18] ss:$0 sps:$4 sm:$0x11]  }
  0x13   :  { %5793 = vmatpush3.bf16.msra.mxu1 %v6480_v14  ;;  %5800 = vmatprep.mubr.msk.bf16.mxu1 %vm6833_vm0, %v6832_v0  ;;  %v6527_v14 = vld [vmem:[%s8637_s1 + $0x38] sm:$0xff]  }
  0x14   :  { %5794 = vmatprep.subr.bf16.mxu1 %v6832_v0  ;;  %5817 = vmatpush3.bf16.msra.mxu0 %v6490_v16  ;;  %v6529_v16 = vld [vmem:[%s8637_s1 + $0x48] sm:$0xff]  }
  0x15   :  { %5832 = vmatprep.mubr.msk.bf16.mxu0 %vm6833_vm0, %v6832_v0  ;;  %5818 = vmatprep.subr.bf16.mxu0 %v6832_v0 }
  0x17   :  { %5795 = vmatpush3.bf16.msra.mxu1 %v6482_v17  ;;  %v6530_v17 = vld [vmem:[%s8637_s1 + $0x50] ss:$0 sps:$4 sm:$0x11]  }
  0x18   :  { %5796 = vmatprep.subr.bf16.mxu1 %v6832_v0  ;;  %5819 = vmatpush3.bf16.msra.mxu0 %v6494_v26  ;;  %v6537_v26 = vld [vmem:[%s8638_s2 + $0x158] ss:$28 sps:$4 sm:$0xff]  }
  0x19   :  { %5820 = vmatprep.subr.bf16.mxu0 %v6832_v0 }
  0x1b   :  { %5797 = vmatpush3.bf16.msra.mxu1 %v6484_v18  ;;  %v728_v18 = vand.u32 %v6530_v17, %v6888_v8  ;;  %v6829_v17 = vld [vmem:[%s8638_s2 + $0x3c] ss:$28 sps:$4 sm:$0xff]  }
  0x1c   :  { %5798 = vmatprep.subr.bf16.mxu1 %v6832_v0  ;;  %5821 = vmatpush3.bf16.msra.mxu0 %v6498_v29  ;;  %v6538_v29 = vld [vmem:[%s8638_s2 + $0x190] ss:$28 sps:$4 sm:$0xff]  }
  0x1d   :  { %5822 = vmatprep.subr.bf16.mxu0 %v6832_v0 }
  0x1f   :  { %5799 = vmatpush3.bf16.msra.mxu1 %v176_v21  ;;  %v6532_v21 = vld [vmem:[%s8638_s2 + $0x40] ss:$28 sps:$4 sm:$0xff]  }
  0x20   :  { %459 = vmatprep.subr.bf16.mxu1 %v6936_v20  ;;  %5823 = vmatpush3.bf16.msra.mxu0 %v6502_v32 }
  0x21   :  { %5824 = vmatprep.subr.bf16.mxu0 %v6832_v0 }
  0x22   :  { %5801 = vmatmul.mubr.msk.bf16.vlgmr.msra.gmra.mrb[4].mxu1 %vm101_vm2, %v62_v22  ;;  %v6533_v22 = vld [vmem:[%s8638_s2 + $0x78] ss:$28 sps:$4 sm:$0xff]  }
  0x23   :  { %460 = vmatpush1.bf16.msra.mxu1 %v6946_v23  ;;  %491 = vmatprep.mubr.bf16.mxu1 %v6834_v7 }
  0x24   :  { %461 = vmatprep.subr.bf16.mxu1 %v6951_v24  ;;  %5825 = vmatpush3.bf16.msra.mxu0 %v6506_v35 }
  0x25   :  { %5826 = vmatprep.subr.bf16.mxu0 %v6832_v0 }
  0x27   :  { %462 = vmatpush1.bf16.msra.mxu1 %v6957_v25 }
  0x28   :  { %463 = vmatprep.subr.bf16.mxu1 %v6970_v27  ;;  %5827 = vmatpush3.bf16.msra.mxu0 %v6510_v38 }
  0x29   :  { %5828 = vmatprep.subr.bf16.mxu0 %v6832_v0 }
  0x2b   :  { %464 = vmatpush1.bf16.msra.mxu1 %v6975_v28 }
  0x2c   :  { %465 = vmatprep.subr.bf16.mxu1 %v6991_v31  ;;  %5829 = vmatpush3.bf16.msra.mxu0 %v6514_v41 }
  0x2d   :  { %5830 = vmatprep.subr.bf16.mxu0 %v6832_v0 }
  0x2f   :  { %466 = vmatpush1.bf16.msra.mxu1 %v6986_v30 }
  0x30   :  { %467 = vmatprep.subr.bf16.mxu1 %v6999_v33  ;;  %5831 = vmatpush3.bf16.msra.mxu0 %v6518_v44 }
  0x31   :  { %5848 = vmatprep.subr.bf16.mxu0 %v6832_v0 }
  0x33   :  { %468 = vmatpush1.bf16.msra.mxu1 %v7006_v34 }
  0x34   :  { %469 = vmatprep.subr.bf16.mxu1 %v7014_v36 }
  0x37   :  { %470 = vmatpush1.bf16.msra.mxu1 %v7022_v37 }
  0x38   :  { %471 = vmatprep.subr.bf16.mxu1 %v7034_v39 }
  0x3b   :  { %472 = vmatpush1.bf16.msra.mxu1 %v7039_v40 }
  0x3c   :  { %473 = vmatprep.subr.bf16.mxu1 %v7050_v42 }
  0x3f   :  { %474 = vmatpush1.bf16.msra.mxu1 %v7055_v43 }
  0x40   :  { %5836 = vmatprep.subr.bf16.mxu1 %v6832_v0 }
  0xe5   :  { %v145_v45 = vpop.f32.mrb[0].mxu1  ;;  %v289_v49 = vpop.f32.mrb[0].mxu0 }
  0xe6   :  { %v5790_v46 = vpop.f32.mrb[1].mxu1  ;;  %v5814_v50 = vpop.f32.mrb[1].mxu0 }
  0xe7   :  { %v148_v47 = vpop.f32.mrb[2].mxu1  ;;  %v292_v51 = vpop.f32.mrb[2].mxu0 }
  0xe8   :  { %v5791_v48 = vpop.f32.mrb[3].mxu1  ;;  %v5815_v52 = vpop.f32.mrb[3].mxu0 }
  0xf5   :  { %v212_v53 = vpop.f32.mrb[4].mxu1 }
  0xf6   :  { %v213_v54 = vadd.f32 %v212_v53, %v145_v45  ;;  %v5802_v55 = vpop.f32.mrb[5].mxu1 }
  0xf7   :  { %v215_v57 = vpop.f32.mrb[6].mxu1 }
  0xf8   :  { %v295_v58 = vadd.f32 %v289_v49, %v213_v54  ;;  %v5803_v59 = vpop.f32.mrb[7].mxu1 }
  0xfa   :  { %v296_v60 = vadd.f32 %v7068_v56, %v295_v58 }
  0xfc   :  { %v297_v61 = vmax.f32 %v296_v60, 0.0 }
  0xfe   :  { %v298_v1 = vpack.c.bf16 %v297_v61, %v297_v61  ;;  %v6539_v61 = vld [vmem:[%s8637_s1 + $0x1c] sm:$0xff]  }
 0x100   :  { %492 = vmatmul.mubr.bf16.vlgmr.msra.gmra.mrb[8].mxu1 %v298_v1  ;;  %5833 = vmatmul.mubr.bf16.vlgmr.msra.gmra.mrb[4].mxu0 %v298_v1  ;;  %v6541_v1 = vld [vmem:[%s8637_s1 + $0x24] sm:$0xff]  }
 0x101   :  { %5837 = vmatpush3.bf16.msra.mxu1 %v6519_v62  ;;  %5849 = vmatpush3.bf16.msra.mxu0 %v6520_v63  ;;  %v6540_v62 = vld [vmem:[%s8637_s1] sm:$0xff]  }
 0x102   :  { %5838 = vmatprep.subr.bf16.mxu1 %v6832_v0  ;;  %5850 = vmatprep.subr.bf16.mxu0 %v6832_v0 }
 0x103   :  { %5844 = vmatprep.mubr.msk.bf16.mxu1 %vm6833_vm0, %v6832_v0  ;;  %5856 = vmatprep.mubr.msk.bf16.mxu0 %vm6833_vm0, %v6832_v0 }
 0x105   :  { %5839 = vmatpush3.bf16.msra.mxu1 %v6521_v2  ;;  %5851 = vmatpush3.bf16.msra.mxu0 %v6522_v3  ;;  %v6542_v2 = vld [vmem:[%s8637_s1 + $0x8] sm:$0xff]  }
 0x106   :  { %5840 = vmatprep.subr.bf16.mxu1 %v6832_v0  ;;  %5852 = vmatprep.subr.bf16.mxu0 %v6832_v0  ;;  %v6543_v3 = vld [vmem:[%s8637_s1 + $0x2c] sm:$0xff]  }
 0x109   :  { %5841 = vmatpush3.bf16.msra.mxu1 %v6523_v4  ;;  %5853 = vmatpush3.bf16.msra.mxu0 %v6524_v5  ;;  %v6544_v4 = vld [vmem:[%s8637_s1 + $0x10] sm:$0xff]  }
 0x10a   :  { %5842 = vmatprep.subr.bf16.mxu1 %v6832_v0  ;;  %5854 = vmatprep.subr.bf16.mxu0 %v6832_v0  ;;  %v6545_v5 = vld [vmem:[%s8637_s1 + $0x34] ss:$0 sps:$4 sm:$0x11]  }
 0x10b   :  { %v1061_v9 = vand.u32 %v6545_v5, %v6888_v8  ;;  %v6569_v5 = vld [vmem:[%s8637_s1 + $0x48] sm:$0xff]  }
 0x10d   :  { %5843 = vmatpush3.bf16.msra.mxu1 %v585_v10  ;;  %5855 = vmatpush3.bf16.msra.mxu0 %v652_v11  ;;  %v1128_v10 = vand.u32 %v6546_v6, %v6888_v8  ;;  %v5121_v11 = vld [vmem:[%s8639_s0 + $0x14] sm:$0xf]  ;;  %v6570_v6 = vld [vmem:[%s8637_s1 + $0x50] ss:$0 sps:$4 sm:$0x11]  }
 0x10e   :  { %5860 = vmatprep.subr.bf16.mxu1 %v6832_v0  ;;  %934 = vmatprep.subr.bf16.mxu0 %v6936_v20  ;;  %v6531_v20 = vld [vmem:[%s8638_s2 + $0x8] ss:$28 sps:$4 sm:$0xff]  }
 0x110   :  { %5845 = vmatmul.mubr.msk.bf16.vlgmr.msra.gmra.mrb[12].mxu1 %vm101_vm2, %v5065_v12  ;;  %5857 = vmatmul.mubr.msk.bf16.vlgmr.msra.gmra.mrb[8].mxu0 %vm101_vm2, %v5064_v13  ;;  %v5120_v12 = vld [vmem:[%s8639_s0 + $0x10] sm:$0xf]  ;;  %v6547_v13 = vld [vmem:[%s8637_s1 + $0x38] sm:$0xff]  }
 0x111   :  { %5861 = vmatpush3.bf16.msra.mxu1 %v6527_v14  ;;  %5868 = vmatprep.mubr.msk.bf16.mxu1 %vm6833_vm0, %v6832_v0  ;;  %v6827_v14 = vld [vmem:[%s8638_s2 + $0x4] ss:$28 sps:$4 sm:$0xff]  }
 0x112   :  { %5862 = vmatprep.subr.bf16.mxu1 %v6832_v0  ;;  %935 = vmatpush1.bf16.msra.mxu0 %v6946_v23  ;;  %v6534_v23 = vld [vmem:[%s8638_s2 + $0xb0] ss:$28 sps:$4 sm:$0xff]  }
 0x113   :  { %936 = vmatprep.subr.bf16.mxu0 %v6951_v24  ;;  %966 = vmatprep.mubr.bf16.mxu0 %v6834_v7  ;;  %v6535_v24 = vld [vmem:[%s8638_s2 + $0xe8] ss:$28 sps:$4 sm:$0xff]  }
 0x115   :  { %5863 = vmatpush3.bf16.msra.mxu1 %v6528_v15  ;;  %v6548_v15 = vld [vmem:[%s8637_s1 + $0x40] sm:$0xff]  }
 0x116   :  { %5864 = vmatprep.subr.bf16.mxu1 %v6832_v0  ;;  %937 = vmatpush1.bf16.msra.mxu0 %v6957_v25  ;;  %v6536_v25 = vld [vmem:[%s8638_s2 + $0x120] ss:$28 sps:$4 sm:$0xff]  }
 0x117   :  { %938 = vmatprep.subr.bf16.mxu0 %v6970_v27 }
 0x119   :  { %5865 = vmatpush3.bf16.msra.mxu1 %v6529_v16  ;;  %v6828_v16 = vld [vmem:[%s8638_s2] ss:$28 sps:$4 sm:$0xff]  }
 0x11a   :  { %5866 = vmatprep.subr.bf16.mxu1 %v6832_v0  ;;  %939 = vmatpush1.bf16.msra.mxu0 %v6975_v28 }
 0x11b   :  { %940 = vmatprep.subr.bf16.mxu0 %v6991_v31 }
 0x11d   :  { %5867 = vmatpush3.bf16.msra.mxu1 %v728_v18  ;;  %v6549_v18 = vld [vmem:[%s8637_s1 + $0x48] sm:$0xff]  }
 0x11e   :  { %5872 = vmatprep.subr.bf16.mxu1 %v6832_v0  ;;  %941 = vmatpush1.bf16.msra.mxu0 %v6986_v30 }
 0x11f   :  { %942 = vmatprep.subr.bf16.mxu0 %v6999_v33 }
 0x120   :  { %5869 = vmatmul.mubr.msk.bf16.vlgmr.msra.gmra.mrb[16].mxu1 %vm101_vm2, %v5083_v19  ;;  %v6550_v19 = vld [vmem:[%s8637_s1 + $0x50] ss:$0 sps:$4 sm:$0x11]  }
 0x121   :  { %5888 = vmatprep.mubr.msk.bf16.mxu1 %vm6833_vm0, %v6832_v0  ;;  %5873 = vmatpush3.bf16.msra.mxu1 %v6531_v20  ;;  %v6830_v20 = vld [vmem:[%s8638_s2 + $0x38] ss:$28 sps:$4 sm:$0xff]  }
 0x122   :  { %943 = vmatpush1.bf16.msra.mxu0 %v7006_v34  ;;  %5874 = vmatprep.subr.bf16.mxu1 %v6832_v0 }
 0x123   :  { %944 = vmatprep.subr.bf16.mxu0 %v7014_v36 }
 0x125   :  { %5875 = vmatpush3.bf16.msra.mxu1 %v6532_v21  ;;  %v1204_v21 = vand.u32 %v6550_v19, %v6888_v8  ;;  %v6582_v19 = vld [vmem:[%s8638_s2 + $0x78] ss:$28 sps:$4 sm:$0xff]  }
 0x126   :  { %945 = vmatpush1.bf16.msra.mxu0 %v7022_v37  ;;  %5876 = vmatprep.subr.bf16.mxu1 %v6832_v0 }
 0x127   :  { %946 = vmatprep.subr.bf16.mxu0 %v7034_v39 }
 0x129   :  { %5877 = vmatpush3.bf16.msra.mxu1 %v6533_v22  ;;  %v5139_v22 = vld [vmem:[%s8639_s0 + $0x18] sm:$0xf] }
 0x12a   :  { %947 = vmatpush1.bf16.msra.mxu0 %v7039_v40  ;;  %5878 = vmatprep.subr.bf16.mxu1 %v6832_v0 }
 0x12b   :  { %948 = vmatprep.subr.bf16.mxu0 %v7050_v42 }
 0x12d   :  { %5879 = vmatpush3.bf16.msra.mxu1 %v6534_v23 }
 0x12e   :  { %949 = vmatpush1.bf16.msra.mxu0 %v7055_v43  ;;  %5880 = vmatprep.subr.bf16.mxu1 %v6832_v0 }
 0x12f   :  { %5892 = vmatprep.subr.bf16.mxu0 %v6832_v0 }
 0x131   :  { %5881 = vmatpush3.bf16.msra.mxu1 %v6535_v24 }
 0x132   :  { %5882 = vmatprep.subr.bf16.mxu1 %v6832_v0 }
 0x135   :  { %5883 = vmatpush3.bf16.msra.mxu1 %v6536_v25 }
 0x136   :  { %5884 = vmatprep.subr.bf16.mxu1 %v6832_v0 }
 0x139   :  { %5885 = vmatpush3.bf16.msra.mxu1 %v6537_v26 }
 0x13a   :  { %5886 = vmatprep.subr.bf16.mxu1 %v6832_v0 }
 0x13d   :  { %5887 = vmatpush3.bf16.msra.mxu1 %v6538_v29 }
 0x13e   :  { %5904 = vmatprep.subr.bf16.mxu1 %v6832_v0 }
 0x1d3   :  { %v7191_v32 = vpop.f32.mrb[4].mxu0 }
 0x1d4   :  { %v5834_v35 = vpop.f32.mrb[5].mxu0 }
 0x1d5   :  { %v537_v38 = vpop.f32.mrb[6].mxu0 }
 0x1d6   :  { %v5835_v41 = vpop.f32.mrb[7].mxu0 }
 0x1e3   :  { %v621_v44 = vpop.f32.mrb[12].mxu1  ;;  %v688_v45 = vpop.f32.mrb[8].mxu0 }
 0x1e4   :  { %v5846_v46 = vpop.f32.mrb[13].mxu1  ;;  %v689_v47 = vadd.f32 %v688_v45, %v621_v44  ;;  %v5858_v48 = vpop.f32.mrb[9].mxu0 }
 0x1e5   :  { %v624_v49 = vpop.f32.mrb[14].mxu1  ;;  %v691_v50 = vpop.f32.mrb[10].mxu0 }
 0x1e6   :  { %v5847_v51 = vpop.f32.mrb[15].mxu1  ;;  %v5859_v52 = vpop.f32.mrb[11].mxu0 }
 0x1e7   :  { %v6559_v52 = vld [vmem:[%s8637_s1 + $0x1c] sm:$0xff]  }
 0x1f3   :  { %v764_v53 = vpop.f32.mrb[16].mxu1 }
 0x1f4   :  { %v770_v54 = vadd.f32 %v764_v53, %v689_v47  ;;  %v5870_v55 = vpop.f32.mrb[17].mxu1  ;;  %v6560_v53 = vld [vmem:[%s8637_s1] sm:$0xff]  }
 0x1f5   :  { %v767_v57 = vpop.f32.mrb[18].mxu1  ;;  %v6561_v55 = vld [vmem:[%s8637_s1 + $0x24] sm:$0xff]  }
 0x1f6   :  { %v771_v58 = vadd.f32 %v7068_v56, %v770_v54  ;;  %v5871_v59 = vpop.f32.mrb[19].mxu1  ;;  %v6562_v57 = vld [vmem:[%s8637_s1 + $0x8] sm:$0xff]  }
 0x1f7   :  { %v6564_v59 = vld [vmem:[%s8637_s1 + $0x10] sm:$0xff]  }
 0x1f8   :  { %v772_v60 = vmax.f32 %v771_v58, 0.0  ;;  %v6563_v58 = vld [vmem:[%s8637_s1 + $0x2c] sm:$0xff]  }
 0x1fa   :  { %v773_v63 = vpack.c.bf16 %v772_v60, %v772_v60  ;;  %v6565_v60 = vld [vmem:[%s8637_s1 + $0x34] ss:$0 sps:$4 sm:$0x11]  }
 0x1fc   :  { %967 = vmatmul.mubr.bf16.vlgmr.msra.gmra.mrb[12].mxu0 %v773_v63  ;;  %5889 = vmatmul.mubr.bf16.vlgmr.msra.gmra.mrb[20].mxu1 %v773_v63 }
 0x1fd   :  { %5893 = vmatpush3.bf16.msra.mxu0 %v6539_v61  ;;  %5905 = vmatpush3.bf16.msra.mxu1 %v6540_v62  ;;  %v6566_v61 = vld [vmem:[%s8637_s1 + $0x18] ss:$0 sps:$4 sm:$0x11]   ;;  %v1537_v62 = vand.u32 %v6565_v60, %v6888_v8 }
 0x1fe   :  { %5894 = vmatprep.subr.bf16.mxu0 %v6832_v0  ;;  %5906 = vmatprep.subr.bf16.mxu1 %v6832_v0  ;;  %v1604_v63 = vand.u32 %v6566_v61, %v6888_v8  ;;  %v6605_v61 = vld [vmem:[%s8637_s1 + $0x24] sm:$0xff]  }
 0x1ff   :  { %5900 = vmatprep.mubr.msk.bf16.mxu0 %vm6833_vm0, %v6832_v0  ;;  %5912 = vmatprep.mubr.msk.bf16.mxu1 %vm6833_vm0, %v6832_v0 }
 0x201   :  { %5895 = vmatpush3.bf16.msra.mxu0 %v6541_v1  ;;  %5907 = vmatpush3.bf16.msra.mxu1 %v6542_v2  ;;  %v5177_v1 = vld [vmem:[%s8639_s0 + $0x1c] sm:$0xf]  ;;  %v5176_v2 = vld [vmem:[%s8639_s0 + $0x18] sm:$0xf] }
 0x202   :  { %5896 = vmatprep.subr.bf16.mxu0 %v6832_v0  ;;  %5908 = vmatprep.subr.bf16.mxu1 %v6832_v0 }
 0x205   :  { %5897 = vmatpush3.bf16.msra.mxu0 %v6543_v3  ;;  %5909 = vmatpush3.bf16.msra.mxu1 %v6544_v4  ;;  %v6567_v3 = vld [vmem:[%s8637_s1 + $0x38] sm:$0xff]   ;;  %v6568_v4 = vld [vmem:[%s8637_s1 + $0x40] sm:$0xff]  }
 0x206   :  { %5898 = vmatprep.subr.bf16.mxu0 %v6832_v0  ;;  %5910 = vmatprep.subr.bf16.mxu1 %v6832_v0 }
 0x209   :  { %5899 = vmatpush3.bf16.msra.mxu0 %v1061_v9  ;;  %5911 = vmatpush3.bf16.msra.mxu1 %v1128_v10  ;;  %v1680_v9 = vand.u32 %v6570_v6, %v6888_v8  ;;  %v5195_v10 = vld [vmem:[%s8639_s0 + $0x20] sm:$0xf]  ;;  %v5233_v6 = vld [vmem:[%s8639_s0 + $0x24] sm:$0xf] }
 0x20a   :  { %5916 = vmatprep.subr.bf16.mxu0 %v6832_v0  ;;  %1410 = vmatprep.subr.bf16.mxu1 %v6827_v14  ;;  %v7412_v14 = vld [vmem:[%s8638_s2 + $0x3c] ss:$28 sps:$4 sm:$0xff]  }
 0x20c   :  { %5901 = vmatmul.mubr.msk.bf16.vlgmr.msra.gmra.mrb[16].mxu0 %vm101_vm2, %v5121_v11  ;;  %5913 = vmatmul.mubr.msk.bf16.vlgmr.msra.gmra.mrb[24].mxu1 %vm101_vm2, %v5120_v12  ;;  %v7399_v11 = vld [vmem:[%s8638_s2] ss:$28 sps:$4 sm:$0xff]  }
 0x20d   :  { %5917 = vmatpush3.bf16.msra.mxu0 %v6547_v13  ;;  %5924 = vmatprep.mubr.msk.bf16.mxu0 %vm6833_vm0, %v6832_v0  ;;  %v7404_v12 = vld [vmem:[%s8638_s2 + $0x4] ss:$28 sps:$4 sm:$0xff]  }
 0x20e   :  { %5918 = vmatprep.subr.bf16.mxu0 %v6832_v0  ;;  %1411 = vmatpush1.bf16.msra.mxu1 %v6828_v16  ;;  %v6574_v13 = vld [vmem:[%s8638_s2 + $0x8] ss:$28 sps:$4 sm:$0xff]   ;;  %v7422_v16 = vld [vmem:[%s8638_s2 + $0x38] ss:$28 sps:$4 sm:$0xff]  }
 0x20f   :  { %1412 = vmatprep.subr.bf16.mxu1 %v6829_v17  ;;  %1442 = vmatprep.mubr.bf16.mxu1 %v6834_v7  ;;  %v7431_v17 = vld [vmem:[%s8638_s2 + $0x74] ss:$28 sps:$4 sm:$0xff]  }
 0x211   :  { %5919 = vmatpush3.bf16.msra.mxu0 %v6548_v15  ;;  %v6578_v15 = vld [vmem:[%s8638_s2 + $0x40] ss:$28 sps:$4 sm:$0xff]  }
 0x212   :  { %5920 = vmatprep.subr.bf16.mxu0 %v6832_v0  ;;  %1413 = vmatpush1.bf16.msra.mxu1 %v6830_v20  ;;  %v7446_v20 = vld [vmem:[%s8638_s2 + $0xac] ss:$28 sps:$4 sm:$0xff]  }
 0x213   :  { %1414 = vmatprep.subr.bf16.mxu1 %v6970_v27  ;;  %v6551_v27 = vld [vmem:[%s8638_s2 + $0x8] ss:$28 sps:$4 sm:$0xff]  }
 0x215   :  { %5921 = vmatpush3.bf16.msra.mxu0 %v6549_v18  ;;  %v7436_v18 = vld [vmem:[%s8638_s2 + $0x70] ss:$28 sps:$4 sm:$0xff]  }
 0x216   :  { %5922 = vmatprep.subr.bf16.mxu0 %v6832_v0  ;;  %1415 = vmatpush1.bf16.msra.mxu1 %v6975_v28  ;;  %v6552_v28 = vld [vmem:[%s8638_s2 + $0x40] ss:$28 sps:$4 sm:$0xff]  }
 0x217   :  { %1416 = vmatprep.subr.bf16.mxu1 %v6991_v31  ;;  %v6554_v31 = vld [vmem:[%s8638_s2 + $0xb0] ss:$28 sps:$4 sm:$0xff]  }
 0x219   :  { %5923 = vmatpush3.bf16.msra.mxu0 %v1204_v21  ;;  %v7451_v21 = vld [vmem:[%s8638_s2 + $0xa8] ss:$28 sps:$4 sm:$0xff]  }
 0x21a   :  { %5928 = vmatprep.subr.bf16.mxu0 %v6832_v0  ;;  %1417 = vmatpush1.bf16.msra.mxu1 %v6986_v30  ;;  %v6553_v30 = vld [vmem:[%s8638_s2 + $0x78] ss:$28 sps:$4 sm:$0xff]  }
 0x21b   :  { %1418 = vmatprep.subr.bf16.mxu1 %v6999_v33  ;;  %v6555_v33 = vld [vmem:[%s8638_s2 + $0xe8] ss:$28 sps:$4 sm:$0xff]  }
 0x21c   :  { %5925 = vmatmul.mubr.msk.bf16.vlgmr.msra.gmra.mrb[20].mxu0 %vm101_vm2, %v5139_v22  ;;  %v6586_v22 = vld [vmem:[%s8638_s2 + $0xb0] ss:$28 sps:$4 sm:$0xff]  }
 0x21d   :  { %5944 = vmatprep.mubr.msk.bf16.mxu0 %vm6833_vm0, %v6832_v0  ;;  %5929 = vmatpush3.bf16.msra.mxu0 %v6551_v27  ;;  %v7461_v27 = vld [vmem:[%s8638_s2 + $0xe4] ss:$28 sps:$4 sm:$0xff]  }
 0x21e   :  { %1419 = vmatpush1.bf16.msra.mxu1 %v7006_v34  ;;  %5930 = vmatprep.subr.bf16.mxu0 %v6832_v0  ;;  %v6556_v34 = vld [vmem:[%s8638_s2 + $0x120] ss:$28 sps:$4 sm:$0xff]  }
 0x21f   :  { %1420 = vmatprep.subr.bf16.mxu1 %v7014_v36  ;;  %v6557_v36 = vld [vmem:[%s8638_s2 + $0x158] ss:$28 sps:$4 sm:$0xff]  }
 0x221   :  { %5931 = vmatpush3.bf16.msra.mxu0 %v6552_v28  ;;  %v7467_v28 = vld [vmem:[%s8638_s2 + $0xe0] ss:$28 sps:$4 sm:$0xff]  }
 0x222   :  { %1421 = vmatpush1.bf16.msra.mxu1 %v7022_v37  ;;  %5932 = vmatprep.subr.bf16.mxu0 %v6832_v0  ;;  %v6558_v37 = vld [vmem:[%s8638_s2 + $0x190] ss:$28 sps:$4 sm:$0xff]  }
 0x223   :  { %1422 = vmatprep.subr.bf16.mxu1 %v7034_v39 }
 0x225   :  { %5933 = vmatpush3.bf16.msra.mxu0 %v6553_v30  ;;  %v6590_v30 = vld [vmem:[%s8638_s2 + $0xe8] ss:$28 sps:$4 sm:$0xff]  }
 0x226   :  { %1423 = vmatpush1.bf16.msra.mxu1 %v7039_v40  ;;  %5934 = vmatprep.subr.bf16.mxu0 %v6832_v0 }
 0x227   :  { %1424 = vmatprep.subr.bf16.mxu1 %v7050_v42 }
 0x229   :  { %5935 = vmatpush3.bf16.msra.mxu0 %v6554_v31  ;;  %v7476_v31 = vld [vmem:[%s8638_s2 + $0x11c] ss:$28 sps:$4 sm:$0xff]  }
 0x22a   :  { %1425 = vmatpush1.bf16.msra.mxu1 %v7055_v43  ;;  %5936 = vmatprep.subr.bf16.mxu0 %v6832_v0 }
 0x22b   :  { %5948 = vmatprep.subr.bf16.mxu1 %v6832_v0 }
 0x22d   :  { %5937 = vmatpush3.bf16.msra.mxu0 %v6555_v33  ;;  %v7483_v33 = vld [vmem:[%s8638_s2 + $0x118] ss:$28 sps:$4 sm:$0xff]  }
 0x22e   :  { %5938 = vmatprep.subr.bf16.mxu0 %v6832_v0 }
 0x231   :  { %5939 = vmatpush3.bf16.msra.mxu0 %v6556_v34  ;;  %v6594_v34 = vld [vmem:[%s8638_s2 + $0x120] ss:$28 sps:$4 sm:$0xff]  }
 0x232   :  { %5940 = vmatprep.subr.bf16.mxu0 %v6832_v0 }
 0x235   :  { %5941 = vmatpush3.bf16.msra.mxu0 %v6557_v36  ;;  %v7494_v36 = vld [vmem:[%s8638_s2 + $0x154] ss:$28 sps:$4 sm:$0xff]  }
 0x236   :  { %5942 = vmatprep.subr.bf16.mxu0 %v6832_v0 }
 0x239   :  { %5943 = vmatpush3.bf16.msra.mxu0 %v6558_v37  ;;  %v7499_v37 = vld [vmem:[%s8638_s2 + $0x150] ss:$28 sps:$4 sm:$0xff]  }
 0x23a   :  { %5960 = vmatprep.subr.bf16.mxu0 %v6832_v0 }
 0x2cf   :  { %v7322_v39 = vpop.f32.mrb[20].mxu1 }
 0x2d0   :  { %v5890_v40 = vpop.f32.mrb[21].mxu1 }
 0x2d1   :  { %v1012_v42 = vpop.f32.mrb[22].mxu1  ;;  %v6598_v40 = vld [vmem:[%s8638_s2 + $0x158] ss:$28 sps:$4 sm:$0xff]  }
 0x2d2   :  { %v5891_v43 = vpop.f32.mrb[23].mxu1  ;;  %v7510_v42 = vld [vmem:[%s8638_s2 + $0x18c] ss:$28 sps:$4 sm:$0xff]  }
 0x2d3   :  { %v7515_v43 = vld [vmem:[%s8638_s2 + $0x188] ss:$28 sps:$4 sm:$0xff]  }
 0x2df   :  { %v1097_v23 = vpop.f32.mrb[16].mxu0  ;;  %v1164_v24 = vpop.f32.mrb[24].mxu1 }
 0x2e0   :  { %v5902_v25 = vpop.f32.mrb[17].mxu0  ;;  %v1165_v26 = vadd.f32 %v1164_v24, %v1097_v23  ;;  %v5914_v29 = vpop.f32.mrb[25].mxu1  ;;  %v6602_v23 = vld [vmem:[%s8638_s2 + $0x190] ss:$28 sps:$4 sm:$0xff]  }
 0x2e1   :  { %v1100_v35 = vpop.f32.mrb[18].mxu0  ;;  %v1167_v38 = vpop.f32.mrb[26].mxu1 }
 0x2e2   :  { %v5903_v41 = vpop.f32.mrb[19].mxu0  ;;  %v5915_v44 = vpop.f32.mrb[27].mxu1 }
 0x2ef   :  { %v1240_v45 = vpop.f32.mrb[20].mxu0 }
 0x2f0   :  { %v1246_v46 = vadd.f32 %v1240_v45, %v1165_v26  ;;  %v5926_v47 = vpop.f32.mrb[21].mxu0 }
 0x2f1   :  { %v1243_v48 = vpop.f32.mrb[22].mxu0 }
 0x2f2   :  { %v1247_v49 = vadd.f32 %v7068_v56, %v1246_v46  ;;  %v5927_v50 = vpop.f32.mrb[23].mxu0 }
 0x2f4   :  { %v1248_v51 = vmax.f32 %v1247_v49, 0.0 }
 0x2f6   :  { %v1249_v54 = vpack.c.bf16 %v1248_v51, %v1248_v51 }
 0x2f8   :  { %1443 = vmatmul.mubr.bf16.vlgmr.msra.gmra.mrb[28].mxu1 %v1249_v54  ;;  %5945 = vmatmul.mubr.bf16.vlgmr.msra.gmra.mrb[24].mxu0 %v1249_v54 }
 0x2f9   :  { %5949 = vmatpush3.bf16.msra.mxu1 %v6559_v52  ;;  %5961 = vmatpush3.bf16.msra.mxu0 %v6560_v53 }
 0x2fa   :  { %5950 = vmatprep.subr.bf16.mxu1 %v6832_v0  ;;  %5962 = vmatprep.subr.bf16.mxu0 %v6832_v0 }
 0x2fb   :  { %5956 = vmatprep.mubr.msk.bf16.mxu1 %vm6833_vm0, %v6832_v0  ;;  %5968 = vmatprep.mubr.msk.bf16.mxu0 %vm6833_vm0, %v6832_v0 }
 0x2fd   :  { %5951 = vmatpush3.bf16.msra.mxu1 %v6561_v55  ;;  %5963 = vmatpush3.bf16.msra.mxu0 %v6562_v57 }
 0x2fe   :  { %5952 = vmatprep.subr.bf16.mxu1 %v6832_v0  ;;  %5964 = vmatprep.subr.bf16.mxu0 %v6832_v0 }
 0x301   :  { %5953 = vmatpush3.bf16.msra.mxu1 %v6563_v58  ;;  %5965 = vmatpush3.bf16.msra.mxu0 %v6564_v59  ;;  %v6603_v58 = vld [vmem:[%s8637_s1 + $0x1c] sm:$0xff]  }
 0x302   :  { %5954 = vmatprep.subr.bf16.mxu1 %v6832_v0  ;;  %5966 = vmatprep.subr.bf16.mxu0 %v6832_v0  ;;  %v6604_v59 = vld [vmem:[%s8637_s1] sm:$0xff]  }
 0x305   :  { %5955 = vmatpush3.bf16.msra.mxu1 %v1537_v62  ;;  %5967 = vmatpush3.bf16.msra.mxu0 %v1604_v63  ;;  %v6606_v62 = vld [vmem:[%s8637_s1 + $0x8] sm:$0xff]  }
 0x306   :  { %5972 = vmatprep.subr.bf16.mxu1 %v6832_v0  ;;  %1886 = vmatprep.subr.bf16.mxu0 %v7404_v12  ;;  %v6607_v63 = vld [vmem:[%s8637_s1 + $0x2c] sm:$0xff]  }
 0x308   :  { %5957 = vmatmul.mubr.msk.bf16.vlgmr.msra.gmra.mrb[32].mxu1 %vm101_vm2, %v5177_v1  ;;  %5969 = vmatmul.mubr.msk.bf16.vlgmr.msra.gmra.mrb[28].mxu0 %vm101_vm2, %v5176_v2  ;;  %v6608_v1 = vld [vmem:[%s8637_s1 + $0x10] sm:$0xff]  }
 0x309   :  { %5973 = vmatpush3.bf16.msra.mxu1 %v6567_v3  ;;  %5980 = vmatprep.mubr.msk.bf16.mxu1 %vm6833_vm0, %v6832_v0  ;;  %v6609_v2 = vld [vmem:[%s8637_s1 + $0x34] ss:$0 sps:$4 sm:$0x11]   ;;  %v6610_v3 = vld [vmem:[%s8637_s1 + $0x18] ss:$0 sps:$4 sm:$0x11]  }
 0x30a   :  { %5974 = vmatprep.subr.bf16.mxu1 %v6832_v0  ;;  %1918 = vmatprep.mubr.bf16.mxu0 %v6834_v7 }
 0x30b   :  { %1887 = vmatpush1.bf16.msra.mxu0 %v7399_v11 }
 0x30c   :  { %1888 = vmatprep.subr.bf16.mxu0 %v7412_v14 }
 0x30d   :  { %5975 = vmatpush3.bf16.msra.mxu1 %v6568_v4  ;;  %v2013_v4 = vand.u32 %v6609_v2, %v6888_v8  ;;  %v6624_v2 = vld [vmem:[%s8637_s1] sm:$0xff]  }
 0x30e   :  { %5976 = vmatprep.subr.bf16.mxu1 %v6832_v0 }
 0x30f   :  { %1889 = vmatpush1.bf16.msra.mxu0 %v7422_v16 }
 0x310   :  { %1890 = vmatprep.subr.bf16.mxu0 %v7431_v17 }
 0x311   :  { %5977 = vmatpush3.bf16.msra.mxu1 %v6569_v5  ;;  %v2080_v5 = vand.u32 %v6610_v3, %v6888_v8 }
 0x312   :  { %5978 = vmatprep.subr.bf16.mxu1 %v6832_v0 }
 0x313   :  { %1891 = vmatpush1.bf16.msra.mxu0 %v7436_v18 }
 0x314   :  { %1892 = vmatprep.subr.bf16.mxu0 %v7446_v20 }
 0x315   :  { %5979 = vmatpush3.bf16.msra.mxu1 %v1680_v9  ;;  %v5232_v9 = vld [vmem:[%s8639_s0 + $0x20] sm:$0xf] }
 0x316   :  { %5984 = vmatprep.subr.bf16.mxu1 %v6832_v0 }
 0x317   :  { %1893 = vmatpush1.bf16.msra.mxu0 %v7451_v21 }
 0x318   :  { %5981 = vmatmul.mubr.msk.bf16.vlgmr.msra.gmra.mrb[36].mxu1 %vm101_vm2, %v5195_v10  ;;  %1894 = vmatprep.subr.bf16.mxu0 %v7461_v27  ;;  %v6611_v10 = vld [vmem:[%s8637_s1 + $0x38] sm:$0xff]  }
 0x319   :  { %6000 = vmatprep.mubr.msk.bf16.mxu1 %vm6833_vm0, %v6832_v0  ;;  %5985 = vmatpush3.bf16.msra.mxu1 %v6574_v13  ;;  %v6612_v13 = vld [vmem:[%s8637_s1 + $0x40] sm:$0xff]  }
 0x31a   :  { %5986 = vmatprep.subr.bf16.mxu1 %v6832_v0 }
 0x31b   :  { %1895 = vmatpush1.bf16.msra.mxu0 %v7467_v28 }
 0x31c   :  { %1896 = vmatprep.subr.bf16.mxu0 %v7476_v31 }
 0x31d   :  { %5987 = vmatpush3.bf16.msra.mxu1 %v6578_v15  ;;  %v6613_v15 = vld [vmem:[%s8637_s1 + $0x48] sm:$0xff]  }
 0x31e   :  { %5988 = vmatprep.subr.bf16.mxu1 %v6832_v0 }
 0x31f   :  { %1897 = vmatpush1.bf16.msra.mxu0 %v7483_v33 }
 0x320   :  { %1898 = vmatprep.subr.bf16.mxu0 %v7494_v36 }
 0x321   :  { %5989 = vmatpush3.bf16.msra.mxu1 %v6582_v19  ;;  %v6614_v19 = vld [vmem:[%s8637_s1 + $0x50] ss:$0 sps:$4 sm:$0x11]  }
 0x322   :  { %5990 = vmatprep.subr.bf16.mxu1 %v6832_v0 }
 0x323   :  { %1899 = vmatpush1.bf16.msra.mxu0 %v7499_v37 }
 0x324   :  { %1900 = vmatprep.subr.bf16.mxu0 %v7510_v42 }
 0x325   :  { %5991 = vmatpush3.bf16.msra.mxu1 %v6586_v22  ;;  %v2156_v22 = vand.u32 %v6614_v19, %v6888_v8  ;;  %v5289_v19 = vld [vmem:[%s8639_s0 + $0x2c] sm:$0xf] }
 0x326   :  { %5992 = vmatprep.subr.bf16.mxu1 %v6832_v0 }
 0x327   :  { %1901 = vmatpush1.bf16.msra.mxu0 %v7515_v43 }
 0x328   :  { %6004 = vmatprep.subr.bf16.mxu0 %v6832_v0 }
 0x329   :  { %5993 = vmatpush3.bf16.msra.mxu1 %v6590_v30  ;;  %v5251_v30 = vld [vmem:[%s8639_s0 + $0x28] sm:$0xf] }
 0x32a   :  { %5994 = vmatprep.subr.bf16.mxu1 %v6832_v0 }
 0x32d   :  { %5995 = vmatpush3.bf16.msra.mxu1 %v6594_v34  ;;  %v6615_v34 = vld [vmem:[%s8638_s2 + $0x8] ss:$28 sps:$4 sm:$0xff]  }
 0x32e   :  { %5996 = vmatprep.subr.bf16.mxu1 %v6832_v0 }
 0x331   :  { %5997 = vmatpush3.bf16.msra.mxu1 %v6598_v40  ;;  %v6616_v40 = vld [vmem:[%s8638_s2 + $0x40] ss:$28 sps:$4 sm:$0xff]  }
 0x332   :  { %5998 = vmatprep.subr.bf16.mxu1 %v6832_v0 }
 0x335   :  { %5999 = vmatpush3.bf16.msra.mxu1 %v6602_v23  ;;  %v6617_v23 = vld [vmem:[%s8638_s2 + $0x78] ss:$28 sps:$4 sm:$0xff]  }
 0x336   :  { %6016 = vmatprep.subr.bf16.mxu1 %v6832_v0 }
 0x3cb   :  { %v7525_v24 = vpop.f32.mrb[24].mxu0 }
 0x3cc   :  { %v5946_v25 = vpop.f32.mrb[25].mxu0 }
 0x3cd   :  { %v1488_v26 = vpop.f32.mrb[26].mxu0  ;;  %v6618_v25 = vld [vmem:[%s8638_s2 + $0xb0] ss:$28 sps:$4 sm:$0xff]  }
 0x3ce   :  { %v5947_v29 = vpop.f32.mrb[27].mxu0  ;;  %v6619_v26 = vld [vmem:[%s8638_s2 + $0xe8] ss:$28 sps:$4 sm:$0xff]  }
 0x3cf   :  { %v6620_v29 = vld [vmem:[%s8638_s2 + $0x120] ss:$28 sps:$4 sm:$0xff]  }
 0x3db   :  { %v1573_v35 = vpop.f32.mrb[32].mxu1  ;;  %v1640_v38 = vpop.f32.mrb[28].mxu0 }
 0x3dc   :  { %v5958_v41 = vpop.f32.mrb[33].mxu1  ;;  %v1641_v44 = vadd.f32 %v1640_v38, %v1573_v35  ;;  %v5970_v45 = vpop.f32.mrb[29].mxu0  ;;  %v6621_v35 = vld [vmem:[%s8638_s2 + $0x158] ss:$28 sps:$4 sm:$0xff]   ;;  %v6622_v38 = vld [vmem:[%s8638_s2 + $0x190] ss:$28 sps:$4 sm:$0xff]  }
 0x3dd   :  { %v1576_v46 = vpop.f32.mrb[34].mxu1  ;;  %v1643_v47 = vpop.f32.mrb[30].mxu0 }
 0x3de   :  { %v5959_v48 = vpop.f32.mrb[35].mxu1  ;;  %v5971_v49 = vpop.f32.mrb[31].mxu0 }
 0x3eb   :  { %v1716_v50 = vpop.f32.mrb[36].mxu1 }
 0x3ec   :  { %v1722_v51 = vadd.f32 %v1716_v50, %v1641_v44  ;;  %v5982_v52 = vpop.f32.mrb[37].mxu1 }
 0x3ed   :  { %v1719_v53 = vpop.f32.mrb[38].mxu1 }
 0x3ee   :  { %v1723_v54 = vadd.f32 %v7068_v56, %v1722_v51  ;;  %v5983_v55 = vpop.f32.mrb[39].mxu1 }
 0x3f0   :  { %v1724_v57 = vmax.f32 %v1723_v54, 0.0 }
 0x3f2   :  { %v1725_v60 = vpack.c.bf16 %v1724_v57, %v1724_v57 }
 0x3f4   :  { %1919 = vmatmul.mubr.bf16.vlgmr.msra.gmra.mrb[32].mxu0 %v1725_v60  ;;  %6001 = vmatmul.mubr.bf16.vlgmr.msra.gmra.mrb[40].mxu1 %v1725_v60 }
 0x3f5   :  { %6005 = vmatpush3.bf16.msra.mxu0 %v6603_v58  ;;  %6017 = vmatpush3.bf16.msra.mxu1 %v6604_v59 }
 0x3f6   :  { %6006 = vmatprep.subr.bf16.mxu0 %v6832_v0  ;;  %6018 = vmatprep.subr.bf16.mxu1 %v6832_v0 }
 0x3f7   :  { %6012 = vmatprep.mubr.msk.bf16.mxu0 %vm6833_vm0, %v6832_v0  ;;  %6024 = vmatprep.mubr.msk.bf16.mxu1 %vm6833_vm0, %v6832_v0 }
 0x3f9   :  { %6007 = vmatpush3.bf16.msra.mxu0 %v6605_v61  ;;  %6019 = vmatpush3.bf16.msra.mxu1 %v6606_v62 }
 0x3fa   :  { %6008 = vmatprep.subr.bf16.mxu0 %v6832_v0  ;;  %6020 = vmatprep.subr.bf16.mxu1 %v6832_v0 }
 0x3fd   :  { %6009 = vmatpush3.bf16.msra.mxu0 %v6607_v63  ;;  %6021 = vmatpush3.bf16.msra.mxu1 %v6608_v1  ;;  %v6623_v1 = vld [vmem:[%s8637_s1 + $0x1c] sm:$0xff]  }
 0x3fe   :  { %6010 = vmatprep.subr.bf16.mxu0 %v6832_v0  ;;  %6022 = vmatprep.subr.bf16.mxu1 %v6832_v0 }
 0x401   :  { %6011 = vmatpush3.bf16.msra.mxu0 %v2013_v4  ;;  %6023 = vmatpush3.bf16.msra.mxu1 %v2080_v5  ;;  %v6625_v4 = vld [vmem:[%s8637_s1 + $0x24] sm:$0xff]   ;;  %v6627_v5 = vld [vmem:[%s8637_s1 + $0x2c] sm:$0xff]  }
 0x402   :  { %6028 = vmatprep.subr.bf16.mxu0 %v6832_v0  ;;  %2362 = vmatprep.subr.bf16.mxu1 %v7404_v12 }
 0x404   :  { %6013 = vmatmul.mubr.msk.bf16.vlgmr.msra.gmra.mrb[36].mxu0 %vm101_vm2, %v5233_v6  ;;  %6025 = vmatmul.mubr.msk.bf16.vlgmr.msra.gmra.mrb[44].mxu1 %vm101_vm2, %v5232_v9  ;;  %v6628_v6 = vld [vmem:[%s8637_s1 + $0x10] sm:$0xff]  }
 0x405   :  { %6029 = vmatpush3.bf16.msra.mxu0 %v6611_v10  ;;  %6036 = vmatprep.mubr.msk.bf16.mxu0 %vm6833_vm0, %v6832_v0  ;;  %v6629_v9 = vld [vmem:[%s8637_s1 + $0x34] ss:$0 sps:$4 sm:$0x11]   ;;  %v6630_v10 = vld [vmem:[%s8637_s1 + $0x18] ss:$0 sps:$4 sm:$0x11]  }
 0x406   :  { %6030 = vmatprep.subr.bf16.mxu0 %v6832_v0  ;;  %2363 = vmatpush1.bf16.msra.mxu1 %v7399_v11 }
 0x407   :  { %2364 = vmatprep.subr.bf16.mxu1 %v7412_v14  ;;  %2394 = vmatprep.mubr.bf16.mxu1 %v6834_v7 }
 0x409   :  { %6031 = vmatpush3.bf16.msra.mxu0 %v6612_v13  ;;  %v2489_v13 = vand.u32 %v6629_v9, %v6888_v8  ;;  %v6654_v9 = vld [vmem:[%s8637_s1 + $0x50] ss:$0 sps:$4 sm:$0x11]  }
 0x40a   :  { %6032 = vmatprep.subr.bf16.mxu0 %v6832_v0  ;;  %2365 = vmatpush1.bf16.msra.mxu1 %v7422_v16 }
 0x40b   :  { %2366 = vmatprep.subr.bf16.mxu1 %v7431_v17 }
 0x40d   :  { %6033 = vmatpush3.bf16.msra.mxu0 %v6613_v15  ;;  %v2556_v15 = vand.u32 %v6630_v10, %v6888_v8  ;;  %v3108_v10 = vand.u32 %v6654_v9, %v6888_v8  ;;  %v6694_v9 = vld [vmem:[%s8637_s1 + $0x18] ss:$0 sps:$4 sm:$0x11]  }
 0x40e   :  { %6034 = vmatprep.subr.bf16.mxu0 %v6832_v0  ;;  %2367 = vmatpush1.bf16.msra.mxu1 %v7436_v18 }
 0x40f   :  { %2368 = vmatprep.subr.bf16.mxu1 %v7446_v20 }
 0x411   :  { %6035 = vmatpush3.bf16.msra.mxu0 %v2156_v22  ;;  %v5288_v22 = vld [vmem:[%s8639_s0 + $0x28] sm:$0xf] }
 0x412   :  { %6040 = vmatprep.subr.bf16.mxu0 %v6832_v0  ;;  %2369 = vmatpush1.bf16.msra.mxu1 %v7451_v21 }
 0x413   :  { %2370 = vmatprep.subr.bf16.mxu1 %v7461_v27 }
 0x414   :  { %6037 = vmatmul.mubr.msk.bf16.vlgmr.msra.gmra.mrb[40].mxu0 %vm101_vm2, %v5251_v30  ;;  %v6631_v30 = vld [vmem:[%s8637_s1 + $0x38] sm:$0xff]  }
 0x415   :  { %6056 = vmatprep.mubr.msk.bf16.mxu0 %vm6833_vm0, %v6832_v0  ;;  %6041 = vmatpush3.bf16.msra.mxu0 %v6615_v34  ;;  %v6632_v34 = vld [vmem:[%s8637_s1 + $0x40] sm:$0xff]  }
 0x416   :  { %2371 = vmatpush1.bf16.msra.mxu1 %v7467_v28  ;;  %6042 = vmatprep.subr.bf16.mxu0 %v6832_v0 }
 0x417   :  { %2372 = vmatprep.subr.bf16.mxu1 %v7476_v31 }
 0x419   :  { %6043 = vmatpush3.bf16.msra.mxu0 %v6616_v40  ;;  %v6634_v40 = vld [vmem:[%s8637_s1 + $0x50] ss:$0 sps:$4 sm:$0x11]  }
 0x41a   :  { %2373 = vmatpush1.bf16.msra.mxu1 %v7483_v33  ;;  %6044 = vmatprep.subr.bf16.mxu0 %v6832_v0 }
 0x41b   :  { %2374 = vmatprep.subr.bf16.mxu1 %v7494_v36 }
 0x41d   :  { %6045 = vmatpush3.bf16.msra.mxu0 %v6617_v23 }
 0x41e   :  { %2375 = vmatpush1.bf16.msra.mxu1 %v7499_v37  ;;  %6046 = vmatprep.subr.bf16.mxu0 %v6832_v0 }
 0x41f   :  { %2376 = vmatprep.subr.bf16.mxu1 %v7510_v42 }
 0x421   :  { %6047 = vmatpush3.bf16.msra.mxu0 %v6618_v25 }
 0x422   :  { %2377 = vmatpush1.bf16.msra.mxu1 %v7515_v43  ;;  %6048 = vmatprep.subr.bf16.mxu0 %v6832_v0 }
 0x423   :  { %6060 = vmatprep.subr.bf16.mxu1 %v6832_v0 }
 0x425   :  { %6049 = vmatpush3.bf16.msra.mxu0 %v6619_v26 }
 0x426   :  { %6050 = vmatprep.subr.bf16.mxu0 %v6832_v0 }
 0x429   :  { %6051 = vmatpush3.bf16.msra.mxu0 %v6620_v29 }
 0x42a   :  { %6052 = vmatprep.subr.bf16.mxu0 %v6832_v0 }
 0x42d   :  { %6053 = vmatpush3.bf16.msra.mxu0 %v6621_v35 }
 0x42e   :  { %6054 = vmatprep.subr.bf16.mxu0 %v6832_v0 }
 0x431   :  { %6055 = vmatpush3.bf16.msra.mxu0 %v6622_v38 }
 0x432   :  { %6072 = vmatprep.subr.bf16.mxu0 %v6832_v0 }
 0x4c7   :  { %v7648_v41 = vpop.f32.mrb[40].mxu1 }
 0x4c8   :  { %v6002_v44 = vpop.f32.mrb[41].mxu1 }
 0x4c9   :  { %v1964_v45 = vpop.f32.mrb[42].mxu1 }
 0x4ca   :  { %v6003_v46 = vpop.f32.mrb[43].mxu1 }
 0x4d7   :  { %v2049_v47 = vpop.f32.mrb[36].mxu0  ;;  %v2116_v48 = vpop.f32.mrb[44].mxu1 }
 0x4d8   :  { %v6014_v49 = vpop.f32.mrb[37].mxu0  ;;  %v2117_v50 = vadd.f32 %v2116_v48, %v2049_v47  ;;  %v6026_v51 = vpop.f32.mrb[45].mxu1 }
 0x4d9   :  { %v2052_v52 = vpop.f32.mrb[38].mxu0  ;;  %v2119_v53 = vpop.f32.mrb[46].mxu1 }
 0x4da   :  { %v6015_v54 = vpop.f32.mrb[39].mxu0  ;;  %v6027_v55 = vpop.f32.mrb[47].mxu1 }
 0x4db   :  { %v6643_v54 = vld [vmem:[%s8637_s1 + $0x1c] sm:$0xff]  }
 0x4dc   :  { %v6644_v55 = vld [vmem:[%s8637_s1] sm:$0xff]  }
 0x4e7   :  { %v2192_v57 = vpop.f32.mrb[40].mxu0 }
 0x4e8   :  { %v2198_v58 = vadd.f32 %v2192_v57, %v2117_v50  ;;  %v6038_v59 = vpop.f32.mrb[41].mxu0  ;;  %v7776_v50 = vld [vmem:[%s8640_s3] ss:$0 sm:$0xff] }
 0x4e9   :  { %v2195_v60 = vpop.f32.mrb[42].mxu0  ;;  %v6646_v59 = vld [vmem:[%s8637_s1 + $0x8] sm:$0xff]  }
 0x4ea   :  { %v2199_v61 = vadd.f32 %v7068_v56, %v2198_v58  ;;  %v6039_v62 = vpop.f32.mrb[43].mxu0  ;;  %v6626_v56 = vld [vmem:[%s8637_s1 + $0x8] sm:$0xff]  }
 0x4eb   :  { %v6645_v58 = vld [vmem:[%s8637_s1 + $0x24] sm:$0xff]   ;;  %v6647_v60 = vld [vmem:[%s8637_s1 + $0x2c] sm:$0xff]   ;;  %v6649_v62 = vld [vmem:[%s8637_s1 + $0x34] ss:$0 sps:$4 sm:$0x11]  }
 0x4ec   :  { %v2200_v63 = vmax.f32 %v2199_v61, 0.0  ;;  %v6648_v61 = vld [vmem:[%s8637_s1 + $0x10] sm:$0xff]  }
 0x4ee   :  { %v2201_v3 = vpack.c.bf16 %v2200_v63, %v2200_v63  ;;  %v6650_v63 = vld [vmem:[%s8637_s1 + $0x18] ss:$0 sps:$4 sm:$0x11]  }
 0x4f0   :  { %2395 = vmatmul.mubr.bf16.vlgmr.msra.gmra.mrb[48].mxu1 %v2201_v3  ;;  %6057 = vmatmul.mubr.bf16.vlgmr.msra.gmra.mrb[44].mxu0 %v2201_v3  ;;  %v5345_v3 = vld [vmem:[%s8639_s0 + $0x34] sm:$0xf] }
 0x4f1   :  { %6061 = vmatpush3.bf16.msra.mxu1 %v6623_v1  ;;  %6073 = vmatpush3.bf16.msra.mxu0 %v6624_v2  ;;  %v2965_v1 = vand.u32 %v6649_v62, %v6888_v8  ;;  %v3032_v2 = vand.u32 %v6650_v63, %v6888_v8  ;;  %v6687_v63 = vld [vmem:[%s8637_s1 + $0x1c] sm:$0xff]  }
 0x4f2   :  { %6062 = vmatprep.subr.bf16.mxu1 %v6832_v0  ;;  %6074 = vmatprep.subr.bf16.mxu0 %v6832_v0 }
 0x4f3   :  { %6068 = vmatprep.mubr.msk.bf16.mxu1 %vm6833_vm0, %v6832_v0  ;;  %6080 = vmatprep.mubr.msk.bf16.mxu0 %vm6833_vm0, %v6832_v0 }
 0x4f5   :  { %6063 = vmatpush3.bf16.msra.mxu1 %v6625_v4  ;;  %6075 = vmatpush3.bf16.msra.mxu0 %v6626_v56  ;;  %v5344_v4 = vld [vmem:[%s8639_s0 + $0x30] sm:$0xf]  ;;  %v6651_v56 = vld [vmem:[%s8637_s1 + $0x38] sm:$0xff]  }
 0x4f6   :  { %6064 = vmatprep.subr.bf16.mxu1 %v6832_v0  ;;  %6076 = vmatprep.subr.bf16.mxu0 %v6832_v0 }
 0x4f9   :  { %6065 = vmatpush3.bf16.msra.mxu1 %v6627_v5  ;;  %6077 = vmatpush3.bf16.msra.mxu0 %v6628_v6  ;;  %v6652_v5 = vld [vmem:[%s8637_s1 + $0x40] sm:$0xff]   ;;  %v6653_v6 = vld [vmem:[%s8637_s1 + $0x48] sm:$0xff]  }
 0x4fa   :  { %6066 = vmatprep.subr.bf16.mxu1 %v6832_v0  ;;  %6078 = vmatprep.subr.bf16.mxu0 %v6832_v0 }
 0x4fd   :  { %6067 = vmatpush3.bf16.msra.mxu1 %v2489_v13  ;;  %6079 = vmatpush3.bf16.msra.mxu0 %v2556_v15  ;;  %v5363_v13 = vld [vmem:[%s8639_s0 + $0x38] sm:$0xf]  ;;  %v7853_v15 = vld [vmem:[%s8638_s2] ss:$28 sps:$4 sm:$0xff]  }
 0x4fe   :  { %6084 = vmatprep.subr.bf16.mxu1 %v6832_v0  ;;  %2838 = vmatprep.subr.bf16.mxu0 %v7404_v12  ;;  %v6633_v12 = vld [vmem:[%s8637_s1 + $0x48] sm:$0xff]  }
 0x500   :  { %6069 = vmatmul.mubr.msk.bf16.vlgmr.msra.gmra.mrb[52].mxu1 %vm101_vm2, %v5289_v19  ;;  %6081 = vmatmul.mubr.msk.bf16.vlgmr.msra.gmra.mrb[48].mxu0 %vm101_vm2, %v5288_v22  ;;  %v7858_v19 = vld [vmem:[%s8638_s2 + $0x4] ss:$28 sps:$4 sm:$0xff]  }
 0x501   :  { %6085 = vmatpush3.bf16.msra.mxu1 %v6631_v30  ;;  %6092 = vmatprep.mubr.msk.bf16.mxu1 %vm6833_vm0, %v6832_v0  ;;  %v6658_v22 = vld [vmem:[%s8638_s2 + $0x8] ss:$28 sps:$4 sm:$0xff]   ;;  %v7866_v30 = vld [vmem:[%s8638_s2 + $0x3c] ss:$28 sps:$4 sm:$0xff]  }
 0x502   :  { %6086 = vmatprep.subr.bf16.mxu1 %v6832_v0  ;;  %2839 = vmatpush1.bf16.msra.mxu0 %v7399_v11  ;;  %v2632_v11 = vand.u32 %v6634_v40, %v6888_v8  ;;  %v7885_v40 = vld [vmem:[%s8638_s2 + $0x74] ss:$28 sps:$4 sm:$0xff]  }
 0x503   :  { %2840 = vmatprep.subr.bf16.mxu0 %v7412_v14  ;;  %2870 = vmatprep.mubr.bf16.mxu0 %v6834_v7  ;;  %v5307_v14 = vld [vmem:[%s8639_s0 + $0x30] sm:$0xf] }
 0x505   :  { %6087 = vmatpush3.bf16.msra.mxu1 %v6632_v34  ;;  %v6662_v34 = vld [vmem:[%s8638_s2 + $0x40] ss:$28 sps:$4 sm:$0xff]  }
 0x506   :  { %6088 = vmatprep.subr.bf16.mxu1 %v6832_v0  ;;  %2841 = vmatpush1.bf16.msra.mxu0 %v7422_v16  ;;  %v6635_v16 = vld [vmem:[%s8638_s2 + $0x8] ss:$28 sps:$4 sm:$0xff]  }
 0x507   :  { %2842 = vmatprep.subr.bf16.mxu0 %v7431_v17  ;;  %v6636_v17 = vld [vmem:[%s8638_s2 + $0x40] ss:$28 sps:$4 sm:$0xff]  }
 0x509   :  { %6089 = vmatpush3.bf16.msra.mxu1 %v6633_v12  ;;  %v7876_v12 = vld [vmem:[%s8638_s2 + $0x38] ss:$28 sps:$4 sm:$0xff]  }
 0x50a   :  { %6090 = vmatprep.subr.bf16.mxu1 %v6832_v0  ;;  %2843 = vmatpush1.bf16.msra.mxu0 %v7436_v18  ;;  %v6637_v18 = vld [vmem:[%s8638_s2 + $0x78] ss:$28 sps:$4 sm:$0xff]  }
 0x50b   :  { %2844 = vmatprep.subr.bf16.mxu0 %v7446_v20  ;;  %v6638_v20 = vld [vmem:[%s8638_s2 + $0xb0] ss:$28 sps:$4 sm:$0xff]  }
 0x50d   :  { %6091 = vmatpush3.bf16.msra.mxu1 %v2632_v11  ;;  %v7890_v11 = vld [vmem:[%s8638_s2 + $0x70] ss:$28 sps:$4 sm:$0xff]  }
 0x50e   :  { %6096 = vmatprep.subr.bf16.mxu1 %v6832_v0  ;;  %2845 = vmatpush1.bf16.msra.mxu0 %v7451_v21  ;;  %v6639_v21 = vld [vmem:[%s8638_s2 + $0xe8] ss:$28 sps:$4 sm:$0xff]  }
 0x50f   :  { %2846 = vmatprep.subr.bf16.mxu0 %v7461_v27  ;;  %v6640_v27 = vld [vmem:[%s8638_s2 + $0x120] ss:$28 sps:$4 sm:$0xff]  }
 0x510   :  { %6093 = vmatmul.mubr.msk.bf16.vlgmr.msra.gmra.mrb[56].mxu1 %vm101_vm2, %v5307_v14  ;;  %v6666_v14 = vld [vmem:[%s8638_s2 + $0x78] ss:$28 sps:$4 sm:$0xff]  }
 0x511   :  { %6112 = vmatprep.mubr.msk.bf16.mxu1 %vm6833_vm0, %v6832_v0  ;;  %6097 = vmatpush3.bf16.msra.mxu1 %v6635_v16  ;;  %v7900_v16 = vld [vmem:[%s8638_s2 + $0xac] ss:$28 sps:$4 sm:$0xff]  }
 0x512   :  { %2847 = vmatpush1.bf16.msra.mxu0 %v7467_v28  ;;  %6098 = vmatprep.subr.bf16.mxu1 %v6832_v0  ;;  %v6641_v28 = vld [vmem:[%s8638_s2 + $0x158] ss:$28 sps:$4 sm:$0xff]  }
 0x513   :  { %2848 = vmatprep.subr.bf16.mxu0 %v7476_v31  ;;  %v6642_v31 = vld [vmem:[%s8638_s2 + $0x190] ss:$28 sps:$4 sm:$0xff]  }
 0x515   :  { %6099 = vmatpush3.bf16.msra.mxu1 %v6636_v17  ;;  %v7905_v17 = vld [vmem:[%s8638_s2 + $0xa8] ss:$28 sps:$4 sm:$0xff]  }
 0x516   :  { %2849 = vmatpush1.bf16.msra.mxu0 %v7483_v33  ;;  %6100 = vmatprep.subr.bf16.mxu1 %v6832_v0 }
 0x517   :  { %2850 = vmatprep.subr.bf16.mxu0 %v7494_v36 }
 0x519   :  { %6101 = vmatpush3.bf16.msra.mxu1 %v6637_v18  ;;  %v6670_v18 = vld [vmem:[%s8638_s2 + $0xb0] ss:$28 sps:$4 sm:$0xff]  }
 0x51a   :  { %2851 = vmatpush1.bf16.msra.mxu0 %v7499_v37  ;;  %6102 = vmatprep.subr.bf16.mxu1 %v6832_v0 }
 0x51b   :  { %2852 = vmatprep.subr.bf16.mxu0 %v7510_v42 }
 0x51d   :  { %6103 = vmatpush3.bf16.msra.mxu1 %v6638_v20  ;;  %v7915_v20 = vld [vmem:[%s8638_s2 + $0xe4] ss:$28 sps:$4 sm:$0xff]  }
 0x51e   :  { %2853 = vmatpush1.bf16.msra.mxu0 %v7515_v43  ;;  %6104 = vmatprep.subr.bf16.mxu1 %v6832_v0 }
 0x51f   :  { %6116 = vmatprep.subr.bf16.mxu0 %v6832_v0 }
 0x521   :  { %6105 = vmatpush3.bf16.msra.mxu1 %v6639_v21  ;;  %v7921_v21 = vld [vmem:[%s8638_s2 + $0xe0] ss:$28 sps:$4 sm:$0xff]  }
 0x522   :  { %6106 = vmatprep.subr.bf16.mxu1 %v6832_v0 }
 0x525   :  { %6107 = vmatpush3.bf16.msra.mxu1 %v6640_v27  ;;  %v6674_v27 = vld [vmem:[%s8638_s2 + $0xe8] ss:$28 sps:$4 sm:$0xff]  }
 0x526   :  { %6108 = vmatprep.subr.bf16.mxu1 %v6832_v0 }
 0x529   :  { %6109 = vmatpush3.bf16.msra.mxu1 %v6641_v28  ;;  %v7930_v28 = vld [vmem:[%s8638_s2 + $0x11c] ss:$28 sps:$4 sm:$0xff]  }
 0x52a   :  { %6110 = vmatprep.subr.bf16.mxu1 %v6832_v0 }
 0x52d   :  { %6111 = vmatpush3.bf16.msra.mxu1 %v6642_v31  ;;  %v7937_v31 = vld [vmem:[%s8638_s2 + $0x118] ss:$28 sps:$4 sm:$0xff]  }
 0x52e   :  { %6128 = vmatprep.subr.bf16.mxu1 %v6832_v0 }
 0x5c3   :  { %v7771_v33 = vpop.f32.mrb[44].mxu0 }
 0x5c4   :  { %v6058_v36 = vpop.f32.mrb[45].mxu0 }
 0x5c5   :  { %v2440_v37 = vpop.f32.mrb[46].mxu0  ;;  %v6678_v36 = vld [vmem:[%s8638_s2 + $0x120] ss:$28 sps:$4 sm:$0xff]  }
 0x5c6   :  { %v6059_v42 = vpop.f32.mrb[47].mxu0  ;;  %v7948_v37 = vld [vmem:[%s8638_s2 + $0x154] ss:$28 sps:$4 sm:$0xff]  }
 0x5c7   :  { %v7953_v42 = vld [vmem:[%s8638_s2 + $0x150] ss:$28 sps:$4 sm:$0xff]  }
 0x5d3   :  { %v2525_v43 = vpop.f32.mrb[52].mxu1  ;;  %v2592_v23 = vpop.f32.mrb[48].mxu0 }
 0x5d4   :  { %v6070_v25 = vpop.f32.mrb[53].mxu1  ;;  %v2593_v26 = vadd.f32 %v2592_v23, %v2525_v43  ;;  %v6082_v29 = vpop.f32.mrb[49].mxu0  ;;  %v6682_v43 = vld [vmem:[%s8638_s2 + $0x158] ss:$28 sps:$4 sm:$0xff]   ;;  %v7964_v23 = vld [vmem:[%s8638_s2 + $0x18c] ss:$28 sps:$4 sm:$0xff]  }
 0x5d5   :  { %v2528_v35 = vpop.f32.mrb[54].mxu1  ;;  %v2595_v38 = vpop.f32.mrb[50].mxu0  ;;  %v7969_v25 = vld [vmem:[%s8638_s2 + $0x188] ss:$28 sps:$4 sm:$0xff]  }
 0x5d6   :  { %v6071_v44 = vpop.f32.mrb[55].mxu1  ;;  %v6083_v45 = vpop.f32.mrb[51].mxu0 }
 0x5e3   :  { %v2668_v46 = vpop.f32.mrb[56].mxu1 }
 0x5e4   :  { %v2674_v47 = vadd.f32 %v2668_v46, %v2593_v26  ;;  %v6094_v48 = vpop.f32.mrb[57].mxu1  ;;  %v6686_v26 = vld [vmem:[%s8638_s2 + $0x190] ss:$28 sps:$4 sm:$0xff]  }
 0x5e5   :  { %v2671_v49 = vpop.f32.mrb[58].mxu1 }
 0x5e6   :  { %v2675_v51 = vadd.f32 %v7776_v50, %v2674_v47  ;;  %v6095_v52 = vpop.f32.mrb[59].mxu1 }
 0x5e8   :  { %v2676_v53 = vmax.f32 %v2675_v51, 0.0 }
 0x5ea   :  { %v2677_v57 = vpack.c.bf16 %v2676_v53, %v2676_v53 }
 0x5ec   :  { %2871 = vmatmul.mubr.bf16.vlgmr.msra.gmra.mrb[52].mxu0 %v2677_v57  ;;  %6113 = vmatmul.mubr.bf16.vlgmr.msra.gmra.mrb[60].mxu1 %v2677_v57 }
 0x5ed   :  { %6117 = vmatpush3.bf16.msra.mxu0 %v6643_v54  ;;  %6129 = vmatpush3.bf16.msra.mxu1 %v6644_v55 }
 0x5ee   :  { %6118 = vmatprep.subr.bf16.mxu0 %v6832_v0  ;;  %6130 = vmatprep.subr.bf16.mxu1 %v6832_v0 }
 0x5ef   :  { %6124 = vmatprep.mubr.msk.bf16.mxu0 %vm6833_vm0, %v6832_v0  ;;  %6136 = vmatprep.mubr.msk.bf16.mxu1 %vm6833_vm0, %v6832_v0 }
 0x5f1   :  { %6119 = vmatpush3.bf16.msra.mxu0 %v6645_v58  ;;  %6131 = vmatpush3.bf16.msra.mxu1 %v6646_v59 }
 0x5f2   :  { %6120 = vmatprep.subr.bf16.mxu0 %v6832_v0  ;;  %6132 = vmatprep.subr.bf16.mxu1 %v6832_v0 }
 0x5f5   :  { %6121 = vmatpush3.bf16.msra.mxu0 %v6647_v60  ;;  %6133 = vmatpush3.bf16.msra.mxu1 %v6648_v61 }
 0x5f6   :  { %6122 = vmatprep.subr.bf16.mxu0 %v6832_v0  ;;  %6134 = vmatprep.subr.bf16.mxu1 %v6832_v0 }
 0x5f9   :  { %6123 = vmatpush3.bf16.msra.mxu0 %v2965_v1  ;;  %6135 = vmatpush3.bf16.msra.mxu1 %v3032_v2  ;;  %v6688_v1 = vld [vmem:[%s8637_s1] sm:$0xff]  }
 0x5fa   :  { %6140 = vmatprep.subr.bf16.mxu0 %v6832_v0  ;;  %3314 = vmatprep.subr.bf16.mxu1 %v7858_v19 }
 0x5fc   :  { %6125 = vmatmul.mubr.msk.bf16.vlgmr.msra.gmra.mrb[56].mxu0 %vm101_vm2, %v5345_v3  ;;  %6137 = vmatmul.mubr.msk.bf16.vlgmr.msra.gmra.mrb[64].mxu1 %vm101_vm2, %v5344_v4  ;;  %v6689_v3 = vld [vmem:[%s8637_s1 + $0x24] sm:$0xff]  }
 0x5fd   :  { %6141 = vmatpush3.bf16.msra.mxu0 %v6651_v56  ;;  %6148 = vmatprep.mubr.msk.bf16.mxu0 %vm6833_vm0, %v6832_v0  ;;  %v6690_v4 = vld [vmem:[%s8637_s1 + $0x8] sm:$0xff]  }
 0x5fe   :  { %6142 = vmatprep.subr.bf16.mxu0 %v6832_v0  ;;  %3346 = vmatprep.mubr.bf16.mxu1 %v6834_v7  ;;  %v6691_v56 = vld [vmem:[%s8637_s1 + $0x2c] sm:$0xff]  }
 0x5ff   :  { %3315 = vmatpush1.bf16.msra.mxu1 %v7853_v15 }
 0x600   :  { %3316 = vmatprep.subr.bf16.mxu1 %v7866_v30 }
 0x601   :  { %6143 = vmatpush3.bf16.msra.mxu0 %v6652_v5  ;;  %v6692_v5 = vld [vmem:[%s8637_s1 + $0x10] sm:$0xff]  }
 0x602   :  { %6144 = vmatprep.subr.bf16.mxu0 %v6832_v0 }
 0x603   :  { %3317 = vmatpush1.bf16.msra.mxu1 %v7876_v12 }
 0x604   :  { %3318 = vmatprep.subr.bf16.mxu1 %v7885_v40 }
 0x605   :  { %6145 = vmatpush3.bf16.msra.mxu0 %v6653_v6  ;;  %v6693_v6 = vld [vmem:[%s8637_s1 + $0x34] ss:$0 sps:$4 sm:$0x11]  }
 0x606   :  { %6146 = vmatprep.subr.bf16.mxu0 %v6832_v0 }
 0x607   :  { %3319 = vmatpush1.bf16.msra.mxu1 %v7890_v11 }
 0x608   :  { %3320 = vmatprep.subr.bf16.mxu1 %v7900_v16 }
 0x609   :  { %6147 = vmatpush3.bf16.msra.mxu0 %v3108_v10  ;;  %v3441_v10 = vand.u32 %v6693_v6, %v6888_v8  ;;  %v8201_v6 = vld [vmem:[%s8638_s2 + $0x128] ss:$28 sps:$4 sm:$0xff]  }
 0x60a   :  { %6152 = vmatprep.subr.bf16.mxu0 %v6832_v0 }
 0x60b   :  { %3321 = vmatpush1.bf16.msra.mxu1 %v7905_v17 }
 0x60c   :  { %6149 = vmatmul.mubr.msk.bf16.vlgmr.msra.gmra.mrb[60].mxu0 %vm101_vm2, %v5363_v13  ;;  %3322 = vmatprep.subr.bf16.mxu1 %v7915_v20  ;;  %v3508_v13 = vand.u32 %v6694_v9, %v6888_v8  ;;  %v8208_v9 = vld [vmem:[%s8638_s2 + $0x124] ss:$28 sps:$4 sm:$0xff]  }
 0x60d   :  { %6168 = vmatprep.mubr.msk.bf16.mxu0 %vm6833_vm0, %v6832_v0  ;;  %6153 = vmatpush3.bf16.msra.mxu0 %v6658_v22  ;;  %v5401_v22 = vld [vmem:[%s8639_s0 + $0x3c] sm:$0xf] }
 0x60e   :  { %6154 = vmatprep.subr.bf16.mxu0 %v6832_v0 }
 0x60f   :  { %3323 = vmatpush1.bf16.msra.mxu1 %v7921_v21 }
 0x610   :  { %3324 = vmatprep.subr.bf16.mxu1 %v7930_v28 }
 0x611   :  { %6155 = vmatpush3.bf16.msra.mxu0 %v6662_v34  ;;  %v5400_v34 = vld [vmem:[%s8639_s0 + $0x38] sm:$0xf] }
 0x612   :  { %6156 = vmatprep.subr.bf16.mxu0 %v6832_v0 }
 0x613   :  { %3325 = vmatpush1.bf16.msra.mxu1 %v7937_v31 }
 0x614   :  { %3326 = vmatprep.subr.bf16.mxu1 %v7948_v37 }
 0x615   :  { %6157 = vmatpush3.bf16.msra.mxu0 %v6666_v14  ;;  %v6695_v14 = vld [vmem:[%s8637_s1 + $0x38] sm:$0xff]  }
 0x616   :  { %6158 = vmatprep.subr.bf16.mxu0 %v6832_v0 }
 0x617   :  { %3327 = vmatpush1.bf16.msra.mxu1 %v7953_v42 }
 0x618   :  { %3328 = vmatprep.subr.bf16.mxu1 %v7964_v23 }
 0x619   :  { %6159 = vmatpush3.bf16.msra.mxu0 %v6670_v18  ;;  %v6696_v18 = vld [vmem:[%s8637_s1 + $0x40] sm:$0xff]  }
 0x61a   :  { %6160 = vmatprep.subr.bf16.mxu0 %v6832_v0 }
 0x61b   :  { %3329 = vmatpush1.bf16.msra.mxu1 %v7969_v25 }
 0x61c   :  { %6172 = vmatprep.subr.bf16.mxu1 %v6832_v0 }
 0x61d   :  { %6161 = vmatpush3.bf16.msra.mxu0 %v6674_v27  ;;  %v6698_v27 = vld [vmem:[%s8637_s1 + $0x50] ss:$0 sps:$4 sm:$0x11]  }
 0x61e   :  { %6162 = vmatprep.subr.bf16.mxu0 %v6832_v0 }
 0x621   :  { %6163 = vmatpush3.bf16.msra.mxu0 %v6678_v36 }
 0x622   :  { %6164 = vmatprep.subr.bf16.mxu0 %v6832_v0 }
 0x625   :  { %6165 = vmatpush3.bf16.msra.mxu0 %v6682_v43 }
 0x626   :  { %6166 = vmatprep.subr.bf16.mxu0 %v6832_v0 }
 0x629   :  { %6167 = vmatpush3.bf16.msra.mxu0 %v6686_v26 }
 0x62a   :  { %6184 = vmatprep.subr.bf16.mxu0 %v6832_v0 }
 0x6bf   :  { %v7979_v29 = vpop.f32.mrb[60].mxu1 }
 0x6c0   :  { %v6114_v35 = vpop.f32.mrb[61].mxu1 }
 0x6c1   :  { %v2916_v38 = vpop.f32.mrb[62].mxu1 }
 0x6c2   :  { %v6115_v44 = vpop.f32.mrb[63].mxu1 }
 0x6cf   :  { %v3001_v45 = vpop.f32.mrb[56].mxu0  ;;  %v3068_v46 = vpop.f32.mrb[64].mxu1 }
 0x6d0   :  { %v6126_v47 = vpop.f32.mrb[57].mxu0  ;;  %v3069_v48 = vadd.f32 %v3068_v46, %v3001_v45  ;;  %v6138_v49 = vpop.f32.mrb[65].mxu1 }
 0x6d1   :  { %v3004_v51 = vpop.f32.mrb[58].mxu0  ;;  %v3071_v52 = vpop.f32.mrb[66].mxu1 }
 0x6d2   :  { %v6127_v53 = vpop.f32.mrb[59].mxu0  ;;  %v6139_v54 = vpop.f32.mrb[67].mxu1 }
 0x6df   :  { %v3144_v55 = vpop.f32.mrb[60].mxu0 }
 0x6e0   :  { %v3150_v57 = vadd.f32 %v3144_v55, %v3069_v48  ;;  %v6150_v58 = vpop.f32.mrb[61].mxu0  ;;  %v8113_v55 = vld [vmem:[%s8638_s2 + $0xc] ss:$28 sps:$4 sm:$0xff]  }
 0x6e1   :  { %v3147_v59 = vpop.f32.mrb[62].mxu0 }
 0x6e2   :  { %v3151_v60 = vadd.f32 %v7776_v50, %v3150_v57  ;;  %v6151_v61 = vpop.f32.mrb[63].mxu0  ;;  %v8118_v57 = vld [vmem:[%s8638_s2 + $0x14] ss:$28 sps:$4 sm:$0xff]   ;;  %v8123_v59 = vld [vmem:[%s8638_s2 + $0x48] ss:$28 sps:$4 sm:$0xff]  }
 0x6e3   :  { %v8141_v61 = vld [vmem:[%s8638_s2 + $0x80] ss:$28 sps:$4 sm:$0xff]  }
 0x6e4   :  { %v3152_v62 = vmax.f32 %v3151_v60, 0.0  ;;  %v8135_v60 = vld [vmem:[%s8638_s2 + $0x4c] ss:$28 sps:$4 sm:$0xff]  }
 0x6e6   :  { %v3153_v2 = vpack.c.bf16 %v3152_v62, %v3152_v62  ;;  %v8151_v62 = vld [vmem:[%s8638_s2 + $0x7c] ss:$28 sps:$4 sm:$0xff]  }
 0x6e8   :  { %3347 = vmatmul.mubr.bf16.vlgmr.msra.gmra.mrb[68].mxu1 %v3153_v2  ;;  %6169 = vmatmul.mubr.bf16.vlgmr.msra.gmra.mrb[64].mxu0 %v3153_v2  ;;  %v8170_v2 = vld [vmem:[%s8638_s2 + $0xb4] ss:$28 sps:$4 sm:$0xff]  }
 0x6e9   :  { %6173 = vmatpush3.bf16.msra.mxu1 %v6687_v63  ;;  %6185 = vmatpush3.bf16.msra.mxu0 %v6688_v1  ;;  %v8157_v63 = vld [vmem:[%s8638_s2 + $0x84] ss:$28 sps:$4 sm:$0xff]   ;;  %v8163_v1 = vld [vmem:[%s8638_s2 + $0xb8] ss:$28 sps:$4 sm:$0xff]  }
 0x6ea   :  { %6174 = vmatprep.subr.bf16.mxu1 %v6832_v0  ;;  %6186 = vmatprep.subr.bf16.mxu0 %v6832_v0 }
 0x6eb   :  { %6180 = vmatprep.mubr.msk.bf16.mxu1 %vm6833_vm0, %v6832_v0  ;;  %6192 = vmatprep.mubr.msk.bf16.mxu0 %vm6833_vm0, %v6832_v0 }
 0x6ed   :  { %6175 = vmatpush3.bf16.msra.mxu1 %v6689_v3  ;;  %6187 = vmatpush3.bf16.msra.mxu0 %v6690_v4  ;;  %v8176_v3 = vld [vmem:[%s8638_s2 + $0xbc] ss:$28 sps:$4 sm:$0xff]   ;;  %v8182_v4 = vld [vmem:[%s8638_s2 + $0xf0] ss:$28 sps:$4 sm:$0xff]  }
 0x6ee   :  { %6176 = vmatprep.subr.bf16.mxu1 %v6832_v0  ;;  %6188 = vmatprep.subr.bf16.mxu0 %v6832_v0 }
 0x6f1   :  { %6177 = vmatpush3.bf16.msra.mxu1 %v6691_v56  ;;  %6189 = vmatpush3.bf16.msra.mxu0 %v6692_v5  ;;  %v8189_v56 = vld [vmem:[%s8638_s2 + $0xec] ss:$28 sps:$4 sm:$0xff]   ;;  %v8195_v5 = vld [vmem:[%s8638_s2 + $0xf4] ss:$28 sps:$4 sm:$0xff]  }
 0x6f2   :  { %6178 = vmatprep.subr.bf16.mxu1 %v6832_v0  ;;  %6190 = vmatprep.subr.bf16.mxu0 %v6832_v0 }
 0x6f5   :  { %6179 = vmatpush3.bf16.msra.mxu1 %v3441_v10  ;;  %6191 = vmatpush3.bf16.msra.mxu0 %v3508_v13  ;;  %v8214_v10 = vld [vmem:[%s8638_s2 + $0x12c] ss:$28 sps:$4 sm:$0xff]   ;;  %v8220_v13 = vld [vmem:[%s8638_s2 + $0x160] ss:$28 sps:$4 sm:$0xff]  }
 0x6f6   :  { %6196 = vmatprep.subr.bf16.mxu1 %v6832_v0  ;;  %3790 = vmatprep.subr.bf16.mxu0 %v7858_v19  ;;  %v6697_v19 = vld [vmem:[%s8637_s1 + $0x48] sm:$0xff]  }
 0x6f8   :  { %6181 = vmatmul.mubr.msk.bf16.vlgmr.msra.gmra.mrb[72].mxu1 %vm101_vm2, %v5401_v22  ;;  %6193 = vmatmul.mubr.msk.bf16.vlgmr.msra.gmra.mrb[68].mxu0 %vm101_vm2, %v5400_v34  ;;  %v8227_v22 = vld [vmem:[%s8638_s2 + $0x15c] ss:$28 sps:$4 sm:$0xff]   ;;  %v8233_v34 = vld [vmem:[%s8638_s2 + $0x164] ss:$28 sps:$4 sm:$0xff]  }
 0x6f9   :  { %6197 = vmatpush3.bf16.msra.mxu1 %v6695_v14  ;;  %6204 = vmatprep.mubr.msk.bf16.mxu1 %vm6833_vm0, %v6832_v0  ;;  %v8239_v14 = vld [vmem:[%s8638_s2 + $0x198] ss:$28 sps:$4 sm:$0xff]  }
 0x6fa   :  { %6198 = vmatprep.subr.bf16.mxu1 %v6832_v0  ;;  %3791 = vmatpush1.bf16.msra.mxu0 %v7853_v15  ;;  %v3584_v15 = vand.u32 %v6698_v27, %v6888_v8  ;;  %v6699_v8 = vld [vmem:[%s8638_s2 + $0x8] ss:$28 sps:$4 sm:$0xff]  }
 0x6fb   :  { %3792 = vmatprep.subr.bf16.mxu0 %v7866_v30  ;;  %3822 = vmatprep.mubr.bf16.mxu0 %v6834_v7  ;;  %v5419_v30 = vld [vmem:[%s8639_s0 + $0x40] sm:$0xf] }
 0x6fd   :  { %6199 = vmatpush3.bf16.msra.mxu1 %v6696_v18  ;;  %v8246_v18 = vld [vmem:[%s8638_s2 + $0x194] ss:$28 sps:$4 sm:$0xff]  }
 0x6fe   :  { %6200 = vmatprep.subr.bf16.mxu1 %v6832_v0  ;;  %3793 = vmatpush1.bf16.msra.mxu0 %v7876_v12  ;;  %v6700_v12 = vld [vmem:[%s8638_s2 + $0x40] ss:$28 sps:$4 sm:$0xff]  }
 0x6ff   :  { %3794 = vmatprep.subr.bf16.mxu0 %v7885_v40  ;;  %v6701_v40 = vld [vmem:[%s8638_s2 + $0x78] ss:$28 sps:$4 sm:$0xff]  }
 0x701   :  { %6201 = vmatpush3.bf16.msra.mxu1 %v6697_v19  ;;  %v8252_v19 = vld [vmem:[%s8638_s2 + $0x19c] ss:$28 sps:$4 sm:$0xff]  }
 0x702   :  { %6202 = vmatprep.subr.bf16.mxu1 %v6832_v0  ;;  %3795 = vmatpush1.bf16.msra.mxu0 %v7890_v11  ;;  %v6702_v11 = vld [vmem:[%s8638_s2 + $0xb0] ss:$28 sps:$4 sm:$0xff]  }
 0x703   :  { %3796 = vmatprep.subr.bf16.mxu0 %v7900_v16  ;;  %v6703_v16 = vld [vmem:[%s8638_s2 + $0xe8] ss:$28 sps:$4 sm:$0xff]  }
 0x705   :  { %6203 = vmatpush3.bf16.msra.mxu1 %v3584_v15 }
 0x706   :  { %6208 = vmatprep.subr.bf16.mxu1 %v6832_v0  ;;  %3797 = vmatpush1.bf16.msra.mxu0 %v7905_v17  ;;  %v6704_v17 = vld [vmem:[%s8638_s2 + $0x120] ss:$28 sps:$4 sm:$0xff]  }
 0x707   :  { %3798 = vmatprep.subr.bf16.mxu0 %v7915_v20  ;;  %v6705_v20 = vld [vmem:[%s8638_s2 + $0x158] ss:$28 sps:$4 sm:$0xff]  }
 0x708   :  { %6205 = vmatmul.mubr.msk.bf16.vlgmr.msra.gmra.mrb[76].mxu1 %vm101_vm2, %v5419_v30 }
 0x709   :  { %6224 = vmatprep.mubr.msk.bf16.mxu1 %vm6833_vm0, %v6832_v0  ;;  %6209 = vmatpush3.bf16.msra.mxu1 %v6699_v8 }
 0x70a   :  { %3799 = vmatpush1.bf16.msra.mxu0 %v7921_v21  ;;  %6210 = vmatprep.subr.bf16.mxu1 %v6832_v0  ;;  %v6706_v21 = vld [vmem:[%s8638_s2 + $0x190] ss:$28 sps:$4 sm:$0xff]  }
 0x70b   :  { %3800 = vmatprep.subr.bf16.mxu0 %v7930_v28  ;;  %v8104_v28 = vld [vmem:[%s8638_s2 + $0x10] ss:$28 sps:$4 sm:$0xff]  }
 0x70d   :  { %6211 = vmatpush3.bf16.msra.mxu1 %v6700_v12  ;;  %v27_v12 = vlaneseq }
 0x70e   :  { %3801 = vmatpush1.bf16.msra.mxu0 %v7937_v31  ;;  %6212 = vmatprep.subr.bf16.mxu1 %v6832_v0 }
 0x70f   :  { %3802 = vmatprep.subr.bf16.mxu0 %v7948_v37 }
 0x711   :  { %6213 = vmatpush3.bf16.msra.mxu1 %v6701_v40  ;;  %v28_v40 = vshrl.u32 %v27_v12, 7 }
 0x712   :  { %3803 = vmatpush1.bf16.msra.mxu0 %v7953_v42  ;;  %6214 = vmatprep.subr.bf16.mxu1 %v6832_v0 }
 0x713   :  { %3804 = vmatprep.subr.bf16.mxu0 %v7964_v23 }
 0x715   :  { %6215 = vmatpush3.bf16.msra.mxu1 %v6702_v11  ;;  %v29_v11 = vsub.s32 0, %v28_v40 }
 0x716   :  { %3805 = vmatpush1.bf16.msra.mxu0 %v7969_v25  ;;  %6216 = vmatprep.subr.bf16.mxu1 %v6832_v0 }
 0x717   :  { %6228 = vmatprep.subr.bf16.mxu0 %v6832_v0 }
 0x719   :  { %6217 = vmatpush3.bf16.msra.mxu1 %v6703_v16  ;;  %v42_v16 = vld [vmem:[%s8640_s3 + $0x4] sm:$0x7] }
 0x71a   :  { %6218 = vmatprep.subr.bf16.mxu1 %v6832_v0 }
 0x71d   :  { %6219 = vmatpush3.bf16.msra.mxu1 %v6704_v17  ;;  %v25_v17 = vld [vmem:[%s8640_s3 + $0x1] sm:$0x7] }
 0x71e   :  { %6220 = vmatprep.subr.bf16.mxu1 %v6832_v0 }
 0x721   :  { %6221 = vmatpush3.bf16.msra.mxu1 %v6705_v20  ;;  %v30_v20 = vrot.slane %v25_v17, %v29_v11 }
 0x722   :  { %6222 = vmatprep.subr.bf16.mxu1 %v6832_v0 }
 0x725   :  { %6223 = vmatpush3.bf16.msra.mxu1 %v6706_v21  ;;  %v47_v21 = vrot.slane %v42_v16, %v29_v11 }
 0x726   :  { %4038 = vmatprep.subr.bf16.mxu1 %v8104_v28 }
 0x7bb   :  { %v8107_v31 = vpop.f32.mrb[64].mxu0 }
 0x7bc   :  { %v6170_v36 = vpop.f32.mrb[65].mxu0 }
 0x7bd   :  { %v3392_v37 = vpop.f32.mrb[66].mxu0  ;;  %v8305_v36 = vadd.f32 %v47_v21, %v30_v20 }
 0x7be   :  { %v6171_v42 = vpop.f32.mrb[67].mxu0  ;;  %v33_v37 = vsub.s32 1, %v28_v40 }
 0x7cb   :  { %v3477_v43 = vpop.f32.mrb[72].mxu1  ;;  %v3544_v23 = vpop.f32.mrb[68].mxu0 }
 0x7cc   :  { %v6182_v25 = vpop.f32.mrb[73].mxu1  ;;  %v3545_v26 = vadd.f32 %v3544_v23, %v3477_v43  ;;  %v6194_v35 = vpop.f32.mrb[69].mxu0 }
 0x7cd   :  { %v3480_v38 = vpop.f32.mrb[74].mxu1  ;;  %v3547_v44 = vpop.f32.mrb[70].mxu0  ;;  %v34_v25 = vrot.slane %v25_v17, %v33_v37 }
 0x7ce   :  { %v6183_v45 = vpop.f32.mrb[75].mxu1  ;;  %v6195_v46 = vpop.f32.mrb[71].mxu0 }
 0x7db   :  { %v3620_v47 = vpop.f32.mrb[76].mxu1 }
 0x7dc   :  { %v3626_v48 = vadd.f32 %v3620_v47, %v3545_v26  ;;  %v6206_v49 = vpop.f32.mrb[77].mxu1  ;;  %v51_v26 = vrot.slane %v42_v16, %v33_v37 }
 0x7dd   :  { %v3623_v51 = vpop.f32.mrb[78].mxu1 }
 0x7de   :  { %v3627_v52 = vadd.f32 %v7776_v50, %v3626_v48  ;;  %v6207_v53 = vpop.f32.mrb[79].mxu1  ;;  %v8129_v50 = vld [vmem:[%s8638_s2 + $0x44] ss:$28 sps:$4 sm:$0xff]   ;;  %v8308_v49 = vadd.f32 %v51_v26, %v34_v25 }
 0x7e0   :  { %v3628_v54 = vmax.f32 %v3627_v52, 0.0 }
 0x7e2   :  { %v3629_v58 = vpack.c.bf16 %v3628_v54, %v3628_v54 }
 0x7e4   :  { %3823 = vmatmul.mubr.bf16.vlgmr.msra.gmra.mrb[72].mxu0 %v3629_v58  ;;  %6225 = vmatmul.mubr.bf16.vlgmr.msra.gmra.mrb[80].mxu1 %v3629_v58  ;;  %v37_v58 = vsub.s32 2, %v28_v40 }
 0x7e5   :  { %4039 = vmatpush1.bf16.msra.mxu1 %v8113_v55  ;;  %6229 = vmatpush3.bf16.msra.mxu0 %v8118_v57 }
 0x7e6   :  { %4040 = vmatprep.subr.bf16.mxu1 %v8123_v59  ;;  %6230 = vmatprep.subr.bf16.mxu0 %v6832_v0 }
 0x7e7   :  { %4070 = vmatprep.mubr.bf16.mxu1 %v6834_v7  ;;  %6244 = vmatprep.mubr.msk.bf16.mxu0 %vm6833_vm0, %v6832_v0 }
 0x7e9   :  { %4041 = vmatpush1.bf16.msra.mxu1 %v8129_v50  ;;  %6231 = vmatpush3.bf16.msra.mxu0 %v8135_v60 }
 0x7ea   :  { %4042 = vmatprep.subr.bf16.mxu1 %v8141_v61  ;;  %6232 = vmatprep.subr.bf16.mxu0 %v6832_v0 }
 0x7ed   :  { %4043 = vmatpush1.bf16.msra.mxu1 %v8151_v62  ;;  %6233 = vmatpush3.bf16.msra.mxu0 %v8157_v63 }
 0x7ee   :  { %4044 = vmatprep.subr.bf16.mxu1 %v8163_v1  ;;  %6234 = vmatprep.subr.bf16.mxu0 %v6832_v0 }
 0x7f1   :  { %4045 = vmatpush1.bf16.msra.mxu1 %v8170_v2  ;;  %6235 = vmatpush3.bf16.msra.mxu0 %v8176_v3 }
 0x7f2   :  { %4046 = vmatprep.subr.bf16.mxu1 %v8182_v4  ;;  %6236 = vmatprep.subr.bf16.mxu0 %v6832_v0 }
 0x7f5   :  { %4047 = vmatpush1.bf16.msra.mxu1 %v8189_v56  ;;  %6237 = vmatpush3.bf16.msra.mxu0 %v8195_v5 }
 0x7f6   :  { %4048 = vmatprep.subr.bf16.mxu1 %v8201_v6  ;;  %6238 = vmatprep.subr.bf16.mxu0 %v6832_v0 }
 0x7f9   :  { %4049 = vmatpush1.bf16.msra.mxu1 %v8208_v9  ;;  %6239 = vmatpush3.bf16.msra.mxu0 %v8214_v10 }
 0x7fa   :  { %4050 = vmatprep.subr.bf16.mxu1 %v8220_v13  ;;  %6240 = vmatprep.subr.bf16.mxu0 %v6832_v0 }
 0x7fd   :  { %4051 = vmatpush1.bf16.msra.mxu1 %v8227_v22  ;;  %6241 = vmatpush3.bf16.msra.mxu0 %v8233_v34 }
 0x7fe   :  { %4052 = vmatprep.subr.bf16.mxu1 %v8239_v14  ;;  %6242 = vmatprep.subr.bf16.mxu0 %v6832_v0 }
 0x801   :  { %4053 = vmatpush1.bf16.msra.mxu1 %v8246_v18  ;;  %6243 = vmatpush3.bf16.msra.mxu0 %v8252_v19 }
 0x802   :  { %4143 = vmatprep.subr.bf16.mxu0 %v8104_v28  ;;  %6248 = vmatprep.subr.bf16.mxu1 %v6832_v0 }
 0x804   :  { %4071 = vmatmul.mubr.bf16.vlgmr.msra.gmra.mrb[8].mxu1 %v6834_v7  ;;  %6245 = vmatmul.mubr.bf16.vlgmr.msra.gmra.mrb[76].mxu0 %v6834_v7 }
 0x805   :  { %4144 = vmatpush1.bf16.msra.mxu0 %v8113_v55  ;;  %6249 = vmatpush3.bf16.msra.mxu1 %v8118_v57 }
 0x806   :  { %4145 = vmatprep.subr.bf16.mxu0 %v8123_v59  ;;  %6250 = vmatprep.subr.bf16.mxu1 %v6832_v0 }
 0x807   :  { %4175 = vmatprep.mubr.bf16.mxu0 %v6834_v7  ;;  %6264 = vmatprep.mubr.msk.bf16.mxu1 %vm6833_vm0, %v6832_v0 }
 0x809   :  { %4146 = vmatpush1.bf16.msra.mxu0 %v8129_v50  ;;  %6251 = vmatpush3.bf16.msra.mxu1 %v8135_v60 }
 0x80a   :  { %4147 = vmatprep.subr.bf16.mxu0 %v8141_v61  ;;  %6252 = vmatprep.subr.bf16.mxu1 %v6832_v0 }
 0x80d   :  { %4148 = vmatpush1.bf16.msra.mxu0 %v8151_v62  ;;  %6253 = vmatpush3.bf16.msra.mxu1 %v8157_v63 }
 0x80e   :  { %4149 = vmatprep.subr.bf16.mxu0 %v8163_v1  ;;  %6254 = vmatprep.subr.bf16.mxu1 %v6832_v0 }
 0x811   :  { %4150 = vmatpush1.bf16.msra.mxu0 %v8170_v2  ;;  %6255 = vmatpush3.bf16.msra.mxu1 %v8176_v3 }
 0x812   :  { %4151 = vmatprep.subr.bf16.mxu0 %v8182_v4  ;;  %6256 = vmatprep.subr.bf16.mxu1 %v6832_v0 }
 0x815   :  { %4152 = vmatpush1.bf16.msra.mxu0 %v8189_v56  ;;  %6257 = vmatpush3.bf16.msra.mxu1 %v8195_v5 }
 0x816   :  { %4153 = vmatprep.subr.bf16.mxu0 %v8201_v6  ;;  %6258 = vmatprep.subr.bf16.mxu1 %v6832_v0 }
 0x819   :  { %4154 = vmatpush1.bf16.msra.mxu0 %v8208_v9  ;;  %6259 = vmatpush3.bf16.msra.mxu1 %v8214_v10 }
 0x81a   :  { %4155 = vmatprep.subr.bf16.mxu0 %v8220_v13  ;;  %6260 = vmatprep.subr.bf16.mxu1 %v6832_v0 }
 0x81d   :  { %4156 = vmatpush1.bf16.msra.mxu0 %v8227_v22  ;;  %6261 = vmatpush3.bf16.msra.mxu1 %v8233_v34 }
 0x81e   :  { %4157 = vmatprep.subr.bf16.mxu0 %v8239_v14  ;;  %6262 = vmatprep.subr.bf16.mxu1 %v6832_v0 }
 0x821   :  { %4158 = vmatpush1.bf16.msra.mxu0 %v8246_v18  ;;  %6263 = vmatpush3.bf16.msra.mxu1 %v8252_v19 }
 0x822   :  { %4248 = vmatprep.subr.bf16.mxu1 %v8104_v28  ;;  %6268 = vmatprep.subr.bf16.mxu0 %v6832_v0 }
 0x8b7   :  { %v8297_v27 = vpop.f32.mrb[80].mxu1 }
 0x8b8   :  { %v6226_v15 = vpop.f32.mrb[81].mxu1 }
 0x8b9   :  { %v3868_v30 = vpop.f32.mrb[82].mxu1  ;;  %v8311_v15 = vrot.slane %v42_v16, %v37_v58 }
 0x8ba   :  { %v6227_v8 = vpop.f32.mrb[83].mxu1  ;;  %v8313_v30 = vrot.slane %v25_v17, %v37_v58 }
 0x8bc   :  { %v535_v20 = vadd.f32 %v7191_v32, %v8313_v30 }
 0x8d7   :  { %v4072_v42 = vpop.f32.mrb[8].mxu1  ;;  %v4113_v43 = vpop.f32.mrb[76].mxu0 }
 0x8d8   :  { %v6409_v23 = vadd.f32 %v8305_v36, %v4072_v42  ;;  %v4074_v35 = vpop.f32.mrb[9].mxu1  ;;  %v6246_v38 = vpop.f32.mrb[77].mxu0  ;;  %v4114_v8 = vadd.f32 %v4113_v43, %v8311_v15 }
 0x8d9   :  { %v4076_v44 = vpop.f32.mrb[10].mxu1  ;;  %v4116_v45 = vpop.f32.mrb[78].mxu0  ;;  %v6411_v51 = vadd.f32 %v8308_v49, %v4074_v35 }
 0x8da   :  { %v5480_v46 = vmul.f32 -1.442695, %v6409_v23  ;;  %v4077_v47 = vpop.f32.mrb[11].mxu1  ;;  %v6247_v48 = vpop.f32.mrb[79].mxu0 }
 0x8db   :  { %v5481_v52 = vmul.f32 -1.442695, %v6411_v51 }
 0x8dc   :  { %6747 = vpow2.f32 %v5480_v46 }
 0x8dd   :  { %6749 = vpow2.f32 %v5481_v52 }
 0x8e6   :  { %v6748_v53 = vpop.eup %6747 }
 0x8e7   :  { %v4127_v54 = vadd.f32 1.0, %v6748_v53  ;;  %v6750_v12 = vpop.eup %6749 }
 0x8e8   :  { %v4128_v37 = vadd.f32 1.0, %v6750_v12 }
 0x8e9   :  { %6751 = vrcp.f32 %v4127_v54 }
 0x8f3   :  { %v6752_v11 = vpop.eup %6751 }
 0x8f4   :  { %v4133_v21 = vmul.f32 %v6752_v11, %v4114_v8 }
 0x8f6   :  { %v4134_v42 = vadd.f32 %v4133_v21, %v535_v20  ;;  %v1010_v20 = vadd.f32 %v7322_v39, %v8313_v30 }
 0x8f8   :  { %6753 = vtanh.f32 %v4134_v42 }
 0x8f9   :  { %6755 = vrcp.f32 %v4128_v37 }
 0x902   :  { %v6754_v23 = vpop.eup %6753 }
 0x903   :  { %v4136_v25 = vsub.f32 0.0, %v6754_v23  ;;  %v6756_v26 = vpop.eup %6755 }
 0x905   :  { %v4137_v40 = vmul.f32 %v6756_v26, %v4136_v25 }
 0x907   :  { %v8318_v16 = vadd.f32 %v6754_v23, %v4137_v40 }
 0x909   :  { %v4142_v17 = vpack.c.bf16 %v8318_v16, %v8318_v16 }
 0x90b   :  { %4176 = vmatmul.mubr.bf16.vlgmr.msra.gmra.mrb[12].mxu0 %v4142_v17  ;;  %6265 = vmatmul.mubr.bf16.vlgmr.msra.gmra.mrb[84].mxu1 %v4142_v17 }
 0x90c   :  { %4249 = vmatpush1.bf16.msra.mxu1 %v8113_v55  ;;  %6269 = vmatpush3.bf16.msra.mxu0 %v8118_v57 }
 0x90d   :  { %4250 = vmatprep.subr.bf16.mxu1 %v8123_v59  ;;  %6270 = vmatprep.subr.bf16.mxu0 %v6832_v0 }
 0x90e   :  { %4280 = vmatprep.mubr.bf16.mxu1 %v6834_v7  ;;  %6284 = vmatprep.mubr.msk.bf16.mxu0 %vm6833_vm0, %v6832_v0 }
 0x910   :  { %4251 = vmatpush1.bf16.msra.mxu1 %v8129_v50  ;;  %6271 = vmatpush3.bf16.msra.mxu0 %v8135_v60 }
 0x911   :  { %4252 = vmatprep.subr.bf16.mxu1 %v8141_v61  ;;  %6272 = vmatprep.subr.bf16.mxu0 %v6832_v0 }
 0x914   :  { %4253 = vmatpush1.bf16.msra.mxu1 %v8151_v62  ;;  %6273 = vmatpush3.bf16.msra.mxu0 %v8157_v63 }
 0x915   :  { %4254 = vmatprep.subr.bf16.mxu1 %v8163_v1  ;;  %6274 = vmatprep.subr.bf16.mxu0 %v6832_v0 }
 0x918   :  { %4255 = vmatpush1.bf16.msra.mxu1 %v8170_v2  ;;  %6275 = vmatpush3.bf16.msra.mxu0 %v8176_v3 }
 0x919   :  { %4256 = vmatprep.subr.bf16.mxu1 %v8182_v4  ;;  %6276 = vmatprep.subr.bf16.mxu0 %v6832_v0 }
 0x91c   :  { %4257 = vmatpush1.bf16.msra.mxu1 %v8189_v56  ;;  %6277 = vmatpush3.bf16.msra.mxu0 %v8195_v5 }
 0x91d   :  { %4258 = vmatprep.subr.bf16.mxu1 %v8201_v6  ;;  %6278 = vmatprep.subr.bf16.mxu0 %v6832_v0 }
 0x920   :  { %4259 = vmatpush1.bf16.msra.mxu1 %v8208_v9  ;;  %6279 = vmatpush3.bf16.msra.mxu0 %v8214_v10 }
 0x921   :  { %4260 = vmatprep.subr.bf16.mxu1 %v8220_v13  ;;  %6280 = vmatprep.subr.bf16.mxu0 %v6832_v0 }
 0x924   :  { %4261 = vmatpush1.bf16.msra.mxu1 %v8227_v22  ;;  %6281 = vmatpush3.bf16.msra.mxu0 %v8233_v34 }
 0x925   :  { %4262 = vmatprep.subr.bf16.mxu1 %v8239_v14  ;;  %6282 = vmatprep.subr.bf16.mxu0 %v6832_v0 }
 0x928   :  { %4263 = vmatpush1.bf16.msra.mxu1 %v8246_v18  ;;  %6283 = vmatpush3.bf16.msra.mxu0 %v8252_v19 }
 0x929   :  { %4353 = vmatprep.subr.bf16.mxu0 %v8104_v28  ;;  %6288 = vmatprep.subr.bf16.mxu1 %v6832_v0 }
 0x9de   :  { %v4177_v32 = vpop.f32.mrb[12].mxu0  ;;  %v4218_v43 = vpop.f32.mrb[84].mxu1 }
 0x9df   :  { %v6413_v35 = vadd.f32 %v8305_v36, %v4177_v32  ;;  %v4179_v38 = vpop.f32.mrb[13].mxu0  ;;  %v6266_v44 = vpop.f32.mrb[85].mxu1  ;;  %v4219_v12 = vadd.f32 %v4218_v43, %v8311_v15 }
 0x9e0   :  { %v4181_v45 = vpop.f32.mrb[14].mxu0  ;;  %v4221_v46 = vpop.f32.mrb[86].mxu1  ;;  %v6415_v52 = vadd.f32 %v8308_v49, %v4179_v38 }
 0x9e1   :  { %v5482_v47 = vmul.f32 -1.442695, %v6413_v35  ;;  %v4182_v48 = vpop.f32.mrb[15].mxu0  ;;  %v6267_v51 = vpop.f32.mrb[87].mxu1 }
 0x9e2   :  { %v5483_v53 = vmul.f32 -1.442695, %v6415_v52 }
 0x9e3   :  { %6757 = vpow2.f32 %v5482_v47 }
 0x9e4   :  { %6759 = vpow2.f32 %v5483_v53 }
 0x9ed   :  { %v6758_v54 = vpop.eup %6757 }
 0x9ee   :  { %v4232_v58 = vadd.f32 1.0, %v6758_v54  ;;  %v6760_v8 = vpop.eup %6759 }
 0x9ef   :  { %v4233_v42 = vadd.f32 1.0, %v6760_v8 }
 0x9f0   :  { %6761 = vrcp.f32 %v4232_v58 }
 0x9fa   :  { %v6762_v11 = vpop.eup %6761 }
 0x9fb   :  { %v4238_v21 = vmul.f32 %v6762_v11, %v4219_v12  ;;  %v1486_v11 = vadd.f32 %v7525_v24, %v8313_v30 }
 0x9fd   :  { %v4239_v37 = vadd.f32 %v4238_v21, %v1010_v20 }
 0x9ff   :  { %6763 = vtanh.f32 %v4239_v37 }
 0xa00   :  { %6765 = vrcp.f32 %v4233_v42 }
 0xa09   :  { %v6764_v23 = vpop.eup %6763 }
 0xa0a   :  { %v4241_v25 = vsub.f32 %v8318_v16, %v6764_v23  ;;  %v6766_v26 = vpop.eup %6765 }
 0xa0c   :  { %v4242_v40 = vmul.f32 %v6766_v26, %v4241_v25 }
 0xa0e   :  { %v8363_v17 = vadd.f32 %v6764_v23, %v4242_v40 }
 0xa10   :  { %v4247_v32 = vpack.c.bf16 %v8363_v17, %v8363_v17 }
 0xa12   :  { %4281 = vmatmul.mubr.bf16.vlgmr.msra.gmra.mrb[28].mxu1 %v4247_v32  ;;  %6285 = vmatmul.mubr.bf16.vlgmr.msra.gmra.mrb[80].mxu0 %v4247_v32 }
 0xa13   :  { %4354 = vmatpush1.bf16.msra.mxu0 %v8113_v55  ;;  %6289 = vmatpush3.bf16.msra.mxu1 %v8118_v57 }
 0xa14   :  { %4355 = vmatprep.subr.bf16.mxu0 %v8123_v59  ;;  %6290 = vmatprep.subr.bf16.mxu1 %v6832_v0 }
 0xa15   :  { %4385 = vmatprep.mubr.bf16.mxu0 %v6834_v7  ;;  %6304 = vmatprep.mubr.msk.bf16.mxu1 %vm6833_vm0, %v6832_v0 }
 0xa17   :  { %4356 = vmatpush1.bf16.msra.mxu0 %v8129_v50  ;;  %6291 = vmatpush3.bf16.msra.mxu1 %v8135_v60 }
 0xa18   :  { %4357 = vmatprep.subr.bf16.mxu0 %v8141_v61  ;;  %6292 = vmatprep.subr.bf16.mxu1 %v6832_v0 }
 0xa1b   :  { %4358 = vmatpush1.bf16.msra.mxu0 %v8151_v62  ;;  %6293 = vmatpush3.bf16.msra.mxu1 %v8157_v63 }
 0xa1c   :  { %4359 = vmatprep.subr.bf16.mxu0 %v8163_v1  ;;  %6294 = vmatprep.subr.bf16.mxu1 %v6832_v0 }
 0xa1f   :  { %4360 = vmatpush1.bf16.msra.mxu0 %v8170_v2  ;;  %6295 = vmatpush3.bf16.msra.mxu1 %v8176_v3 }
 0xa20   :  { %4361 = vmatprep.subr.bf16.mxu0 %v8182_v4  ;;  %6296 = vmatprep.subr.bf16.mxu1 %v6832_v0 }
 0xa23   :  { %4362 = vmatpush1.bf16.msra.mxu0 %v8189_v56  ;;  %6297 = vmatpush3.bf16.msra.mxu1 %v8195_v5 }
 0xa24   :  { %4363 = vmatprep.subr.bf16.mxu0 %v8201_v6  ;;  %6298 = vmatprep.subr.bf16.mxu1 %v6832_v0 }
 0xa27   :  { %4364 = vmatpush1.bf16.msra.mxu0 %v8208_v9  ;;  %6299 = vmatpush3.bf16.msra.mxu1 %v8214_v10 }
 0xa28   :  { %4365 = vmatprep.subr.bf16.mxu0 %v8220_v13  ;;  %6300 = vmatprep.subr.bf16.mxu1 %v6832_v0 }
 0xa2b   :  { %4366 = vmatpush1.bf16.msra.mxu0 %v8227_v22  ;;  %6301 = vmatpush3.bf16.msra.mxu1 %v8233_v34 }
 0xa2c   :  { %4367 = vmatprep.subr.bf16.mxu0 %v8239_v14  ;;  %6302 = vmatprep.subr.bf16.mxu1 %v6832_v0 }
 0xa2f   :  { %4368 = vmatpush1.bf16.msra.mxu0 %v8246_v18  ;;  %6303 = vmatpush3.bf16.msra.mxu1 %v8252_v19 }
 0xa30   :  { %4458 = vmatprep.subr.bf16.mxu1 %v8104_v28  ;;  %6308 = vmatprep.subr.bf16.mxu0 %v6832_v0 }
 0xae5   :  { %v4282_v39 = vpop.f32.mrb[28].mxu1  ;;  %v4323_v16 = vpop.f32.mrb[80].mxu0 }
 0xae6   :  { %v6417_v43 = vadd.f32 %v8305_v36, %v4282_v39  ;;  %v4284_v35 = vpop.f32.mrb[29].mxu1  ;;  %v6286_v38 = vpop.f32.mrb[81].mxu0  ;;  %v4324_v8 = vadd.f32 %v4323_v16, %v8311_v15 }
 0xae7   :  { %v4286_v44 = vpop.f32.mrb[30].mxu1  ;;  %v4326_v45 = vpop.f32.mrb[82].mxu0  ;;  %v6419_v51 = vadd.f32 %v8308_v49, %v4284_v35 }
 0xae8   :  { %v5484_v46 = vmul.f32 -1.442695, %v6417_v43  ;;  %v4287_v47 = vpop.f32.mrb[31].mxu1  ;;  %v6287_v48 = vpop.f32.mrb[83].mxu0 }
 0xae9   :  { %v5485_v52 = vmul.f32 -1.442695, %v6419_v51 }
 0xaea   :  { %6767 = vpow2.f32 %v5484_v46 }
 0xaeb   :  { %6769 = vpow2.f32 %v5485_v52 }
 0xaf4   :  { %v6768_v53 = vpop.eup %6767 }
 0xaf5   :  { %v4337_v54 = vadd.f32 1.0, %v6768_v53  ;;  %v6770_v58 = vpop.eup %6769 }
 0xaf6   :  { %v4338_v37 = vadd.f32 1.0, %v6770_v58 }
 0xaf7   :  { %6771 = vrcp.f32 %v4337_v54 }
 0xb01   :  { %v6772_v12 = vpop.eup %6771 }
 0xb02   :  { %v4343_v20 = vmul.f32 %v6772_v12, %v4324_v8  ;;  %v1962_v8 = vadd.f32 %v7648_v41, %v8313_v30 }
 0xb04   :  { %v4344_v21 = vadd.f32 %v4343_v20, %v1486_v11 }
 0xb06   :  { %6773 = vtanh.f32 %v4344_v21 }
 0xb07   :  { %6775 = vrcp.f32 %v4338_v37 }
 0xb10   :  { %v6774_v42 = vpop.eup %6773 }
 0xb11   :  { %v4346_v23 = vsub.f32 %v8363_v17, %v6774_v42  ;;  %v6776_v25 = vpop.eup %6775 }
 0xb13   :  { %v4347_v26 = vmul.f32 %v6776_v25, %v4346_v23 }
 0xb15   :  { %v8408_v40 = vadd.f32 %v6774_v42, %v4347_v26 }
 0xb17   :  { %v4352_v32 = vpack.c.bf16 %v8408_v40, %v8408_v40 }
 0xb19   :  { %4386 = vmatmul.mubr.bf16.vlgmr.msra.gmra.mrb[32].mxu0 %v4352_v32  ;;  %6305 = vmatmul.mubr.bf16.vlgmr.msra.gmra.mrb[88].mxu1 %v4352_v32 }
 0xb1a   :  { %4459 = vmatpush1.bf16.msra.mxu1 %v8113_v55  ;;  %6309 = vmatpush3.bf16.msra.mxu0 %v8118_v57 }
 0xb1b   :  { %4460 = vmatprep.subr.bf16.mxu1 %v8123_v59  ;;  %6310 = vmatprep.subr.bf16.mxu0 %v6832_v0 }
 0xb1c   :  { %4490 = vmatprep.mubr.bf16.mxu1 %v6834_v7  ;;  %6324 = vmatprep.mubr.msk.bf16.mxu0 %vm6833_vm0, %v6832_v0 }
 0xb1e   :  { %4461 = vmatpush1.bf16.msra.mxu1 %v8129_v50  ;;  %6311 = vmatpush3.bf16.msra.mxu0 %v8135_v60 }
 0xb1f   :  { %4462 = vmatprep.subr.bf16.mxu1 %v8141_v61  ;;  %6312 = vmatprep.subr.bf16.mxu0 %v6832_v0 }
 0xb22   :  { %4463 = vmatpush1.bf16.msra.mxu1 %v8151_v62  ;;  %6313 = vmatpush3.bf16.msra.mxu0 %v8157_v63 }
 0xb23   :  { %4464 = vmatprep.subr.bf16.mxu1 %v8163_v1  ;;  %6314 = vmatprep.subr.bf16.mxu0 %v6832_v0 }
 0xb26   :  { %4465 = vmatpush1.bf16.msra.mxu1 %v8170_v2  ;;  %6315 = vmatpush3.bf16.msra.mxu0 %v8176_v3 }
 0xb27   :  { %4466 = vmatprep.subr.bf16.mxu1 %v8182_v4  ;;  %6316 = vmatprep.subr.bf16.mxu0 %v6832_v0 }
 0xb2a   :  { %4467 = vmatpush1.bf16.msra.mxu1 %v8189_v56  ;;  %6317 = vmatpush3.bf16.msra.mxu0 %v8195_v5 }
 0xb2b   :  { %4468 = vmatprep.subr.bf16.mxu1 %v8201_v6  ;;  %6318 = vmatprep.subr.bf16.mxu0 %v6832_v0 }
 0xb2e   :  { %4469 = vmatpush1.bf16.msra.mxu1 %v8208_v9  ;;  %6319 = vmatpush3.bf16.msra.mxu0 %v8214_v10 }
 0xb2f   :  { %4470 = vmatprep.subr.bf16.mxu1 %v8220_v13  ;;  %6320 = vmatprep.subr.bf16.mxu0 %v6832_v0 }
 0xb32   :  { %4471 = vmatpush1.bf16.msra.mxu1 %v8227_v22  ;;  %6321 = vmatpush3.bf16.msra.mxu0 %v8233_v34 }
 0xb33   :  { %4472 = vmatprep.subr.bf16.mxu1 %v8239_v14  ;;  %6322 = vmatprep.subr.bf16.mxu0 %v6832_v0 }
 0xb36   :  { %4473 = vmatpush1.bf16.msra.mxu1 %v8246_v18  ;;  %6323 = vmatpush3.bf16.msra.mxu0 %v8252_v19 }
 0xb37   :  { %4563 = vmatprep.subr.bf16.mxu0 %v8104_v28  ;;  %6328 = vmatprep.subr.bf16.mxu1 %v6832_v0 }
 0xbec   :  { %v4387_v24 = vpop.f32.mrb[32].mxu0  ;;  %v4428_v17 = vpop.f32.mrb[88].mxu1 }
 0xbed   :  { %v6421_v39 = vadd.f32 %v8305_v36, %v4387_v24  ;;  %v4389_v16 = vpop.f32.mrb[33].mxu0  ;;  %v6306_v43 = vpop.f32.mrb[89].mxu1  ;;  %v4429_v54 = vadd.f32 %v4428_v17, %v8311_v15 }
 0xbee   :  { %v4391_v35 = vpop.f32.mrb[34].mxu0  ;;  %v4431_v38 = vpop.f32.mrb[90].mxu1  ;;  %v6423_v47 = vadd.f32 %v8308_v49, %v4389_v16 }
 0xbef   :  { %v5486_v44 = vmul.f32 -1.442695, %v6421_v39  ;;  %v4392_v45 = vpop.f32.mrb[35].mxu0  ;;  %v6307_v46 = vpop.f32.mrb[91].mxu1 }
 0xbf0   :  { %v5487_v48 = vmul.f32 -1.442695, %v6423_v47 }
 0xbf1   :  { %6777 = vpow2.f32 %v5486_v44 }
 0xbf2   :  { %6779 = vpow2.f32 %v5487_v48 }
 0xbfb   :  { %v6778_v51 = vpop.eup %6777 }
 0xbfc   :  { %v4442_v52 = vadd.f32 1.0, %v6778_v51  ;;  %v6780_v53 = vpop.eup %6779 }
 0xbfd   :  { %v4443_v20 = vadd.f32 1.0, %v6780_v53  ;;  %v2438_v53 = vadd.f32 %v7771_v33, %v8313_v30 }
 0xbfe   :  { %6781 = vrcp.f32 %v4442_v52 }
 0xc08   :  { %v6782_v58 = vpop.eup %6781 }
 0xc09   :  { %v4448_v12 = vmul.f32 %v6782_v58, %v4429_v54 }
 0xc0b   :  { %v4449_v11 = vadd.f32 %v4448_v12, %v1962_v8 }
 0xc0d   :  { %6783 = vtanh.f32 %v4449_v11 }
 0xc0e   :  { %6785 = vrcp.f32 %v4443_v20 }
 0xc17   :  { %v6784_v21 = vpop.eup %6783 }
 0xc18   :  { %v4451_v37 = vsub.f32 %v8408_v40, %v6784_v21  ;;  %v6786_v42 = vpop.eup %6785 }
 0xc1a   :  { %v4452_v23 = vmul.f32 %v6786_v42, %v4451_v37 }
 0xc1c   :  { %v8453_v25 = vadd.f32 %v6784_v21, %v4452_v23 }
 0xc1e   :  { %v4457_v26 = vpack.c.bf16 %v8453_v25, %v8453_v25 }
 0xc20   :  { %4491 = vmatmul.mubr.bf16.vlgmr.msra.gmra.mrb[48].mxu1 %v4457_v26  ;;  %6325 = vmatmul.mubr.bf16.vlgmr.msra.gmra.mrb[84].mxu0 %v4457_v26 }
 0xc21   :  { %4564 = vmatpush1.bf16.msra.mxu0 %v8113_v55  ;;  %6329 = vmatpush3.bf16.msra.mxu1 %v8118_v57 }
 0xc22   :  { %4565 = vmatprep.subr.bf16.mxu0 %v8123_v59  ;;  %6330 = vmatprep.subr.bf16.mxu1 %v6832_v0 }
 0xc23   :  { %4595 = vmatprep.mubr.bf16.mxu0 %v6834_v7  ;;  %6344 = vmatprep.mubr.msk.bf16.mxu1 %vm6833_vm0, %v6832_v0 }
 0xc25   :  { %4566 = vmatpush1.bf16.msra.mxu0 %v8129_v50  ;;  %6331 = vmatpush3.bf16.msra.mxu1 %v8135_v60 }
 0xc26   :  { %4567 = vmatprep.subr.bf16.mxu0 %v8141_v61  ;;  %6332 = vmatprep.subr.bf16.mxu1 %v6832_v0 }
 0xc29   :  { %4568 = vmatpush1.bf16.msra.mxu0 %v8151_v62  ;;  %6333 = vmatpush3.bf16.msra.mxu1 %v8157_v63 }
 0xc2a   :  { %4569 = vmatprep.subr.bf16.mxu0 %v8163_v1  ;;  %6334 = vmatprep.subr.bf16.mxu1 %v6832_v0 }
 0xc2d   :  { %4570 = vmatpush1.bf16.msra.mxu0 %v8170_v2  ;;  %6335 = vmatpush3.bf16.msra.mxu1 %v8176_v3 }
 0xc2e   :  { %4571 = vmatprep.subr.bf16.mxu0 %v8182_v4  ;;  %6336 = vmatprep.subr.bf16.mxu1 %v6832_v0 }
 0xc31   :  { %4572 = vmatpush1.bf16.msra.mxu0 %v8189_v56  ;;  %6337 = vmatpush3.bf16.msra.mxu1 %v8195_v5 }
 0xc32   :  { %4573 = vmatprep.subr.bf16.mxu0 %v8201_v6  ;;  %6338 = vmatprep.subr.bf16.mxu1 %v6832_v0 }
 0xc35   :  { %4574 = vmatpush1.bf16.msra.mxu0 %v8208_v9  ;;  %6339 = vmatpush3.bf16.msra.mxu1 %v8214_v10 }
 0xc36   :  { %4575 = vmatprep.subr.bf16.mxu0 %v8220_v13  ;;  %6340 = vmatprep.subr.bf16.mxu1 %v6832_v0 }
 0xc39   :  { %4576 = vmatpush1.bf16.msra.mxu0 %v8227_v22  ;;  %6341 = vmatpush3.bf16.msra.mxu1 %v8233_v34 }
 0xc3a   :  { %4577 = vmatprep.subr.bf16.mxu0 %v8239_v14  ;;  %6342 = vmatprep.subr.bf16.mxu1 %v6832_v0 }
 0xc3d   :  { %4578 = vmatpush1.bf16.msra.mxu0 %v8246_v18  ;;  %6343 = vmatpush3.bf16.msra.mxu1 %v8252_v19 }
 0xc3e   :  { %4668 = vmatprep.subr.bf16.mxu1 %v8104_v28  ;;  %6348 = vmatprep.subr.bf16.mxu0 %v6832_v0 }
 0xcf3   :  { %v4492_v41 = vpop.f32.mrb[48].mxu1  ;;  %v4533_v40 = vpop.f32.mrb[84].mxu0 }
 0xcf4   :  { %v6425_v32 = vadd.f32 %v8305_v36, %v4492_v41  ;;  %v4494_v24 = vpop.f32.mrb[49].mxu1  ;;  %v6326_v17 = vpop.f32.mrb[85].mxu0  ;;  %v4534_v51 = vadd.f32 %v4533_v40, %v8311_v15 }
 0xcf5   :  { %v4496_v39 = vpop.f32.mrb[50].mxu1  ;;  %v4536_v16 = vpop.f32.mrb[86].mxu0  ;;  %v6427_v44 = vadd.f32 %v8308_v49, %v4494_v24 }
 0xcf6   :  { %v5488_v43 = vmul.f32 -1.442695, %v6425_v32  ;;  %v4497_v35 = vpop.f32.mrb[51].mxu1  ;;  %v6327_v38 = vpop.f32.mrb[87].mxu0 }
 0xcf7   :  { %v5489_v45 = vmul.f32 -1.442695, %v6427_v44 }
 0xcf8   :  { %6787 = vpow2.f32 %v5488_v43 }
 0xcf9   :  { %6789 = vpow2.f32 %v5489_v45 }
 0xd02   :  { %v6788_v46 = vpop.eup %6787 }
 0xd03   :  { %v4547_v47 = vadd.f32 1.0, %v6788_v46  ;;  %v6790_v48 = vpop.eup %6789  ;;  %v2914_v46 = vadd.f32 %v7979_v29, %v8313_v30 }
 0xd04   :  { %v4548_v8 = vadd.f32 1.0, %v6790_v48 }
 0xd05   :  { %6791 = vrcp.f32 %v4547_v47 }
 0xd0f   :  { %v6792_v52 = vpop.eup %6791 }
 0xd10   :  { %v4553_v54 = vmul.f32 %v6792_v52, %v4534_v51 }
 0xd12   :  { %v4554_v58 = vadd.f32 %v4553_v54, %v2438_v53 }
 0xd14   :  { %6793 = vtanh.f32 %v4554_v58 }
 0xd15   :  { %6795 = vrcp.f32 %v4548_v8 }
 0xd1e   :  { %v6794_v12 = vpop.eup %6793 }
 0xd1f   :  { %v4556_v11 = vsub.f32 %v8453_v25, %v6794_v12  ;;  %v6796_v20 = vpop.eup %6795 }
 0xd21   :  { %v4557_v21 = vmul.f32 %v6796_v20, %v4556_v11 }
 0xd23   :  { %v8498_v37 = vadd.f32 %v6794_v12, %v4557_v21  ;;  %v6740_v21 = vld [vmem:[%s8638_s2 + $0x50] ss:$28 sps:$4 sm:$0xff]  }
 0xd25   :  { %v4562_v42 = vpack.c.bf16 %v8498_v37, %v8498_v37 }
 0xd27   :  { %4596 = vmatmul.mubr.bf16.vlgmr.msra.gmra.mrb[52].mxu0 %v4562_v42  ;;  %6345 = vmatmul.mubr.bf16.vlgmr.msra.gmra.mrb[92].mxu1 %v4562_v42  ;;  %v6742_v42 = vld [vmem:[%s8638_s2 + $0xc0] ss:$28 sps:$4 sm:$0xff]  }
 0xd28   :  { %4669 = vmatpush1.bf16.msra.mxu1 %v8113_v55  ;;  %6349 = vmatpush3.bf16.msra.mxu0 %v8118_v57 }
 0xd29   :  { %4670 = vmatprep.subr.bf16.mxu1 %v8123_v59  ;;  %6350 = vmatprep.subr.bf16.mxu0 %v6832_v0 }
 0xd2a   :  { %4700 = vmatprep.mubr.bf16.mxu1 %v6834_v7  ;;  %6364 = vmatprep.mubr.msk.bf16.mxu0 %vm6833_vm0, %v6832_v0 }
 0xd2c   :  { %4671 = vmatpush1.bf16.msra.mxu1 %v8129_v50  ;;  %6351 = vmatpush3.bf16.msra.mxu0 %v8135_v60 }
 0xd2d   :  { %4672 = vmatprep.subr.bf16.mxu1 %v8141_v61  ;;  %6352 = vmatprep.subr.bf16.mxu0 %v6832_v0 }
 0xd30   :  { %4673 = vmatpush1.bf16.msra.mxu1 %v8151_v62  ;;  %6353 = vmatpush3.bf16.msra.mxu0 %v8157_v63 }
 0xd31   :  { %4674 = vmatprep.subr.bf16.mxu1 %v8163_v1  ;;  %6354 = vmatprep.subr.bf16.mxu0 %v6832_v0 }
 0xd34   :  { %4675 = vmatpush1.bf16.msra.mxu1 %v8170_v2  ;;  %6355 = vmatpush3.bf16.msra.mxu0 %v8176_v3 }
 0xd35   :  { %4676 = vmatprep.subr.bf16.mxu1 %v8182_v4  ;;  %6356 = vmatprep.subr.bf16.mxu0 %v6832_v0 }
 0xd38   :  { %4677 = vmatpush1.bf16.msra.mxu1 %v8189_v56  ;;  %6357 = vmatpush3.bf16.msra.mxu0 %v8195_v5 }
 0xd39   :  { %4678 = vmatprep.subr.bf16.mxu1 %v8201_v6  ;;  %6358 = vmatprep.subr.bf16.mxu0 %v6832_v0 }
 0xd3c   :  { %4679 = vmatpush1.bf16.msra.mxu1 %v8208_v9  ;;  %6359 = vmatpush3.bf16.msra.mxu0 %v8214_v10 }
 0xd3d   :  { %4680 = vmatprep.subr.bf16.mxu1 %v8220_v13  ;;  %6360 = vmatprep.subr.bf16.mxu0 %v6832_v0 }
 0xd40   :  { %4681 = vmatpush1.bf16.msra.mxu1 %v8227_v22  ;;  %6361 = vmatpush3.bf16.msra.mxu0 %v8233_v34 }
 0xd41   :  { %4682 = vmatprep.subr.bf16.mxu1 %v8239_v14  ;;  %6362 = vmatprep.subr.bf16.mxu0 %v6832_v0 }
 0xd44   :  { %4683 = vmatpush1.bf16.msra.mxu1 %v8246_v18  ;;  %6363 = vmatpush3.bf16.msra.mxu0 %v8252_v19 }
 0xd45   :  { %4773 = vmatprep.subr.bf16.mxu0 %v8104_v28  ;;  %6368 = vmatprep.subr.bf16.mxu1 %v6832_v0 }
 0xdfa   :  { %v4597_v33 = vpop.f32.mrb[52].mxu0  ;;  %v4638_v23 = vpop.f32.mrb[92].mxu1 }
 0xdfb   :  { %v6429_v25 = vadd.f32 %v8305_v36, %v4597_v33  ;;  %v4599_v26 = vpop.f32.mrb[53].mxu0  ;;  %v6346_v41 = vpop.f32.mrb[93].mxu1  ;;  %v4639_v44 = vadd.f32 %v4638_v23, %v8311_v15  ;;  %v6743_v33 = vld [vmem:[%s8638_s2 + $0xf8] ss:$28 sps:$4 sm:$0xff]   ;;  %v6744_v23 = vld [vmem:[%s8638_s2 + $0x130] ss:$28 sps:$4 sm:$0xff]  }
 0xdfc   :  { %v4601_v40 = vpop.f32.mrb[54].mxu0  ;;  %v4641_v32 = vpop.f32.mrb[94].mxu1  ;;  %v6431_v16 = vadd.f32 %v8308_v49, %v4599_v26  ;;  %v6746_v26 = vld [vmem:[%s8638_s2 + $0x1a0] ss:$28 sps:$4 sm:$0xff]  }
 0xdfd   :  { %v5490_v24 = vmul.f32 -1.442695, %v6429_v25  ;;  %v4602_v17 = vpop.f32.mrb[55].mxu0  ;;  %v6347_v39 = vpop.f32.mrb[95].mxu1  ;;  %v6745_v25 = vld [vmem:[%s8638_s2 + $0x168] ss:$28 sps:$4 sm:$0xff]  }
 0xdfe   :  { %v5491_v43 = vmul.f32 -1.442695, %v6431_v16 }
 0xdff   :  { %6797 = vpow2.f32 %v5490_v24 }
 0xe00   :  { %6799 = vpow2.f32 %v5491_v43 }
 0xe09   :  { %v6798_v35 = vpop.eup %6797 }
 0xe0a   :  { %v4652_v38 = vadd.f32 1.0, %v6798_v35  ;;  %v6800_v28 = vpop.eup %6799 }
 0xe0b   :  { %v4653_v51 = vadd.f32 1.0, %v6800_v28 }
 0xe0c   :  { %6801 = vrcp.f32 %v4652_v38 }
 0xe16   :  { %v6802_v45 = vpop.eup %6801 }
 0xe17   :  { %v4658_v47 = vmul.f32 %v6802_v45, %v4639_v44 }
 0xe19   :  { %v4659_v48 = vadd.f32 %v4658_v47, %v2914_v46 }
 0xe1b   :  { %6803 = vtanh.f32 %v4659_v48 }
 0xe1c   :  { %6805 = vrcp.f32 %v4653_v51 }
 0xe25   :  { %v6804_v52 = vpop.eup %6803 }
 0xe26   :  { %v4661_v53 = vsub.f32 %v8498_v37, %v6804_v52  ;;  %v6806_v54 = vpop.eup %6805  ;;  %v6741_v37 = vld [vmem:[%s8638_s2 + $0x88] ss:$28 sps:$4 sm:$0xff]  }
 0xe28   :  { %v4662_v58 = vmul.f32 %v6806_v54, %v4661_v53 }
 0xe2a   :  { %v8543_v8 = vadd.f32 %v6804_v52, %v4662_v58 }
 0xe2c   :  { %v4667_v12 = vpack.c.bf16 %v8543_v8, %v8543_v8 }
 0xe2e   :  { %4701 = vmatmul.mubr.bf16.vlgmr.msra.gmra.mrb[68].mxu1 %v4667_v12  ;;  %6365 = vmatmul.mubr.bf16.vlgmr.msra.gmra.mrb[88].mxu0 %v4667_v12 }
 0xe2f   :  { %4774 = vmatpush1.bf16.msra.mxu0 %v8113_v55  ;;  %6369 = vmatpush3.bf16.msra.mxu1 %v8118_v57 }
 0xe30   :  { %4775 = vmatprep.subr.bf16.mxu0 %v8123_v59  ;;  %6370 = vmatprep.subr.bf16.mxu1 %v6832_v0 }
 0xe31   :  { %4805 = vmatprep.mubr.bf16.mxu0 %v6834_v7  ;;  %6384 = vmatprep.mubr.msk.bf16.mxu1 %vm6833_vm0, %v6832_v0 }
 0xe33   :  { %4776 = vmatpush1.bf16.msra.mxu0 %v8129_v50  ;;  %6371 = vmatpush3.bf16.msra.mxu1 %v8135_v60 }
 0xe34   :  { %4777 = vmatprep.subr.bf16.mxu0 %v8141_v61  ;;  %6372 = vmatprep.subr.bf16.mxu1 %v6832_v0 }
 0xe37   :  { %4778 = vmatpush1.bf16.msra.mxu0 %v8151_v62  ;;  %6373 = vmatpush3.bf16.msra.mxu1 %v8157_v63 }
 0xe38   :  { %4779 = vmatprep.subr.bf16.mxu0 %v8163_v1  ;;  %6374 = vmatprep.subr.bf16.mxu1 %v6832_v0 }
 0xe3b   :  { %4780 = vmatpush1.bf16.msra.mxu0 %v8170_v2  ;;  %6375 = vmatpush3.bf16.msra.mxu1 %v8176_v3 }
 0xe3c   :  { %4781 = vmatprep.subr.bf16.mxu0 %v8182_v4  ;;  %6376 = vmatprep.subr.bf16.mxu1 %v6832_v0 }
 0xe3f   :  { %4782 = vmatpush1.bf16.msra.mxu0 %v8189_v56  ;;  %6377 = vmatpush3.bf16.msra.mxu1 %v8195_v5 }
 0xe40   :  { %4783 = vmatprep.subr.bf16.mxu0 %v8201_v6  ;;  %6378 = vmatprep.subr.bf16.mxu1 %v6832_v0 }
 0xe43   :  { %4784 = vmatpush1.bf16.msra.mxu0 %v8208_v9  ;;  %6379 = vmatpush3.bf16.msra.mxu1 %v8214_v10  ;;  %v3390_v9 = vadd.f32 %v8107_v31, %v8313_v30  ;;  %v6739_v31 = vld [vmem:[%s8638_s2 + $0x18] ss:$28 sps:$4 sm:$0xff]  }
 0xe44   :  { %4785 = vmatprep.subr.bf16.mxu0 %v8220_v13  ;;  %6380 = vmatprep.subr.bf16.mxu1 %v6832_v0 }
 0xe47   :  { %4786 = vmatpush1.bf16.msra.mxu0 %v8227_v22  ;;  %6381 = vmatpush3.bf16.msra.mxu1 %v8233_v34 }
 0xe48   :  { %4787 = vmatprep.subr.bf16.mxu0 %v8239_v14  ;;  %6382 = vmatprep.subr.bf16.mxu1 %v6832_v0 }
 0xe4b   :  { %4788 = vmatpush1.bf16.msra.mxu0 %v8246_v18  ;;  %6383 = vmatpush3.bf16.msra.mxu1 %v8252_v19 }
 0xe4c   :  { %6388 = vmatprep.subr.bf16.mxu0 %v6832_v0 }
 0xf01   :  { %v4702_v7 = vpop.f32.mrb[68].mxu1  ;;  %v4743_v29 = vpop.f32.mrb[88].mxu0 }
 0xf02   :  { %v6433_v55 = vadd.f32 %v8305_v36, %v4702_v7  ;;  %v4704_v57 = vpop.f32.mrb[69].mxu1  ;;  %v6366_v59 = vpop.f32.mrb[89].mxu0  ;;  %v4744_v5 = vadd.f32 %v4743_v29, %v8311_v15 }
 0xf03   :  { %v4706_v50 = vpop.f32.mrb[70].mxu1  ;;  %v4746_v60 = vpop.f32.mrb[90].mxu0  ;;  %v6435_v1 = vadd.f32 %v8308_v49, %v4704_v57 }
 0xf04   :  { %v5492_v61 = vmul.f32 -1.442695, %v6433_v55  ;;  %v4707_v62 = vpop.f32.mrb[71].mxu1  ;;  %v6367_v63 = vpop.f32.mrb[91].mxu0 }
 0xf05   :  { %v5493_v2 = vmul.f32 -1.442695, %v6435_v1 }
 0xf06   :  { %6807 = vpow2.f32 %v5492_v61  ;;  %v5506_v61 = vld [vmem:[%s8640_s3 + $0x9] ss:$0 sm:$0xff] }
 0xf07   :  { %6809 = vpow2.f32 %v5493_v2 }
 0xf10   :  { %v6808_v3 = vpop.eup %6807 }
 0xf11   :  { %v4757_v4 = vadd.f32 1.0, %v6808_v3  ;;  %v6810_v56 = vpop.eup %6809 }
 0xf12   :  { %v4758_v22 = vadd.f32 1.0, %v6810_v56 }
 0xf13   :  { %6811 = vrcp.f32 %v4757_v4 }
 0xf1d   :  { %v6812_v6 = vpop.eup %6811 }
 0xf1e   :  { %v4763_v10 = vmul.f32 %v6812_v6, %v4744_v5 }
 0xf20   :  { %v4764_v13 = vadd.f32 %v4763_v10, %v3390_v9 }
 0xf22   :  { %6813 = vtanh.f32 %v4764_v13 }
 0xf23   :  { %6815 = vrcp.f32 %v4758_v22 }
 0xf2c   :  { %v6814_v34 = vpop.eup %6813 }
 0xf2d   :  { %v4766_v14 = vsub.f32 %v8543_v8, %v6814_v34  ;;  %v6816_v18 = vpop.eup %6815 }
 0xf2f   :  { %v4767_v19 = vmul.f32 %v6816_v18, %v4766_v14 }
 0xf31   :  { %v4768_v11 = vadd.f32 %v6814_v34, %v4767_v19 }
 0xf33   :  { %v4772_v20 = vpack.c.bf16 %v4768_v11, %v4768_v11 }
 0xf35   :  { %4806 = vmatmul.mubr.bf16.vlgmr.msra.gmra.mrb[72].mxu0 %v4772_v20  ;;  %6385 = vmatmul.mubr.bf16.vlgmr.msra.gmra.mrb[96].mxu1 %v4772_v20 }
 0xf36   :  { %6404 = vmatprep.mubr.msk.bf16.mxu0 %vm6833_vm0, %v6832_v0  ;;  %6389 = vmatpush3.bf16.msra.mxu0 %v6739_v31 }
 0xf37   :  { %6390 = vmatprep.subr.bf16.mxu0 %v6832_v0 }
 0xf3a   :  { %6391 = vmatpush3.bf16.msra.mxu0 %v6740_v21 }
 0xf3b   :  { %6392 = vmatprep.subr.bf16.mxu0 %v6832_v0 }
 0xf3e   :  { %6393 = vmatpush3.bf16.msra.mxu0 %v6741_v37 }
 0xf3f   :  { %6394 = vmatprep.subr.bf16.mxu0 %v6832_v0 }
 0xf42   :  { %6395 = vmatpush3.bf16.msra.mxu0 %v6742_v42 }
 0xf43   :  { %6396 = vmatprep.subr.bf16.mxu0 %v6832_v0 }
 0xf46   :  { %6397 = vmatpush3.bf16.msra.mxu0 %v6743_v33 }
 0xf47   :  { %6398 = vmatprep.subr.bf16.mxu0 %v6832_v0 }
 0xf4a   :  { %6399 = vmatpush3.bf16.msra.mxu0 %v6744_v23 }
 0xf4b   :  { %6400 = vmatprep.subr.bf16.mxu0 %v6832_v0 }
 0xf4e   :  { %6401 = vmatpush3.bf16.msra.mxu0 %v6745_v25 }
 0xf4f   :  { %6402 = vmatprep.subr.bf16.mxu0 %v6832_v0 }
 0xf52   :  { %6403 = vmatpush3.bf16.msra.mxu0 %v6746_v26 }
0x1008   :  { %v4807_v41 = vpop.f32.mrb[72].mxu0  ;;  %v4848_v40 = vpop.f32.mrb[96].mxu1 }
0x1009   :  { %v6437_v32 = vadd.f32 %v8305_v36, %v4807_v41  ;;  %v4809_v24 = vpop.f32.mrb[73].mxu0  ;;  %v6386_v17 = vpop.f32.mrb[97].mxu1  ;;  %v4849_v47 = vadd.f32 %v4848_v40, %v8311_v15  ;;  %v3866_v36 = vadd.f32 %v8297_v27, %v8313_v30  ;;  %v5496_v15 = vld [vmem:[%s8640_s3 + $0x7] ss:$0 sm:$0xff]  ;;  %v5505_v30 = vld [vmem:[%s8640_s3 + $0x8] ss:$0 sm:$0xff] }
0x100a   :  { %v4811_v39 = vpop.f32.mrb[74].mxu0  ;;  %v4851_v16 = vpop.f32.mrb[98].mxu1  ;;  %v6439_v28 = vadd.f32 %v8308_v49, %v4809_v24 }
0x100b   :  { %v5494_v43 = vmul.f32 -1.442695, %v6437_v32  ;;  %v4812_v35 = vpop.f32.mrb[75].mxu0  ;;  %v6387_v38 = vpop.f32.mrb[99].mxu1 }
0x100c   :  { %v5495_v44 = vmul.f32 -1.442695, %v6439_v28 }
0x100d   :  { %6817 = vpow2.f32 %v5494_v43 }
0x100e   :  { %6819 = vpow2.f32 %v5495_v44 }
0x1017   :  { %v6818_v45 = vpop.eup %6817 }
0x1018   :  { %v4862_v46 = vadd.f32 1.0, %v6818_v45  ;;  %v6820_v0 = vpop.eup %6819 }
0x1019   :  { %v4863_v53 = vadd.f32 1.0, %v6820_v0 }
0x101a   :  { %6821 = vrcp.f32 %v4862_v46 }
0x1024   :  { %v6822_v48 = vpop.eup %6821 }
0x1025   :  { %v4868_v51 = vmul.f32 %v6822_v48, %v4849_v47 }
0x1027   :  { %v4869_v52 = vadd.f32 %v4868_v51, %v3866_v36 }
0x1029   :  { %6823 = vtanh.f32 %v4869_v52 }
0x102a   :  { %6825 = vrcp.f32 %v4863_v53 }
0x1033   :  { %v6824_v54 = vpop.eup %6823 }
0x1034   :  { %v4871_v58 = vsub.f32 %v4768_v11, %v6824_v54  ;;  %v6826_v49 = vpop.eup %6825 }
0x1036   :  { %v4872_v8 = vmul.f32 %v6826_v49, %v4871_v58 }
0x1038   :  { %v4873_v12 = vadd.f32 %v6824_v54, %v4872_v8 }
0x103a   :  { %v4874_v7 = vpack.c.bf16 %v4873_v12, %v4873_v12 }
0x103c   :  { %6405 = vmatmul.mubr.bf16.vlgmr.msra.gmra.mrb[92].mxu0 %v4874_v7 }
0x110f   :  { %v4979_v29 = vpop.f32.mrb[92].mxu0 }
0x1110   :  { %v4980_v55 = vadd.f32 %v5496_v15, %v4979_v29  ;;  %v6406_v57 = vpop.f32.mrb[93].mxu0 }
0x1111   :  { %v4982_v27 = vpop.f32.mrb[94].mxu0 }
0x1112   :  { %v4985_v59 = vmax.f32 %v4980_v55, 0.0  ;;  %v6407_v50 = vpop.f32.mrb[95].mxu0 }
0x1114   :  { %v4992_v60 = vmul.f32 %v5505_v30, %v4985_v59 }
0x1116   :  { %4993 = vadd.xlane.f32.xlu0 %v4992_v60 }
0x11a3   :  { %v4994_v62 = vpop.xlane.xlu0 %4993 }
0x11a4   :  { %v5001_v63 = vadd.f32 %v5506_v61, %v4994_v62 }
0x11a6   :  { %5003 = vst.msk [vmem:[%s8641_s4] sm:$0xff] %vm5002_vm3, %v5001_v63 }

</bundles_post_ra>
